<compile_context>
chip_gen: v5e
topology: v5e:2x2
jax: 0.10.0
libtpu: 0.0.40
codegen_flags: <defaults>
</compile_context>

<pallas_src>
import math
from functools import partial

import jax
import jax.numpy as jnp
from jax.experimental import pallas as pl
from jax.experimental.pallas import tpu as pltpu


# ----------------------------------------------------------------------------
# Fused attention kernel (one batch element per grid step, channel-major C x L)
# ----------------------------------------------------------------------------
def _attention_kernel(x_ref, wqkv_ref, wout_ref, bout_ref, o_ref, *,
                      heads, dim_head):
    hidden = heads * dim_head
    L = x_ref.shape[2]

    x = x_ref[0].astype(jnp.bfloat16)          # (C, L)      natural NCHW layout
    wqkv = wqkv_ref[...]                       # (3*hidden, C) bf16, Q rows pre-scaled
    wout = wout_ref[...]                       # (C, hidden)   bf16
    bias = bout_ref[...]                       # (C, 1)        f32

    # qkv^T projection (1x1 conv == matmul over pixels), f32 accumulation.
    qkv_t = jnp.dot(wqkv, x, preferred_element_type=jnp.float32)   # (3*hidden, L)

    # Q block transposed once (aligned (hidden,L)->(L,hidden) f32 transpose on
    # the XLU); K/V stay channel-major.  Two wide bf16 casts, not 12 narrow ones.
    q_all = qkv_t[:hidden, :].T.astype(jnp.bfloat16)               # (L, hidden)
    kv = qkv_t[hidden:, :].astype(jnp.bfloat16)                    # (2*hidden, L)

    ones_row = jnp.ones((1, L), jnp.bfloat16)
    outs = []
    for h in range(heads):                     # static unroll (heads = 4)
        q = q_all[:, h * dim_head:(h + 1) * dim_head]                     # (L, dh)
        k_t = kv[h * dim_head:(h + 1) * dim_head, :]                      # (dh, L)
        v_t = kv[hidden + h * dim_head:hidden + (h + 1) * dim_head, :]    # (dh, L)

        # sim[i, j] = <q_i, k_j>   (softmax scale already folded into w_qkv)
        sim = jnp.dot(q, k_t, preferred_element_type=jnp.float32)         # (L, L)
        sim = sim - jnp.max(sim, axis=-1, keepdims=True)
        # TODO(synk): on v6e/v7x the exp could run in bf16 for ~2x EUP rate.
        p = jnp.exp(sim).astype(jnp.bfloat16)                             # (L, L)

        # Un-normalized PV on the MXU: out_t[d, i] = sum_j p[i, j] * v[d, j]
        out_t = jax.lax.dot_general(v_t, p, (((1,), (1,)), ((), ())),
                                    preferred_element_type=jnp.float32)   # (dh, L)
        # Softmax denominator also on the MXU (row-sums of p), oriented (1, L).
        denom = jax.lax.dot_general(ones_row, p, (((1,), (1,)), ((), ())),
                                    preferred_element_type=jnp.float32)   # (1, L)
        # Normalize AFTER PV: L*dh elements instead of L*L.
        outs.append(out_t * pl.reciprocal(denom, approx=True))            # (dh, L)

    # Single full-depth output projection (+ bias): (C,hidden)@(hidden,L).
    out_cat = jnp.concatenate(outs, axis=0).astype(jnp.bfloat16)          # (hidden, L)
    y = jnp.dot(wout, out_cat, preferred_element_type=jnp.float32) + bias # (C, L)
    o_ref[0] = y.astype(o_ref.dtype)


# ----------------------------------------------------------------------------
# Wrapper (free reshapes only — no HBM transpose / cast passes)
# ----------------------------------------------------------------------------
def attention_forward(params, x, *, heads=4, dim_head=32):
    B, C, H, W = x.shape
    L = H * W
    hidden = heads * dim_head
    # Lane-dense channel-major layout assumptions for this kernel.
    # TODO(synk): pad C / hidden / L to TPU tile multiples for arbitrary dims.
    assert C % 128 == 0 and hidden % 128 == 0 and L % 128 == 0

    x_flat = x.reshape(B, C, L)                # free reshape of NCHW (no copy)

    out = pl.pallas_call(
        partial(_attention_kernel, heads=heads, dim_head=dim_head),
        grid=(B,),
        out_shape=jax.ShapeDtypeStruct((B, C, L), jnp.bfloat16),
        in_specs=[
            pl.BlockSpec((1, C, L), lambda b: (b, 0, 0)),
            pl.BlockSpec((3 * hidden, C), lambda b: (0, 0)),
            pl.BlockSpec((C, hidden), lambda b: (0, 0)),
            pl.BlockSpec((C, 1), lambda b: (0, 0)),
        ],
        out_specs=pl.BlockSpec((1, C, L), lambda b: (b, 0, 0)),
        compiler_params=pltpu.CompilerParams(
            dimension_semantics=("parallel",)),
    )(x_flat, params["w_qkv"], params["w_out"], params["b_out"])

    return out.reshape(B, C, H, W)


# ----------------------------------------------------------------------------
# Parameter construction (deterministic) + pure-JAX f32 reference
# ----------------------------------------------------------------------------
def init_attention(key, dim, heads=4, dim_head=32):
    hidden = heads * dim_head
    scale = dim_head ** (-0.5)
    k1, k2 = jax.random.split(key)
    w_qkv = jax.random.normal(k1, (3 * hidden, dim), jnp.float32) / math.sqrt(dim)
    w_out = jax.random.normal(k2, (dim, hidden), jnp.float32) / math.sqrt(hidden)
    b_out = jnp.zeros((dim,), jnp.float32)
    raw = {"w_qkv": w_qkv, "w_out": w_out, "b_out": b_out}
    # Kernel-side params, prepared ONCE (not per forward pass):
    #  * softmax scale folded into the Q rows of w_qkv
    #  * bf16 casts for MXU operands
    #  * bias as a (dim, 1) column for channel-major broadcast
    w_qkv_scaled = w_qkv.at[:hidden, :].multiply(scale)
    kernel_params = {
        "w_qkv": w_qkv_scaled.astype(jnp.bfloat16),    # (3*hidden, dim)
        "w_out": w_out.astype(jnp.bfloat16),           # (dim, hidden)
        "b_out": b_out.reshape(dim, 1),                # (dim, 1) f32
    }
    return raw, kernel_params


def attention_ref(raw, x, *, heads=4, dim_head=32):
    """Plain-JAX f32 reference matching the PyTorch module exactly."""
    B, C, H, W = x.shape
    hidden = heads * dim_head
    scale = dim_head ** (-0.5)
    qkv = jnp.einsum('bchw,oc->bohw', x, raw["w_qkv"], precision='highest')
    q, k, v = jnp.split(qkv, 3, axis=1)
    def rearr(t):  # 'b (h c) x y -> b h c (x y)'
        return t.reshape(B, heads, dim_head, H * W)
    q, k, v = rearr(q) * scale, rearr(k), rearr(v)
    sim = jnp.einsum('bhdi,bhdj->bhij', q, k, precision='highest')
    sim = sim - jnp.max(sim, axis=-1, keepdims=True)
    attn = jax.nn.softmax(sim, axis=-1)
    out = jnp.einsum('bhij,bhdj->bhid', attn, v, precision='highest')
    out = out.transpose(0, 1, 3, 2).reshape(B, hidden, H, W)  # 'b h (x y) d -> b (h d) x y'
    y = jnp.einsum('bchw,oc->bohw', out, raw["w_out"], precision='highest')
    return y + raw["b_out"][None, :, None, None]


# ----------------------------------------------------------------------------
if __name__ == "__main__":
    heads, dim_head = 4, 32
    dim = 128                    # attention input channels (lane-dense)
    B, H, W = 2, 16, 16

    key = jax.random.PRNGKey(0)
    k_params, k_x = jax.random.split(key)
    raw, params = init_attention(k_params, dim, heads=heads, dim_head=dim_head)
    x = jax.random.normal(k_x, (B, dim, H, W), dtype=jnp.float32)   # NCHW

    fwd = jax.jit(partial(attention_forward, heads=heads, dim_head=dim_head))
    out = jax.block_until_ready(fwd(params, x))

    assert out.shape == (B, dim, H, W), out.shape
    assert bool(jnp.all(jnp.isfinite(out.astype(jnp.float32))))

    ref = attention_ref(raw, x, heads=heads, dim_head=dim_head)
    err = float(jnp.max(jnp.abs(out.astype(jnp.float32) - ref)))
    assert err < 7.5e-2, f"max abs err vs f32 reference = {err}"

    print("KERNEL_OK")
</pallas_src>

<mosaic_0001>
module attributes {stable_mosaic.version = 11 : i64} {
  func.func @_attention_kernel(%arg0: i32, %arg1: memref<1x128x256xf32, #tpu.memory_space<vmem>>, %arg2: memref<384x128xbf16, #tpu.memory_space<vmem>>, %arg3: memref<128x128xbf16, #tpu.memory_space<vmem>>, %arg4: memref<128x1xf32, #tpu.memory_space<vmem>>, %arg5: memref<1x128x256xbf16, #tpu.memory_space<vmem>>) attributes {dimension_semantics = [#tpu.dimension_semantics<parallel>], iteration_bounds = array<i64: 2>, scalar_prefetch = 0 : i64, scratch_operands = 0 : i64, tpu.core_type = #tpu.core_type<tc>, window_params = [{transform_indices = @transform_0, window_bounds = array<i64: 1, 128, 256>}, {pipeline_mode = #tpu.pipeline_mode<synchronous>, transform_indices = @transform_1, window_bounds = array<i64: 384, 128>}, {pipeline_mode = #tpu.pipeline_mode<synchronous>, transform_indices = @transform_2, window_bounds = array<i64: 128, 128>}, {pipeline_mode = #tpu.pipeline_mode<synchronous>, transform_indices = @transform_3, window_bounds = array<i64: 128, 1>}, {transform_indices = @transform_4, window_bounds = array<i64: 1, 128, 256>}]} {
    %c0 = arith.constant 0 : index
    %c0_0 = arith.constant 0 : index
    %c0_1 = arith.constant 0 : index
    %0 = vector.load %arg1[%c0, %c0_0, %c0_1] : memref<1x128x256xf32, #tpu.memory_space<vmem>>, vector<1x128x256xf32>
    %1 = vector.shape_cast %0 : vector<1x128x256xf32> to vector<128x256xf32>
    %2 = arith.truncf %1 : vector<128x256xf32> to vector<128x256xbf16>
    %c0_2 = arith.constant 0 : index
    %c0_3 = arith.constant 0 : index
    %3 = vector.load %arg2[%c0_2, %c0_3] : memref<384x128xbf16, #tpu.memory_space<vmem>>, vector<384x128xbf16>
    %c0_4 = arith.constant 0 : index
    %c0_5 = arith.constant 0 : index
    %4 = vector.load %arg3[%c0_4, %c0_5] : memref<128x128xbf16, #tpu.memory_space<vmem>>, vector<128x128xbf16>
    %c0_6 = arith.constant 0 : index
    %c0_7 = arith.constant 0 : index
    %5 = vector.load %arg4[%c0_6, %c0_7] : memref<128x1xf32, #tpu.memory_space<vmem>>, vector<128x1xf32>
    %cst = arith.constant dense<0.000000e+00> : vector<384x256xf32>
    %6 = tpu.matmul %3, %2, %cst {dimension_numbers = #tpu.dot_dimension_numbers<[1], [0], [0], [1], [0, 0, 1, 1], [], []>} : vector<384x128xbf16>, vector<128x256xbf16>, vector<384x256xf32> -> vector<384x256xf32>
    %7 = vector.extract_strided_slice %6 {offsets = [0, 0], sizes = [128, 256], strides = [1, 1]} : vector<384x256xf32> to vector<128x256xf32>
    %8 = tpu.transpose %7, [1, 0] : vector<128x256xf32> -> vector<256x128xf32>
    %9 = arith.truncf %8 : vector<256x128xf32> to vector<256x128xbf16>
    %10 = vector.extract_strided_slice %6 {offsets = [128, 0], sizes = [256, 256], strides = [1, 1]} : vector<384x256xf32> to vector<256x256xf32>
    %11 = arith.truncf %10 : vector<256x256xf32> to vector<256x256xbf16>
    %cst_8 = arith.constant 1.000000e+00 : bf16
    %12 = vector.broadcast %cst_8 : bf16 to vector<1x256xbf16>
    %13 = vector.extract_strided_slice %9 {offsets = [0, 0], sizes = [256, 32], strides = [1, 1]} : vector<256x128xbf16> to vector<256x32xbf16>
    %14 = vector.extract_strided_slice %11 {offsets = [0, 0], sizes = [32, 256], strides = [1, 1]} : vector<256x256xbf16> to vector<32x256xbf16>
    %15 = vector.extract_strided_slice %11 {offsets = [128, 0], sizes = [32, 256], strides = [1, 1]} : vector<256x256xbf16> to vector<32x256xbf16>
    %cst_9 = arith.constant dense<0.000000e+00> : vector<256x256xf32>
    %16 = tpu.matmul %13, %14, %cst_9 {dimension_numbers = #tpu.dot_dimension_numbers<[1], [0], [0], [1], [0, 0, 1, 1], [], []>} : vector<256x32xbf16>, vector<32x256xbf16>, vector<256x256xf32> -> vector<256x256xf32>
    %cst_10 = arith.constant dense<0xFF800000> : vector<256xf32>
    %17 = vector.multi_reduction <maximumf>, %16, %cst_10 [1] : vector<256x256xf32> to vector<256xf32>
    %18 = vector.shape_cast %17 : vector<256xf32> to vector<256x1xf32>
    %19 = vector.broadcast %18 : vector<256x1xf32> to vector<256x256xf32>
    %20 = arith.subf %16, %19 : vector<256x256xf32>
    %21 = math.exp %20 : vector<256x256xf32>
    %22 = arith.truncf %21 : vector<256x256xf32> to vector<256x256xbf16>
    %cst_11 = arith.constant dense<0.000000e+00> : vector<32x256xf32>
    %23 = tpu.matmul %15, %22, %cst_11 {dimension_numbers = #tpu.dot_dimension_numbers<[1], [1], [0], [0], [0, 0, 1, 0], [], []>} : vector<32x256xbf16>, vector<256x256xbf16>, vector<32x256xf32> -> vector<32x256xf32>
    %cst_12 = arith.constant dense<0.000000e+00> : vector<1x256xf32>
    %24 = tpu.matmul %12, %22, %cst_12 {dimension_numbers = #tpu.dot_dimension_numbers<[1], [1], [0], [0], [0, 0, 1, 0], [], []>} : vector<1x256xbf16>, vector<256x256xbf16>, vector<1x256xf32> -> vector<1x256xf32>
    %25 = tpu.reciprocal %24 {approx = true} : vector<1x256xf32> -> vector<1x256xf32>
    %26 = vector.broadcast %25 : vector<1x256xf32> to vector<32x256xf32>
    %27 = arith.mulf %23, %26 : vector<32x256xf32>
    %28 = vector.extract_strided_slice %9 {offsets = [0, 32], sizes = [256, 32], strides = [1, 1]} : vector<256x128xbf16> to vector<256x32xbf16>
    %29 = vector.extract_strided_slice %11 {offsets = [32, 0], sizes = [32, 256], strides = [1, 1]} : vector<256x256xbf16> to vector<32x256xbf16>
    %30 = vector.extract_strided_slice %11 {offsets = [160, 0], sizes = [32, 256], strides = [1, 1]} : vector<256x256xbf16> to vector<32x256xbf16>
    %cst_13 = arith.constant dense<0.000000e+00> : vector<256x256xf32>
    %31 = tpu.matmul %28, %29, %cst_13 {dimension_numbers = #tpu.dot_dimension_numbers<[1], [0], [0], [1], [0, 0, 1, 1], [], []>} : vector<256x32xbf16>, vector<32x256xbf16>, vector<256x256xf32> -> vector<256x256xf32>
    %cst_14 = arith.constant dense<0xFF800000> : vector<256xf32>
    %32 = vector.multi_reduction <maximumf>, %31, %cst_14 [1] : vector<256x256xf32> to vector<256xf32>
    %33 = vector.shape_cast %32 : vector<256xf32> to vector<256x1xf32>
    %34 = vector.broadcast %33 : vector<256x1xf32> to vector<256x256xf32>
    %35 = arith.subf %31, %34 : vector<256x256xf32>
    %36 = math.exp %35 : vector<256x256xf32>
    %37 = arith.truncf %36 : vector<256x256xf32> to vector<256x256xbf16>
    %cst_15 = arith.constant dense<0.000000e+00> : vector<32x256xf32>
    %38 = tpu.matmul %30, %37, %cst_15 {dimension_numbers = #tpu.dot_dimension_numbers<[1], [1], [0], [0], [0, 0, 1, 0], [], []>} : vector<32x256xbf16>, vector<256x256xbf16>, vector<32x256xf32> -> vector<32x256xf32>
    %cst_16 = arith.constant dense<0.000000e+00> : vector<1x256xf32>
    %39 = tpu.matmul %12, %37, %cst_16 {dimension_numbers = #tpu.dot_dimension_numbers<[1], [1], [0], [0], [0, 0, 1, 0], [], []>} : vector<1x256xbf16>, vector<256x256xbf16>, vector<1x256xf32> -> vector<1x256xf32>
    %40 = tpu.reciprocal %39 {approx = true} : vector<1x256xf32> -> vector<1x256xf32>
    %41 = vector.broadcast %40 : vector<1x256xf32> to vector<32x256xf32>
    %42 = arith.mulf %38, %41 : vector<32x256xf32>
    %43 = vector.extract_strided_slice %9 {offsets = [0, 64], sizes = [256, 32], strides = [1, 1]} : vector<256x128xbf16> to vector<256x32xbf16>
    %44 = vector.extract_strided_slice %11 {offsets = [64, 0], sizes = [32, 256], strides = [1, 1]} : vector<256x256xbf16> to vector<32x256xbf16>
    %45 = vector.extract_strided_slice %11 {offsets = [192, 0], sizes = [32, 256], strides = [1, 1]} : vector<256x256xbf16> to vector<32x256xbf16>
    %cst_17 = arith.constant dense<0.000000e+00> : vector<256x256xf32>
    %46 = tpu.matmul %43, %44, %cst_17 {dimension_numbers = #tpu.dot_dimension_numbers<[1], [0], [0], [1], [0, 0, 1, 1], [], []>} : vector<256x32xbf16>, vector<32x256xbf16>, vector<256x256xf32> -> vector<256x256xf32>
    %cst_18 = arith.constant dense<0xFF800000> : vector<256xf32>
    %47 = vector.multi_reduction <maximumf>, %46, %cst_18 [1] : vector<256x256xf32> to vector<256xf32>
    %48 = vector.shape_cast %47 : vector<256xf32> to vector<256x1xf32>
    %49 = vector.broadcast %48 : vector<256x1xf32> to vector<256x256xf32>
    %50 = arith.subf %46, %49 : vector<256x256xf32>
    %51 = math.exp %50 : vector<256x256xf32>
    %52 = arith.truncf %51 : vector<256x256xf32> to vector<256x256xbf16>
    %cst_19 = arith.constant dense<0.000000e+00> : vector<32x256xf32>
    %53 = tpu.matmul %45, %52, %cst_19 {dimension_numbers = #tpu.dot_dimension_numbers<[1], [1], [0], [0], [0, 0, 1, 0], [], []>} : vector<32x256xbf16>, vector<256x256xbf16>, vector<32x256xf32> -> vector<32x256xf32>
    %cst_20 = arith.constant dense<0.000000e+00> : vector<1x256xf32>
    %54 = tpu.matmul %12, %52, %cst_20 {dimension_numbers = #tpu.dot_dimension_numbers<[1], [1], [0], [0], [0, 0, 1, 0], [], []>} : vector<1x256xbf16>, vector<256x256xbf16>, vector<1x256xf32> -> vector<1x256xf32>
    %55 = tpu.reciprocal %54 {approx = true} : vector<1x256xf32> -> vector<1x256xf32>
    %56 = vector.broadcast %55 : vector<1x256xf32> to vector<32x256xf32>
    %57 = arith.mulf %53, %56 : vector<32x256xf32>
    %58 = vector.extract_strided_slice %9 {offsets = [0, 96], sizes = [256, 32], strides = [1, 1]} : vector<256x128xbf16> to vector<256x32xbf16>
    %59 = vector.extract_strided_slice %11 {offsets = [96, 0], sizes = [32, 256], strides = [1, 1]} : vector<256x256xbf16> to vector<32x256xbf16>
    %60 = vector.extract_strided_slice %11 {offsets = [224, 0], sizes = [32, 256], strides = [1, 1]} : vector<256x256xbf16> to vector<32x256xbf16>
    %cst_21 = arith.constant dense<0.000000e+00> : vector<256x256xf32>
    %61 = tpu.matmul %58, %59, %cst_21 {dimension_numbers = #tpu.dot_dimension_numbers<[1], [0], [0], [1], [0, 0, 1, 1], [], []>} : vector<256x32xbf16>, vector<32x256xbf16>, vector<256x256xf32> -> vector<256x256xf32>
    %cst_22 = arith.constant dense<0xFF800000> : vector<256xf32>
    %62 = vector.multi_reduction <maximumf>, %61, %cst_22 [1] : vector<256x256xf32> to vector<256xf32>
    %63 = vector.shape_cast %62 : vector<256xf32> to vector<256x1xf32>
    %64 = vector.broadcast %63 : vector<256x1xf32> to vector<256x256xf32>
    %65 = arith.subf %61, %64 : vector<256x256xf32>
    %66 = math.exp %65 : vector<256x256xf32>
    %67 = arith.truncf %66 : vector<256x256xf32> to vector<256x256xbf16>
    %cst_23 = arith.constant dense<0.000000e+00> : vector<32x256xf32>
    %68 = tpu.matmul %60, %67, %cst_23 {dimension_numbers = #tpu.dot_dimension_numbers<[1], [1], [0], [0], [0, 0, 1, 0], [], []>} : vector<32x256xbf16>, vector<256x256xbf16>, vector<32x256xf32> -> vector<32x256xf32>
    %cst_24 = arith.constant dense<0.000000e+00> : vector<1x256xf32>
    %69 = tpu.matmul %12, %67, %cst_24 {dimension_numbers = #tpu.dot_dimension_numbers<[1], [1], [0], [0], [0, 0, 1, 0], [], []>} : vector<1x256xbf16>, vector<256x256xbf16>, vector<1x256xf32> -> vector<1x256xf32>
    %70 = tpu.reciprocal %69 {approx = true} : vector<1x256xf32> -> vector<1x256xf32>
    %71 = vector.broadcast %70 : vector<1x256xf32> to vector<32x256xf32>
    %72 = arith.mulf %68, %71 : vector<32x256xf32>
    %73 = tpu.concatenate %27, %42, %57, %72 in 0 : vector<32x256xf32>, vector<32x256xf32>, vector<32x256xf32>, vector<32x256xf32> -> vector<128x256xf32>
    %74 = arith.truncf %73 : vector<128x256xf32> to vector<128x256xbf16>
    %cst_25 = arith.constant dense<0.000000e+00> : vector<128x256xf32>
    %75 = tpu.matmul %4, %74, %cst_25 {dimension_numbers = #tpu.dot_dimension_numbers<[1], [0], [0], [1], [0, 0, 1, 1], [], []>} : vector<128x128xbf16>, vector<128x256xbf16>, vector<128x256xf32> -> vector<128x256xf32>
    %76 = vector.broadcast %5 : vector<128x1xf32> to vector<128x256xf32>
    %77 = arith.addf %75, %76 : vector<128x256xf32>
    %78 = arith.truncf %77 : vector<128x256xf32> to vector<128x256xbf16>
    %c0_26 = arith.constant 0 : index
    %c0_27 = arith.constant 0 : index
    %c0_28 = arith.constant 0 : index
    %79 = vector.load %arg5[%c0_26, %c0_27, %c0_28] : memref<1x128x256xbf16, #tpu.memory_space<vmem>>, vector<1x128x256xbf16>
    %80 = vector.shape_cast %79 : vector<1x128x256xbf16> to vector<128x256xbf16>
    %81 = vector.shape_cast %78 : vector<128x256xbf16> to vector<1x128x256xbf16>
    tpu.vector_store %arg5[%c0_26, %c0_27, %c0_28], %81 {strides = array<i32>} : memref<1x128x256xbf16, #tpu.memory_space<vmem>>, vector<1x128x256xbf16>,
    return
  }
  func.func @transform_0(%arg0: i32) -> (i32, i32, i32) {
    %c0_i32 = arith.constant 0 : i32
    %c0_i32_0 = arith.constant 0 : i32
    %c0_i32_1 = arith.constant 0 : i32
    return %arg0, %c0_i32, %c0_i32_0 : i32, i32, i32
  }
  func.func @transform_1(%arg0: i32) -> (i32, i32) {
    %c0_i32 = arith.constant 0 : i32
    %c0_i32_0 = arith.constant 0 : i32
    %c0_i32_1 = arith.constant 0 : i32
    return %c0_i32, %c0_i32_0 : i32, i32
  }
  func.func @transform_2(%arg0: i32) -> (i32, i32) {
    %c0_i32 = arith.constant 0 : i32
    %c0_i32_0 = arith.constant 0 : i32
    %c0_i32_1 = arith.constant 0 : i32
    return %c0_i32, %c0_i32_0 : i32, i32
  }
  func.func @transform_3(%arg0: i32) -> (i32, i32) {
    %c0_i32 = arith.constant 0 : i32
    %c0_i32_0 = arith.constant 0 : i32
    %c0_i32_1 = arith.constant 0 : i32
    return %c0_i32, %c0_i32_0 : i32, i32
  }
  func.func @transform_4(%arg0: i32) -> (i32, i32, i32) {
    %c0_i32 = arith.constant 0 : i32
    %c0_i32_0 = arith.constant 0 : i32
    %c0_i32_1 = arith.constant 0 : i32
    return %arg0, %c0_i32, %c0_i32_0 : i32, i32, i32
  }
}

</mosaic_0001>

<bundles_post_ra>
// kernel: attention_forward.1
= control target key start
LH: loop header
LB: loop body
LE: loop exit
PB: predicated region body
PF: predicated region fallthrough
CT: control target
= control target key end

     0   :  { %s5167_s15 = smov 0   ;;  %s7370_s0 = inlined_call_operand.vmem [shape: f32[2,128,256], index: 0, kind: input, shape index: {}]   ;;  %s7371_s1 = inlined_call_operand.vmem [shape: bf16[384,128], index: 1, kind: input, shape index: {}]   ;;  %s7372_s2 = inlined_call_operand.vmem [shape: bf16[128,128], index: 2, kind: input, shape index: {}]   ;;  %s7373_s3 = inlined_call_operand.vmem [shape: f32[128,1], index: 3, kind: input, shape index: {}]   ;;  %s7374_s4 = inlined_call_operand.vmem [shape: bf16[2,128,256], index: 4, kind: output, shape index: {}]  }
   0x1 LB: > { %s4268_s16 = sadd.s32 4294967295, %s5135_s15   ;;  %p4272_p0 = scmp.ge.s32.totalorder %s5135_s15, 1  ;;  %s5135_s15 = sphi %s5167_s15, %s14_s15  }
   0x2   : > { %p162_p1 = scmp.lt.s32.totalorder %s5135_s15, 3 }
   0x4   : > { %p163_p2 = pnand %p4272_p0, %p162_p1 }
   0x6   : > { %166 = sbr.rel (%p163_p2) target bundleno = 3451 (0xd7b), region = 36 }
   0xb   : > { %p188_p3 = scmp.lt.s32.totalorder %s4268_s16, 1  ;;  %v4537_v48 = vld [vmem:[%s7371_s1] sm:$0xff]  ;;  %v4538_v49 = vld [vmem:[%s7371_s1 + $0x8] sm:$0xff]  ;;  %v4539_v50 = vld [vmem:[%s7371_s1 + $0x10] sm:$0xff]  ;;  %vm958_vm0 = vcmask 261120   ;;  %s5137_s21 = smov 96  }
   0xc   : > { %v4540_v51 = vld [vmem:[%s7371_s1 + $0x18] sm:$0xff]  ;;  %v4541_v52 = vld [vmem:[%s7371_s1 + $0x20] sm:$0xff]  ;;  %v4542_v53 = vld [vmem:[%s7371_s1 + $0x28] sm:$0xff]  ;;  %s5139_s22 = smov 64   ;;  %s5140_s23 = smov 32  }
   0xd   : > { %s7845_s16 = smov (!%p188_p3, %s4268_s16), 1  ;;  %v4543_v54 = vld [vmem:[%s7371_s1 + $0x30] sm:$0xff]  ;;  %v4544_v55 = vld [vmem:[%s7371_s1 + $0x38] sm:$0xff]  ;;  %v4545_v56 = vld [vmem:[%s7371_s1 + $0x40] sm:$0xff] }
   0xe   : > { %s4535_s17 = sshll.u32 %s7845_s16, 8  ;;  %v4546_v61 = vld [vmem:[%s7371_s1 + $0x48] sm:$0xff]  ;;  %s4536_s24 = sshll.u32 %s7845_s16, 7 }
   0xf   : > { %s5181_s20 = scalar_lea.vmem %s7370_s0, %s4535_s17  ;;  %s7349_s27 = scalar_lea.vmem %s7374_s4, %s4536_s24 }
  0x10   : > { %v228_v0 = vld [vmem:[%s5181_s20 + $0xe0] sm:$0xff]  ;;  %v230_v1 = vld [vmem:[%s5181_s20 + $0xf0] sm:$0xff]  ;;  %v229_v2 = vld [vmem:[%s5181_s20 + $0xe8] sm:$0xff] }
  0x11   : > { %v246_v3 = vpack.c.bf16 %v230_v1, %v228_v0  ;;  %v231_v4 = vld [vmem:[%s5181_s20 + $0xf8] sm:$0xff]  ;;  %v224_v5 = vld [vmem:[%s5181_s20 + $0xc0] sm:$0xff]  ;;  %v226_v6 = vld [vmem:[%s5181_s20 + $0xd0] sm:$0xff] }
  0x12   : > { %v247_v7 = vpack.c.bf16 %v231_v4, %v229_v2  ;;  %v225_v8 = vld [vmem:[%s5181_s20 + $0xc8] sm:$0xff]  ;;  %v227_v9 = vld [vmem:[%s5181_s20 + $0xd8] sm:$0xff]  ;;  %v244_v10 = vpack.c.bf16 %v226_v6, %v224_v5  ;;  %v220_v12 = vld [vmem:[%s5181_s20 + $0xa0] sm:$0xff] }
  0x13   : > { %472 = vmatpush.bf16.msra.mxu0 %v246_v3  ;;  %4569 = vmatpush.bf16.msra.mxu2 %v246_v3  ;;  %v245_v11 = vpack.c.bf16 %v227_v9, %v225_v8  ;;  %v222_v13 = vld [vmem:[%s5181_s20 + $0xb0] sm:$0xff]  ;;  %v221_v14 = vld [vmem:[%s5181_s20 + $0xa8] sm:$0xff]  ;;  %v223_v15 = vld [vmem:[%s5181_s20 + $0xb8] sm:$0xff] }
  0x14   : > { %601 = vmatpush.bf16.msra.mxu1 %v247_v7  ;;  %4577 = vmatpush.bf16.msra.mxu3 %v247_v7  ;;  %v242_v16 = vpack.c.bf16 %v222_v13, %v220_v12  ;;  %v243_v17 = vpack.c.bf16 %v223_v15, %v221_v14  ;;  %v216_v18 = vld [vmem:[%s5181_s20 + $0x80] sm:$0xff]  ;;  %v218_v19 = vld [vmem:[%s5181_s20 + $0x90] sm:$0xff]  ;;  %v217_v20 = vld [vmem:[%s5181_s20 + $0x88] sm:$0xff] }
  0x15   : > { %v219_v21 = vld [vmem:[%s5181_s20 + $0x98] sm:$0xff]  ;;  %v240_v22 = vpack.c.bf16 %v218_v19, %v216_v18  ;;  %v212_v24 = vld [vmem:[%s5181_s20 + $0x60] sm:$0xff]  ;;  %v214_v25 = vld [vmem:[%s5181_s20 + $0x70] sm:$0xff] }
  0x16   : > { %v241_v23 = vpack.c.bf16 %v219_v21, %v217_v20  ;;  %v213_v26 = vld [vmem:[%s5181_s20 + $0x68] sm:$0xff]  ;;  %v215_v27 = vld [vmem:[%s5181_s20 + $0x78] sm:$0xff]  ;;  %v238_v28 = vpack.c.bf16 %v214_v25, %v212_v24  ;;  %v208_v30 = vld [vmem:[%s5181_s20 + $0x40] sm:$0xff] }
  0x17   : > { %473 = vmatpush.bf16.msra.mxu0 %v244_v10  ;;  %4570 = vmatpush.bf16.msra.mxu2 %v244_v10  ;;  %v239_v29 = vpack.c.bf16 %v215_v27, %v213_v26  ;;  %v210_v31 = vld [vmem:[%s5181_s20 + $0x50] sm:$0xff]  ;;  %v209_v32 = vld [vmem:[%s5181_s20 + $0x48] sm:$0xff]  ;;  %v211_v33 = vld [vmem:[%s5181_s20 + $0x58] sm:$0xff] }
  0x18   : > { %602 = vmatpush.bf16.msra.mxu1 %v245_v11  ;;  %4578 = vmatpush.bf16.msra.mxu3 %v245_v11  ;;  %v236_v34 = vpack.c.bf16 %v210_v31, %v208_v30  ;;  %v237_v35 = vpack.c.bf16 %v211_v33, %v209_v32  ;;  %v204_v36 = vld [vmem:[%s5181_s20 + $0x20] sm:$0xff]  ;;  %v206_v37 = vld [vmem:[%s5181_s20 + $0x30] sm:$0xff]  ;;  %v205_v38 = vld [vmem:[%s5181_s20 + $0x28] sm:$0xff] }
  0x19   : > { %v207_v39 = vld [vmem:[%s5181_s20 + $0x38] sm:$0xff]  ;;  %v234_v40 = vpack.c.bf16 %v206_v37, %v204_v36  ;;  %v200_v42 = vld [vmem:[%s5181_s20] sm:$0xff]  ;;  %v202_v43 = vld [vmem:[%s5181_s20 + $0x10] sm:$0xff] }
  0x1a   : > { %v235_v41 = vpack.c.bf16 %v207_v39, %v205_v38  ;;  %v201_v44 = vld [vmem:[%s5181_s20 + $0x8] sm:$0xff]  ;;  %v203_v45 = vld [vmem:[%s5181_s20 + $0x18] sm:$0xff]  ;;  %v232_v46 = vpack.c.bf16 %v202_v43, %v200_v42 }
  0x1b   : > { %474 = vmatpush.bf16.msra.mxu0 %v242_v16  ;;  %4571 = vmatpush.bf16.msra.mxu2 %v242_v16  ;;  %v233_v47 = vpack.c.bf16 %v203_v45, %v201_v44  ;;  %v4560_v27 = vld [vmem:[%s7371_s1 + $0xb8] sm:$0xff] }
  0x1c   : > { %603 = vmatpush.bf16.msra.mxu1 %v243_v17  ;;  %4579 = vmatpush.bf16.msra.mxu3 %v243_v17 }
  0x1f   : > { %475 = vmatpush.bf16.msra.mxu0 %v240_v22  ;;  %4572 = vmatpush.bf16.msra.mxu2 %v240_v22  ;;  %v4559_v22 = vld [vmem:[%s7371_s1 + $0xb0] sm:$0xff] }
  0x20   : > { %604 = vmatpush.bf16.msra.mxu1 %v241_v23  ;;  %4580 = vmatpush.bf16.msra.mxu3 %v241_v23 }
  0x23   : > { %476 = vmatpush.bf16.msra.mxu0 %v238_v28  ;;  %4573 = vmatpush.bf16.msra.mxu2 %v238_v28 }
  0x24   : > { %605 = vmatpush.bf16.msra.mxu1 %v239_v29  ;;  %4581 = vmatpush.bf16.msra.mxu3 %v239_v29 }
  0x27   : > { %477 = vmatpush.bf16.msra.mxu0 %v236_v34  ;;  %4574 = vmatpush.bf16.msra.mxu2 %v236_v34 }
  0x28   : > { %606 = vmatpush.bf16.msra.mxu1 %v237_v35  ;;  %4582 = vmatpush.bf16.msra.mxu3 %v237_v35 }
  0x2b   : > { %478 = vmatpush.bf16.msra.mxu0 %v234_v40  ;;  %4575 = vmatpush.bf16.msra.mxu2 %v234_v40 }
  0x2c   : > { %607 = vmatpush.bf16.msra.mxu1 %v235_v41  ;;  %4583 = vmatpush.bf16.msra.mxu3 %v235_v41 }
  0x2f   : > { %479 = vmatpush.bf16.msra.mxu0 %v232_v46  ;;  %4576 = vmatpush.bf16.msra.mxu2 %v232_v46 }
  0x30   : > { %608 = vmatpush.bf16.msra.mxu1 %v233_v47  ;;  %4584 = vmatpush.bf16.msra.mxu3 %v233_v47 }
  0x32   : > { %480 = vmatmul.bf16.vlgmr.msra.gmra.mxu0 %v4537_v48  ;;  %590 = vmatmul.bf16.vlgmr.msra.gmra.mxu2 %v4559_v22 }
  0x33   : > { %609 = vmatmul.bf16.vlgmr.msra.gmra.mxu1 %v4537_v48  ;;  %719 = vmatmul.bf16.vlgmr.msra.gmra.mxu3 %v4559_v22 }
  0x42   : > { %485 = vmatmul.bf16.gmra.mxu0 %v4538_v49  ;;  %595 = vmatmul.bf16.gmra.mxu2 %v4560_v27 }
  0x43   : > { %614 = vmatmul.bf16.gmra.mxu1 %v4538_v49  ;;  %724 = vmatmul.bf16.gmra.mxu3 %v4560_v27 }
  0x52   : > { %490 = vmatmul.bf16.gmra.mxu0 %v4539_v50 }
  0x53   : > { %619 = vmatmul.bf16.gmra.mxu1 %v4539_v50 }
  0x62   : > { %495 = vmatmul.bf16.gmra.mxu0 %v4540_v51 }
  0x63   : > { %624 = vmatmul.bf16.gmra.mxu1 %v4540_v51 }
  0x72   : > { %500 = vmatmul.bf16.gmra.mxu0 %v4541_v52 }
  0x73   : > { %629 = vmatmul.bf16.gmra.mxu1 %v4541_v52 }
  0x82   : > { %505 = vmatmul.bf16.gmra.mxu0 %v4542_v53 }
  0x83   : > { %634 = vmatmul.bf16.gmra.mxu1 %v4542_v53 }
  0x92   : > { %510 = vmatmul.bf16.gmra.mxu0 %v4543_v54 }
  0x93   : > { %639 = vmatmul.bf16.gmra.mxu1 %v4543_v54 }
  0xa2   : > { %515 = vmatmul.bf16.gmra.mxu0 %v4544_v55 }
  0xa3   : > { %644 = vmatmul.bf16.gmra.mxu1 %v4544_v55 }
  0xaf   : > { %v481_v57 = vpop.f32.mrf.mxu0 }
  0xb0   : > { %v610_v58 = vpop.f32.mrf.mxu1  ;;  %730 = vxpose.xlu0.b32.start [1/16] %v481_v57, 128 }
  0xb1   : > { %762 = vxpose.xlu1.b32.start [1/16] %v610_v58, 128 }
  0xb2   : > { %520 = vmatmul.bf16.gmra.mxu0 %v4545_v56 }
  0xb3   : > { %649 = vmatmul.bf16.gmra.mxu1 %v4545_v56 }
  0xb5   : > { %v591_v22 = vpop.f32.mrf.mxu2 }
  0xb7   : > { %v483_v59 = vpop.f32.mrf.mxu0 }
  0xb8   : > { %v612_v60 = vpop.f32.mrf.mxu1  ;;  %731 = vxpose.xlu0.b32.cont [2/16] %v483_v59, 128 }
  0xb9   : > { %763 = vxpose.xlu1.b32.cont [2/16] %v612_v60, 128 }
  0xbd   : > { %v5283_v27 = vpop.f32.mrf.mxu2 }
  0xbe   : > { %7525 = vst [vmem:[#allocation8_spill] sm:$0xff] %v5283_v27 }
  0xbf   : > { %v486_v62 = vpop.f32.mrf.mxu0 }
  0xc0   : > { %v615_v63 = vpop.f32.mrf.mxu1  ;;  %732 = vxpose.xlu0.b32.cont [3/16] %v486_v62, 128 }
  0xc1   : > { %764 = vxpose.xlu1.b32.cont [3/16] %v615_v63, 128 }
  0xc2   : > { %525 = vmatmul.bf16.gmra.mxu0 %v4546_v61 }
  0xc3   : > { %654 = vmatmul.bf16.gmra.mxu1 %v4546_v61 }
  0xc7   : > { %v488_v0 = vpop.f32.mrf.mxu0 }
  0xc8   : > { %v617_v1 = vpop.f32.mrf.mxu1  ;;  %733 = vxpose.xlu0.b32.cont [4/16] %v488_v0, 128 }
  0xc9   : > { %765 = vxpose.xlu1.b32.cont [4/16] %v617_v1, 128 }
  0xcf   : > { %v491_v2 = vpop.f32.mrf.mxu0 }
  0xd0   : > { %v620_v3 = vpop.f32.mrf.mxu1  ;;  %734 = vxpose.xlu0.b32.cont [5/16] %v491_v2, 128 }
  0xd1   : > { %766 = vxpose.xlu1.b32.cont [5/16] %v620_v3, 128 }
  0xd7   : > { %v493_v4 = vpop.f32.mrf.mxu0 }
  0xd8   : > { %v622_v5 = vpop.f32.mrf.mxu1  ;;  %735 = vxpose.xlu0.b32.cont [6/16] %v493_v4, 128 }
  0xd9   : > { %767 = vxpose.xlu1.b32.cont [6/16] %v622_v5, 128 }
  0xdf   : > { %v496_v6 = vpop.f32.mrf.mxu0 }
  0xe0   : > { %v625_v7 = vpop.f32.mrf.mxu1  ;;  %736 = vxpose.xlu0.b32.cont [7/16] %v496_v6, 128 }
  0xe1   : > { %768 = vxpose.xlu1.b32.cont [7/16] %v625_v7, 128 }
  0xe7   : > { %v498_v8 = vpop.f32.mrf.mxu0 }
  0xe8   : > { %v627_v9 = vpop.f32.mrf.mxu1  ;;  %737 = vxpose.xlu0.b32.cont [8/16] %v498_v8, 128 }
  0xe9   : > { %769 = vxpose.xlu1.b32.cont [8/16] %v627_v9, 128 }
  0xef   : > { %v501_v10 = vpop.f32.mrf.mxu0 }
  0xf0   : > { %v630_v11 = vpop.f32.mrf.mxu1  ;;  %738 = vxpose.xlu0.b32.cont [9/16] %v501_v10, 128 }
  0xf1   : > { %770 = vxpose.xlu1.b32.cont [9/16] %v630_v11, 128 }
  0xf7   : > { %v503_v12 = vpop.f32.mrf.mxu0 }
  0xf8   : > { %v632_v13 = vpop.f32.mrf.mxu1  ;;  %739 = vxpose.xlu0.b32.cont [10/16] %v503_v12, 128 }
  0xf9   : > { %771 = vxpose.xlu1.b32.cont [10/16] %v632_v13, 128 }
  0xff   : > { %v506_v14 = vpop.f32.mrf.mxu0 }
 0x100   : > { %v635_v15 = vpop.f32.mrf.mxu1  ;;  %740 = vxpose.xlu0.b32.cont [11/16] %v506_v14, 128 }
 0x101   : > { %772 = vxpose.xlu1.b32.cont [11/16] %v635_v15, 128 }
 0x107   : > { %v508_v16 = vpop.f32.mrf.mxu0 }
 0x108   : > { %v637_v17 = vpop.f32.mrf.mxu1  ;;  %741 = vxpose.xlu0.b32.cont [12/16] %v508_v16, 128 }
 0x109   : > { %773 = vxpose.xlu1.b32.cont [12/16] %v637_v17, 128 }
 0x10f   : > { %v511_v18 = vpop.f32.mrf.mxu0 }
 0x110   : > { %v640_v19 = vpop.f32.mrf.mxu1  ;;  %742 = vxpose.xlu0.b32.cont [13/16] %v511_v18, 128 }
 0x111   : > { %774 = vxpose.xlu1.b32.cont [13/16] %v640_v19, 128 }
 0x117   : > { %v513_v20 = vpop.f32.mrf.mxu0 }
 0x118   : > { %v642_v21 = vpop.f32.mrf.mxu1  ;;  %743 = vxpose.xlu0.b32.cont [14/16] %v513_v20, 128 }
 0x119   : > { %775 = vxpose.xlu1.b32.cont [14/16] %v642_v21, 128 }
 0x11f   : > { %v516_v23 = vpop.f32.mrf.mxu0 }
 0x120   : > { %v645_v24 = vpop.f32.mrf.mxu1  ;;  %744 = vxpose.xlu0.b32.cont [15/16] %v516_v23, 128  ;;  %v720_v23 = vpop.f32.mrf.mxu3 }
 0x121   : > { %776 = vxpose.xlu1.b32.cont [15/16] %v645_v24, 128 }
 0x127   : > { %v518_v25 = vpop.f32.mrf.mxu0 }
 0x128   : > { %v647_v26 = vpop.f32.mrf.mxu1  ;;  %745 = vxpose.xlu0.b32.end [16/16] %v518_v25, 128  ;;  %v5277_v25 = vpack.c.bf16 %v720_v23, %v591_v22 }
 0x129   : > { %777 = vxpose.xlu1.b32.end [16/16] %v647_v26, 128 }
 0x12a   : > { %7524 = vst [vmem:[#allocation7_spill] sm:$0xff] %v5277_v25  ;;  %v4548_v25 = vld [vmem:[%s7371_s1 + $0x58] sm:$0xff] }
 0x12f   : > { %v521_v28 = vpop.f32.mrf.mxu0 }
 0x130   : > { %v650_v29 = vpop.f32.mrf.mxu1 }
 0x131   : > { %v826_v36 = vpack.c.bf16 %v650_v29, %v521_v28  ;;  %v5285_v28 = vpop.f32.mrf.mxu3 }
 0x132   : > { %7526 = vst [vmem:[#allocation9_spill] sm:$0xff] %v5285_v28 }
 0x133   : > { %v942_v44 = vunpack.c.l.b16 %v826_v36  ;;  %v943_v45 = vunpack.c.h.b16 %v826_v36 }
 0x137   : > { %v523_v30 = vpop.f32.mrf.mxu0 }
 0x138   : > { %v652_v31 = vpop.f32.mrf.mxu1 }
 0x139   : > { %v827_v38 = vpack.c.bf16 %v652_v31, %v523_v30  ;;  %v725_v36 = vpop.f32.mrf.mxu3 }
 0x13b   : > { %v944_v48 = vunpack.c.l.b16 %v827_v38  ;;  %v945_v49 = vunpack.c.h.b16 %v827_v38 }
 0x13d   : > { %v950_v50 = vpack.c.b16 %v944_v48, %v942_v44  ;;  %v951_v51 = vpack.c.b16 %v945_v49, %v943_v45 }
 0x13f   : > { %v526_v32 = vpop.f32.mrf.mxu0 }
 0x140   : > { %v655_v33 = vpop.f32.mrf.mxu1 }
 0x141   : > { %v828_v34 = vpack.c.bf16 %v655_v33, %v526_v32 }
 0x143   : > { %v946_v39 = vunpack.c.l.b16 %v828_v34  ;;  %v947_v40 = vunpack.c.h.b16 %v828_v34 }
 0x147   : > { %v528_v35 = vpop.f32.mrf.mxu0 }
 0x148   : > { %v657_v37 = vpop.f32.mrf.mxu1 }
 0x149   : > { %v829_v41 = vpack.c.bf16 %v657_v37, %v528_v35  ;;  %v596_v35 = vpop.f32.mrf.mxu2 }
 0x14a   : > { %v5289_v38 = vpack.c.bf16 %v725_v36, %v596_v35 }
 0x14b   : > { %v948_v42 = vunpack.c.l.b16 %v829_v41  ;;  %v949_v43 = vunpack.c.h.b16 %v829_v41 }
 0x14c   : > { %7528 = vst [vmem:[#allocation11_spill] sm:$0xff] %v5289_v38 }
 0x14d   : > { %v952_v46 = vpack.c.b16 %v948_v42, %v946_v39  ;;  %v953_v47 = vpack.c.b16 %v949_v43, %v947_v40 }
 0x14f   : > { %1013 = vmatpush.bf16.msrb.mxu2 %v952_v46  ;;  %1102 = vmatpush.bf16.msrb.mxu3 %v953_v47 }
 0x153   : > { %1014 = vmatpush.bf16.msrb.mxu2 %v950_v50  ;;  %1103 = vmatpush.bf16.msrb.mxu3 %v951_v51 }
 0x154   : > { %v746_v52 = vpop.trf.xlu0 }
 0x155   : > { %v794_v53 = vpack.c.bf16 %v746_v52, %v746_v52  ;;  %v778_v29 = vpop.trf.xlu1 }
 0x157   : > { %v890_v56 = vunpack.c.l.b16 %v794_v53 }
 0x15c   : > { %v747_v54 = vpop.trf.xlu0 }
 0x15d   : > { %v795_v55 = vpack.c.bf16 %v747_v54, %v747_v54  ;;  %v779_v39 = vpop.trf.xlu1 }
 0x15f   : > { %v891_v57 = vunpack.c.l.b16 %v795_v55 }
 0x161   : > { %v5251_v58 = vpack.c.b16 %v891_v57, %v890_v56 }
 0x163   : > { %7519 = vst [vmem:[#allocation2_spill] sm:$0xff] %v5251_v58  ;;  %4373 = vmatmul.msk.bf16.vlgmr.msrb.gmra.mxu2 %vm958_vm0, %v5251_v58  ;;  %4389 = vmatmul.msk.bf16.vlgmr.msrb.gmra.mxu3 %vm958_vm0, %v5251_v58 }
 0x164   : > { %v748_v59 = vpop.trf.xlu0 }
 0x165   : > { %v796_v60 = vpack.c.bf16 %v748_v59, %v748_v59  ;;  %v780_v42 = vpop.trf.xlu1  ;;  %v810_v59 = vpack.c.bf16 %v778_v29, %v778_v29 }
 0x167   : > { %v892_v63 = vunpack.c.l.b16 %v796_v60  ;;  %v811_v60 = vpack.c.bf16 %v779_v39, %v779_v39 }
 0x16c   : > { %v749_v61 = vpop.trf.xlu0 }
 0x16d   : > { %v797_v62 = vpack.c.bf16 %v749_v61, %v749_v61  ;;  %v781_v48 = vpop.trf.xlu1 }
 0x16f   : > { %v893_v0 = vunpack.c.l.b16 %v797_v62  ;;  %v906_v62 = vunpack.c.l.b16 %v810_v59 }
 0x171   : > { %v5257_v1 = vpack.c.b16 %v893_v0, %v892_v63  ;;  %v907_v63 = vunpack.c.l.b16 %v811_v60  ;;  %v5307_v0 = vpop.f32.mrf.mxu2 }
 0x172   : > { %7531 = vst [vmem:[#allocation14_spill] sm:$0xff] %v5307_v0 }
 0x173   : > { %7520 = vst [vmem:[#allocation3_spill] sm:$0xff] %v5257_v1  ;;  %4374 = vmatmul.msk.bf16.gmra.mxu2 %vm958_vm0, %v5257_v1  ;;  %4390 = vmatmul.msk.bf16.gmra.mxu3 %vm958_vm0, %v5257_v1 }
 0x174   : > { %v750_v2 = vpop.trf.xlu0 }
 0x175   : > { %v798_v3 = vpack.c.bf16 %v750_v2, %v750_v2  ;;  %v782_v51 = vpop.trf.xlu1  ;;  %v5309_v2 = vpop.f32.mrf.mxu3 }
 0x176   : > { %7532 = vst [vmem:[#allocation15_spill] sm:$0xff] %v5309_v2  ;;  %v814_v23 = vpack.c.bf16 %v782_v51, %v782_v51 }
 0x177   : > { %v894_v6 = vunpack.c.l.b16 %v798_v3  ;;  %v5311_v3 = vpack.c.b16 %v907_v63, %v906_v62 }
 0x178   : > { %v910_v29 = vunpack.c.l.b16 %v814_v23 }
 0x179   : > { %7533 = vst [vmem:[#allocation16_spill] sm:$0xff] %v5311_v3 }
 0x17c   : > { %v751_v4 = vpop.trf.xlu0 }
 0x17d   : > { %v799_v5 = vpack.c.bf16 %v751_v4, %v751_v4  ;;  %v783_v57 = vpop.trf.xlu1 }
 0x17f   : > { %v895_v7 = vunpack.c.l.b16 %v799_v5 }
 0x181   : > { %v5263_v8 = vpack.c.b16 %v895_v7, %v894_v6 }
 0x183   : > { %7521 = vst [vmem:[#allocation4_spill] sm:$0xff] %v5263_v8  ;;  %4375 = vmatmul.msk.bf16.gmra.mxu2 %vm958_vm0, %v5263_v8  ;;  %4391 = vmatmul.msk.bf16.gmra.mxu3 %vm958_vm0, %v5263_v8 }
 0x184   : > { %v752_v9 = vpop.trf.xlu0 }
 0x185   : > { %v800_v10 = vpack.c.bf16 %v752_v9, %v752_v9  ;;  %v784_v61 = vpop.trf.xlu1  ;;  %v812_v9 = vpack.c.bf16 %v780_v42, %v780_v42 }
 0x187   : > { %v896_v13 = vunpack.c.l.b16 %v800_v10  ;;  %v813_v10 = vpack.c.bf16 %v781_v48, %v781_v48 }
 0x18c   : > { %v753_v11 = vpop.trf.xlu0 }
 0x18d   : > { %v801_v12 = vpack.c.bf16 %v753_v11, %v753_v11  ;;  %v785_v4 = vpop.trf.xlu1 }
 0x18e   : > { %v817_v42 = vpack.c.bf16 %v785_v4, %v785_v4 }
 0x18f   : > { %v897_v14 = vunpack.c.l.b16 %v801_v12  ;;  %v908_v12 = vunpack.c.l.b16 %v812_v9 }
 0x191   : > { %v5269_v15 = vpack.c.b16 %v897_v14, %v896_v13  ;;  %v909_v13 = vunpack.c.l.b16 %v813_v10 }
 0x193   : > { %7522 = vst [vmem:[#allocation5_spill] sm:$0xff] %v5269_v15  ;;  %4376 = vmatmul.msk.bf16.gmra.mxu2 %vm958_vm0, %v5269_v15  ;;  %4392 = vmatmul.msk.bf16.gmra.mxu3 %vm958_vm0, %v5269_v15 }
 0x194   : > { %v754_v16 = vpop.trf.xlu0 }
 0x195   : > { %v802_v17 = vpack.c.bf16 %v754_v16, %v754_v16  ;;  %v786_v11 = vpop.trf.xlu1 }
 0x197   : > { %v898_v20 = vunpack.c.l.b16 %v802_v17 }
 0x19c   : > { %v755_v18 = vpop.trf.xlu0 }
 0x19d   : > { %v803_v19 = vpack.c.bf16 %v755_v18, %v755_v18  ;;  %v5329_v18 = vpack.c.b16 %v909_v13, %v908_v12 }
 0x19f   : > { %v899_v21 = vunpack.c.l.b16 %v803_v19  ;;  %7537 = vst [vmem:[#allocation20_spill] sm:$0xff] %v5329_v18  ;;  %v787_v19 = vpop.trf.xlu1 }
 0x1a1   : > { %v5275_v24 = vpack.c.b16 %v899_v21, %v898_v20 }
 0x1a3   : > { %7523 = vst [vmem:[#allocation6_spill] sm:$0xff] %v5275_v24  ;;  %4377 = vmatmul.msk.bf16.gmra.mxu2 %vm958_vm0, %v5275_v24  ;;  %4393 = vmatmul.msk.bf16.gmra.mxu3 %vm958_vm0, %v5275_v24 }
 0x1a4   : > { %v756_v26 = vpop.trf.xlu0 }
 0x1a5   : > { %v804_v30 = vpack.c.bf16 %v756_v26, %v756_v26  ;;  %v815_v26 = vpack.c.bf16 %v783_v57, %v783_v57  ;;  %v819_v57 = vpack.c.bf16 %v787_v19, %v787_v19 }
 0x1a7   : > { %v900_v33 = vunpack.c.l.b16 %v804_v30  ;;  %v911_v30 = vunpack.c.l.b16 %v815_v26  ;;  %v915_v60 = vunpack.c.l.b16 %v819_v57 }
 0x1a9   : > { %v5347_v35 = vpack.c.b16 %v911_v30, %v910_v29 }
 0x1ab   : > { %7538 = vst [vmem:[#allocation21_spill] sm:$0xff] %v5347_v35 }
 0x1ac   : > { %v757_v31 = vpop.trf.xlu0 }
 0x1ad   : > { %v805_v32 = vpack.c.bf16 %v757_v31, %v757_v31 }
 0x1af   : > { %v901_v34 = vunpack.c.l.b16 %v805_v32 }
 0x1b1   : > { %v5287_v37 = vpack.c.b16 %v901_v34, %v900_v33  ;;  %v788_v34 = vpop.trf.xlu1 }
 0x1b3   : > { %7527 = vst [vmem:[#allocation10_spill] sm:$0xff] %v5287_v37  ;;  %4378 = vmatmul.msk.bf16.gmra.mxu2 %vm958_vm0, %v5287_v37  ;;  %4394 = vmatmul.msk.bf16.gmra.mxu3 %vm958_vm0, %v5287_v37 }
 0x1b4   : > { %v758_v40 = vpop.trf.xlu0 }
 0x1b5   : > { %v806_v41 = vpack.c.bf16 %v758_v40, %v758_v40 }
 0x1b7   : > { %v902_v45 = vunpack.c.l.b16 %v806_v41  ;;  %v816_v41 = vpack.c.bf16 %v784_v61, %v784_v61 }
 0x1bc   : > { %v759_v43 = vpop.trf.xlu0 }
 0x1bd   : > { %v807_v44 = vpack.c.bf16 %v759_v43, %v759_v43  ;;  %v789_v43 = vpop.trf.xlu1 }
 0x1be   : > { %v821_v23 = vpack.c.bf16 %v789_v43, %v789_v43 }
 0x1bf   : > { %v903_v46 = vunpack.c.l.b16 %v807_v44  ;;  %v912_v44 = vunpack.c.l.b16 %v816_v41 }
 0x1c0   : > { %v917_v30 = vunpack.c.l.b16 %v821_v23 }
 0x1c1   : > { %v5295_v47 = vpack.c.b16 %v903_v46, %v902_v45  ;;  %v913_v45 = vunpack.c.l.b16 %v817_v42 }
 0x1c3   : > { %7529 = vst [vmem:[#allocation12_spill] sm:$0xff] %v5295_v47  ;;  %4379 = vmatmul.msk.bf16.gmra.mxu2 %vm958_vm0, %v5295_v47  ;;  %4395 = vmatmul.msk.bf16.gmra.mxu3 %vm958_vm0, %v5295_v47 }
 0x1c4   : > { %v760_v49 = vpop.trf.xlu0 }
 0x1c5   : > { %v808_v50 = vpack.c.bf16 %v760_v49, %v760_v49  ;;  %v790_v51 = vpop.trf.xlu1 }
 0x1c6   : > { %v822_v9 = vpack.c.bf16 %v790_v51, %v790_v51 }
 0x1c7   : > { %v904_v54 = vunpack.c.l.b16 %v808_v50  ;;  %v5367_v50 = vpack.c.b16 %v913_v45, %v912_v44 }
 0x1c9   : > { %7539 = vst [vmem:[#allocation22_spill] sm:$0xff] %v5367_v50 }
 0x1cc   : > { %v761_v52 = vpop.trf.xlu0 }
 0x1cd   : > { %v809_v53 = vpack.c.bf16 %v761_v52, %v761_v52  ;;  %v791_v61 = vpop.trf.xlu1 }
 0x1ce   : > { %v823_v10 = vpack.c.bf16 %v791_v61, %v791_v61 }
 0x1cf   : > { %v905_v55 = vunpack.c.l.b16 %v809_v53 }
 0x1d0   : > { %v919_v12 = vunpack.c.l.b16 %v823_v10 }
 0x1d1   : > { %v5301_v56 = vpack.c.b16 %v905_v55, %v904_v54  ;;  %v818_v55 = vpack.c.bf16 %v786_v11, %v786_v11  ;;  %v918_v11 = vunpack.c.l.b16 %v822_v9 }
 0x1d3   : > { %7530 = vst [vmem:[#allocation13_spill] sm:$0xff] %v5301_v56  ;;  %4380 = vmatmul.msk.bf16.gmra.mxu2 %vm958_vm0, %v5301_v56  ;;  %4396 = vmatmul.msk.bf16.gmra.mxu3 %vm958_vm0, %v5301_v56  ;;  %v914_v59 = vunpack.c.l.b16 %v818_v55  ;;  %v5403_v26 = vpack.c.b16 %v919_v12, %v918_v11 }
 0x1d5   : > { %7541 = vst [vmem:[#allocation24_spill] sm:$0xff] %v5403_v26  ;;  %v792_v45 = vpop.trf.xlu1 }
 0x1d6   : > { %v824_v61 = vpack.c.bf16 %v792_v45, %v792_v45 }
 0x1d8   : > { %v920_v9 = vunpack.c.l.b16 %v824_v61 }
 0x1dd   : > { %v793_v55 = vpop.trf.xlu1 }
 0x1e3   : > { %4381 = vmatmul.msk.bf16.gmra.mxu2 %vm958_vm0, %v5311_v3  ;;  %4397 = vmatmul.msk.bf16.gmra.mxu3 %vm958_vm0, %v5311_v3 }
 0x1e6   : > { %v5317_v5 = vpop.f32.mrf.mxu2  ;;  %v5319_v6 = vpop.f32.mrf.mxu3 }
 0x1e7   : > { %7534 = vst [vmem:[#allocation17_spill] sm:$0xff] %v5317_v5  ;;  %v1185_v7 = vmax.f32 %v5317_v5, %v5319_v6 }
 0x1e8   : > { %7535 = vst [vmem:[#allocation18_spill] sm:$0xff] %v5319_v6 }
 0x1e9   : > { %1186 = vmax.xlane.f32.xlu2 %v1185_v7  ;;  %v5389_v7 = vpack.c.b16 %v915_v60, %v914_v59 }
 0x1eb   : > { %7540 = vst [vmem:[#allocation23_spill] sm:$0xff] %v5389_v7 }
 0x1ee   : > { %v5323_v14 = vpop.f32.mrf.mxu2  ;;  %v5325_v16 = vpop.f32.mrf.mxu3 }
 0x1ef   : > { %7536 = vst [vmem:[#allocation19_spill] sm:$0xff] %v5325_v16  ;;  %v1188_v17 = vmax.f32 %v5323_v14, %v5325_v16 }
 0x1f1   : > { %1189 = vmax.xlane.f32.xlu2 %v1188_v17 }
 0x1f3   : > { %4382 = vmatmul.msk.bf16.gmra.mxu2 %vm958_vm0, %v5329_v18  ;;  %4398 = vmatmul.msk.bf16.gmra.mxu3 %vm958_vm0, %v5329_v18 }
 0x1f6   : > { %v5335_v20 = vpop.f32.mrf.mxu2  ;;  %v5337_v21 = vpop.f32.mrf.mxu3 }
 0x1f7   : > { %v1191_v22 = vmax.f32 %v5335_v20, %v5337_v21 }
 0x1f9   : > { %1192 = vmax.xlane.f32.xlu0 %v1191_v22  ;;  %v820_v22 = vpack.c.bf16 %v788_v34, %v788_v34 }
 0x1fb   : > { %v916_v29 = vunpack.c.l.b16 %v820_v22 }
 0x1fd   : > { %v5413_v42 = vpack.c.b16 %v917_v30, %v916_v29 }
 0x1fe   : > { %v5341_v31 = vpop.f32.mrf.mxu2  ;;  %v5343_v32 = vpop.f32.mrf.mxu3 }
 0x1ff   : > { %v1194_v33 = vmax.f32 %v5341_v31, %v5343_v32  ;;  %7542 = vst [vmem:[#allocation25_spill] sm:$0xff] %v5413_v42 }
 0x201   : > { %1195 = vmax.xlane.f32.xlu1 %v1194_v33 }
 0x203   : > { %4383 = vmatmul.msk.bf16.gmra.mxu2 %vm958_vm0, %v5347_v35  ;;  %4399 = vmatmul.msk.bf16.gmra.mxu3 %vm958_vm0, %v5347_v35 }
 0x206   : > { %v5353_v36 = vpop.f32.mrf.mxu2  ;;  %v5355_v39 = vpop.f32.mrf.mxu3 }
 0x207   : > { %v1197_v40 = vmax.f32 %v5353_v36, %v5355_v39 }
 0x209   : > { %1198 = vmax.xlane.f32.xlu2 %v1197_v40 }
 0x20d   : > { %1669 = vrot.lane.b32.xlu0 %v5263_v8, %s5137_s21 }
 0x20e   : > { %v5361_v46 = vpop.f32.mrf.mxu2  ;;  %v5363_v48 = vpop.f32.mrf.mxu3 }
 0x20f   : > { %v1200_v49 = vmax.f32 %v5361_v46, %v5363_v48 }
 0x211   : > { %1201 = vmax.xlane.f32.xlu2 %v1200_v49 }
 0x213   : > { %4384 = vmatmul.msk.bf16.gmra.mxu2 %vm958_vm0, %v5367_v50  ;;  %4400 = vmatmul.msk.bf16.gmra.mxu3 %vm958_vm0, %v5367_v50 }
 0x215   : > { %1675 = vrot.lane.b32.xlu0 %v5287_v37, %s5137_s21 }
 0x216   : > { %v5375_v52 = vpop.f32.mrf.mxu2  ;;  %v5377_v53 = vpop.f32.mrf.mxu3 }
 0x217   : > { %v1203_v54 = vmax.f32 %v5375_v52, %v5377_v53 }
 0x219   : > { %1204 = vmax.xlane.f32.xlu2 %v1203_v54 }
 0x21d   : > { %1681 = vrot.lane.b32.xlu0 %v5311_v3, %s5137_s21 }
 0x21e   : > { %v5383_v62 = vpop.f32.mrf.mxu2  ;;  %v5385_v63 = vpop.f32.mrf.mxu3 }
 0x21f   : > { %v1206_v4 = vmax.f32 %v5383_v62, %v5385_v63 }
 0x221   : > { %1207 = vmax.xlane.f32.xlu2 %v1206_v4  ;;  %v825_v4 = vpack.c.bf16 %v793_v55, %v793_v55 }
 0x223   : > { %4385 = vmatmul.msk.bf16.gmra.mxu2 %vm958_vm0, %v5389_v7  ;;  %4401 = vmatmul.msk.bf16.gmra.mxu3 %vm958_vm0, %v5389_v7  ;;  %v921_v10 = vunpack.c.l.b16 %v825_v4 }
 0x225   : > { %1687 = vrot.lane.b32.xlu0 %v5367_v50, %s5137_s21  ;;  %v5447_v22 = vpack.c.b16 %v921_v10, %v920_v9 }
 0x226   : > { %v5397_v13 = vpop.f32.mrf.mxu2  ;;  %v5399_v17 = vpop.f32.mrf.mxu3 }
 0x227   : > { %v1209_v19 = vmax.f32 %v5397_v13, %v5399_v17  ;;  %7543 = vst [vmem:[#allocation26_spill] sm:$0xff] %v5447_v22 }
 0x229   : > { %1210 = vmax.xlane.f32.xlu2 %v1209_v19 }
 0x22d   : > { %1693 = vrot.lane.b32.xlu0 %v5403_v26, %s5137_s21 }
 0x22e   : > { %v5407_v33 = vpop.f32.mrf.mxu2  ;;  %v5409_v40 = vpop.f32.mrf.mxu3 }
 0x22f   : > { %v1212_v41 = vmax.f32 %v5407_v33, %v5409_v40 }
 0x231   : > { %1213 = vmax.xlane.f32.xlu2 %v1212_v41 }
 0x233   : > { %4386 = vmatmul.msk.bf16.gmra.mxu2 %vm958_vm0, %v5413_v42  ;;  %4402 = vmatmul.msk.bf16.gmra.mxu3 %vm958_vm0, %v5413_v42 }
 0x236   : > { %v5419_v34 = vpop.f32.mrf.mxu2  ;;  %v5421_v43 = vpop.f32.mrf.mxu3 }
 0x237   : > { %v1215_v44 = vmax.f32 %v5419_v34, %v5421_v43 }
 0x239   : > { %1216 = vmax.xlane.f32.xlu2 %v1215_v44 }
 0x23e   : > { %v5425_v49 = vpop.f32.mrf.mxu2  ;;  %v5427_v51 = vpop.f32.mrf.mxu3 }
 0x23f   : > { %v1218_v54 = vmax.f32 %v5425_v49, %v5427_v51 }
 0x241   : > { %1219 = vmax.xlane.f32.xlu2 %v1218_v54 }
 0x243   : > { %4387 = vmatmul.msk.bf16.gmra.mxu2 %vm958_vm0, %v5403_v26  ;;  %4403 = vmatmul.msk.bf16.gmra.mxu3 %vm958_vm0, %v5403_v26 }
 0x246   : > { %v5435_v57 = vpop.f32.mrf.mxu2  ;;  %v5437_v59 = vpop.f32.mrf.mxu3 }
 0x247   : > { %v1221_v60 = vmax.f32 %v5435_v57, %v5437_v59 }
 0x249   : > { %1222 = vmax.xlane.f32.xlu2 %v1221_v60 }
 0x24e   : > { %v5441_v11 = vpop.f32.mrf.mxu2  ;;  %v5443_v12 = vpop.f32.mrf.mxu3 }
 0x24f   : > { %v1224_v19 = vmax.f32 %v5441_v11, %v5443_v12 }
 0x251   : > { %1225 = vmax.xlane.f32.xlu2 %v1224_v19  ;;  %v4547_v19 = vld [vmem:[%s7371_s1 + $0x50] sm:$0xff] }
 0x252   : > { %530 = vmatmul.bf16.gmra.mxu0 %v4547_v19  ;;  %659 = vmatmul.bf16.gmra.mxu1 %v4547_v19 }
 0x253   : > { %4388 = vmatmul.msk.bf16.gmra.mxu2 %vm958_vm0, %v5447_v22  ;;  %4404 = vmatmul.msk.bf16.gmra.mxu3 %vm958_vm0, %v5447_v22 }
 0x256   : > { %v5453_v23 = vpop.f32.mrf.mxu2  ;;  %v5455_v29 = vpop.f32.mrf.mxu3 }
 0x257   : > { %v1227_v30 = vmax.f32 %v5453_v23, %v5455_v29 }
 0x259   : > { %1228 = vmax.xlane.f32.xlu2 %v1227_v30 }
 0x25c   : > { %v5471_v61 = vpop.xlane.xlu2 %1186 }
 0x25d   : > { %7546 = vst [vmem:[#allocation29_spill] sm:$0xff] %v5471_v61 }
 0x25e   : > { %v5459_v41 = vpop.f32.mrf.mxu2  ;;  %v5461_v44 = vpop.f32.mrf.mxu3 }
 0x25f   : > { %v1230_v45 = vmax.f32 %v5459_v41, %v5461_v44 }
 0x261   : > { %1231 = vmax.xlane.f32.xlu2 %v1230_v45 }
 0x262   : > { %535 = vmatmul.bf16.gmra.mxu0 %v4548_v25  ;;  %664 = vmatmul.bf16.gmra.mxu1 %v4548_v25 }
 0x264   : > { %v5477_v10 = vpop.xlane.xlu2 %1189 }
 0x266   : > { %v5465_v54 = vpop.f32.mrf.mxu2  ;;  %v5467_v55 = vpop.f32.mrf.mxu3 }
 0x267   : > { %7544 = vst [vmem:[#allocation27_spill] sm:$0xff] %v5465_v54  ;;  %v1233_v60 = vmax.f32 %v5465_v54, %v5467_v55  ;;  %v4550_v54 = vld [vmem:[%s7371_s1 + $0x68] sm:$0xff] }
 0x268   : > { %7545 = vst [vmem:[#allocation28_spill] sm:$0xff] %v5467_v55 }
 0x269   : > { %1234 = vmax.xlane.f32.xlu1 %v1233_v60 }
 0x26e   : > { %v5473_v4 = vpop.f32.mrf.mxu2  ;;  %v5475_v9 = vpop.f32.mrf.mxu3 }
 0x26f   : > { %7547 = vst [vmem:[#allocation30_spill] sm:$0xff] %v5473_v4 }
 0x270   : > { %7548 = vst [vmem:[#allocation31_spill] sm:$0xff] %v5475_v9 }
 0x276   : > { %v5482_v30 = vpop.f32.mrf.mxu2  ;;  %v5484_v45 = vpop.f32.mrf.mxu3 }
 0x27c   : > { %v5486_v38 = vpop.xlane.xlu2 %1198 }
 0x27e   : > { %v5488_v60 = vpop.f32.mrf.mxu2  ;;  %v5490_v2 = vpop.f32.mrf.mxu3 }
 0x27f   : > { %7549 = vst [vmem:[#allocation32_spill] sm:$0xff] %v5488_v60 }
 0x280   : > { %7550 = vst [vmem:[#allocation33_spill] sm:$0xff] %v5490_v2 }
 0x282   : > { %1665 = vrot.lane.b32.xlu1 %v5251_v58, %s5137_s21  ;;  %v4549_v58 = vld [vmem:[%s7371_s1 + $0x60] sm:$0xff] }
 0x283   : > { %540 = vmatmul.bf16.gmra.mxu0 %v4549_v58  ;;  %669 = vmatmul.bf16.gmra.mxu1 %v4549_v58 }
 0x284   : > { %v5494_v0 = vpop.xlane.xlu2 %1201 }
 0x286   : > { %v5499_v28 = vpop.f32.mrf.mxu2  ;;  %v5501_v27 = vpop.f32.mrf.mxu3 }
 0x28a   : > { %1673 = vrot.lane.b32.xlu1 %v5275_v24, %s5137_s21 }
 0x28c   : > { %v5505_v19 = vpop.xlane.xlu2 %1204 }
 0x28e   : > { %v5507_v26 = vpop.f32.mrf.mxu2  ;;  %v5509_v50 = vpop.f32.mrf.mxu3 }
 0x292   : > { %1679 = vrot.lane.b32.xlu1 %v5301_v56, %s5137_s21 }
 0x293   : > { %545 = vmatmul.bf16.gmra.mxu0 %v4550_v54  ;;  %674 = vmatmul.bf16.gmra.mxu1 %v4550_v54  ;;  %v4551_v54 = vld [vmem:[%s7371_s1 + $0x70] sm:$0xff] }
 0x294   : > { %v5513_v3 = vpop.xlane.xlu2 %1207 }
 0x296   : > { %v5518_v8 = vpop.f32.mrf.mxu2  ;;  %v5520_v25 = vpop.f32.mrf.mxu3 }
 0x29a   : > { %1685 = vrot.lane.b32.xlu1 %v5347_v35, %s5137_s21 }
 0x29c   : > { %v5524_v24 = vpop.xlane.xlu2 %1210 }
 0x29e   : > { %v5526_v37 = vpop.f32.mrf.mxu2  ;;  %v5528_v56 = vpop.f32.mrf.mxu3 }
 0x2a2   : > { %1691 = vrot.lane.b32.xlu1 %v5413_v42, %s5137_s21 }
 0x2a3   : > { %550 = vmatmul.bf16.gmra.mxu0 %v4551_v54  ;;  %679 = vmatmul.bf16.gmra.mxu1 %v4551_v54 }
 0x2a4   : > { %v5532_v55 = vpop.xlane.xlu2 %1213 }
 0x2a6   : > { %v5537_v22 = vpop.f32.mrf.mxu2  ;;  %v5539_v58 = vpop.f32.mrf.mxu3 }
 0x2a7   : > { %7551 = vst [vmem:[#allocation34_spill] sm:$0xff] %v5537_v22  ;;  %v1257_v35 = vmax.f32 %v5537_v22, %v5539_v58 }
 0x2a8   : > { %7552 = vst [vmem:[#allocation35_spill] sm:$0xff] %v5539_v58 }
 0x2a9   : > { %1258 = vmax.xlane.f32.xlu2 %v1257_v35 }
 0x2ac   : > { %v5543_v7 = vpop.xlane.xlu2 %1216 }
 0x2ae   : > { %v5545_v18 = vpop.f32.mrf.mxu2  ;;  %v5547_v42 = vpop.f32.mrf.mxu3 }
 0x2af   : > { %7553 = vst [vmem:[#allocation36_spill] sm:$0xff] %v5545_v18  ;;  %v1260_v47 = vmax.f32 %v5545_v18, %v5547_v42  ;;  %v4552_v18 = vld [vmem:[%s7371_s1 + $0x78] sm:$0xff] }
 0x2b0   : > { %7554 = vst [vmem:[#allocation37_spill] sm:$0xff] %v5547_v42 }
 0x2b1   : > { %1261 = vmax.xlane.f32.xlu2 %v1260_v47 }
 0x2b3   : > { %555 = vmatmul.bf16.gmra.mxu0 %v4552_v18  ;;  %684 = vmatmul.bf16.gmra.mxu1 %v4552_v18 }
 0x2b4   : > { %v5551_v15 = vpop.xlane.xlu2 %1219 }
 0x2b6   : > { %v5556_v1 = vpop.f32.mrf.mxu2  ;;  %v5558_v58 = vpop.f32.mrf.mxu3 }
 0x2b7   : > { %7555 = vst [vmem:[#allocation38_spill] sm:$0xff] %v5556_v1  ;;  %v1263_v35 = vmax.f32 %v5556_v1, %v5558_v58 }
 0x2b8   : > { %7556 = vst [vmem:[#allocation39_spill] sm:$0xff] %v5558_v58 }
 0x2b9   : > { %1264 = vmax.xlane.f32.xlu2 %v1263_v35 }
 0x2bc   : > { %v1223_v22 = vpop.xlane.xlu2 %1222 }
 0x2be   : > { %v5562_v4 = vpop.f32.mrf.mxu2  ;;  %v5564_v47 = vpop.f32.mrf.mxu3 }
 0x2bf   : > { %7557 = vst [vmem:[#allocation40_spill] sm:$0xff] %v5562_v4  ;;  %v1266_v42 = vmax.f32 %v5562_v4, %v5564_v47 }
 0x2c0   : > { %7558 = vst [vmem:[#allocation41_spill] sm:$0xff] %v5564_v47 }
 0x2c1   : > { %1267 = vmax.xlane.f32.xlu2 %v1266_v42 }
 0x2c4   : > { %v1226_v9 = vpop.xlane.xlu2 %1225 }
 0x2c5   : > { %v1307_v61 = vsub.f32 %v5441_v11, %v1226_v9  ;;  %v1306_v11 = vsub.f32 %v5437_v59, %v1223_v22 }
 0x2c6   : > { %v5571_v60 = vpop.f32.mrf.mxu2  ;;  %v5573_v54 = vpop.f32.mrf.mxu3 }
 0x2c7   : > { %7559 = vst [vmem:[#allocation42_spill] sm:$0xff] %v5571_v60  ;;  %v1269_v35 = vmax.f32 %v5571_v60, %v5573_v54 }
 0x2c8   : > { %7560 = vst [vmem:[#allocation43_spill] sm:$0xff] %v5573_v54 }
 0x2c9   : > { %1270 = vmax.xlane.f32.xlu2 %v1269_v35  ;;  %v4553_v35 = vld [vmem:[%s7371_s1 + $0x80] sm:$0xff] }
 0x2ca   : > { %560 = vmatmul.bf16.gmra.mxu0 %v4553_v35  ;;  %689 = vmatmul.bf16.gmra.mxu1 %v4553_v35 }
 0x2cc   : > { %v1229_v58 = vpop.xlane.xlu2 %1228 }
 0x2cd   : > { %v1309_v42 = vsub.f32 %v5453_v23, %v1229_v58  ;;  %v1310_v2 = vsub.f32 %v5455_v29, %v1229_v58  ;;  %v1308_v58 = vsub.f32 %v5443_v12, %v1226_v9  ;;  %v1304_v12 = vsub.f32 %v5427_v51, %v5551_v15 }
 0x2ce   : > { %v5577_v1 = vpop.f32.mrf.mxu2  ;;  %v5579_v47 = vpop.f32.mrf.mxu3 }
 0x2cf   : > { %7561 = vst [vmem:[#allocation44_spill] sm:$0xff] %v5577_v1  ;;  %v1272_v4 = vmax.f32 %v5577_v1, %v5579_v47  ;;  %v1401_v6 = vmul.f32 1.442695, %v1309_v42  ;;  %v1403_v5 = vmul.f32 1.442695, %v1310_v2 }
 0x2d0   : > { %7562 = vst [vmem:[#allocation45_spill] sm:$0xff] %v5579_v47  ;;  %v1399_v42 = vmul.f32 1.442695, %v1308_v58 }
 0x2d1   : > { %1273 = vmax.xlane.f32.xlu2 %v1272_v4  ;;  %4601 = vpow2.f32 %v1401_v6 }
 0x2d2   : > { %4603 = vpow2.f32 %v1403_v5  ;;  %v1303_v5 = vsub.f32 %v5425_v49, %v5551_v15  ;;  %v1302_v49 = vsub.f32 %v5421_v43, %v5543_v7  ;;  %v1391_v15 = vmul.f32 1.442695, %v1304_v12 }
 0x2d3   : > { %v1251_v43 = vmax.f32 %v5518_v8, %v5520_v25 }
 0x2d4   : > { %v1232_v18 = vpop.xlane.xlu2 %1231 }
 0x2d5   : > { %v1311_v54 = vsub.f32 %v5459_v41, %v1232_v18  ;;  %v1312_v60 = vsub.f32 %v5461_v44, %v1232_v18  ;;  %v1305_v41 = vsub.f32 %v5435_v57, %v1223_v22  ;;  %v1397_v44 = vmul.f32 1.442695, %v1307_v61 }
 0x2d6   : > { %v5591_v23 = vpop.f32.mrf.mxu2  ;;  %v5593_v16 = vpop.f32.mrf.mxu3  ;;  %v1301_v61 = vsub.f32 %v5419_v34, %v5543_v7  ;;  %v1299_v7 = vsub.f32 %v5407_v33, %v5532_v55  ;;  %v1298_v33 = vsub.f32 %v5399_v17, %v5524_v24  ;;  %v1296_v17 = vsub.f32 %v5385_v63, %v5513_v3 }
 0x2d7   : > { %v1405_v29 = vmul.f32 1.442695, %v1311_v54  ;;  %v1407_v2 = vmul.f32 1.442695, %v1312_v60  ;;  %v1275_v4 = vmax.f32 %v5591_v23, %v5593_v16  ;;  %v4602_v18 = vpop.eup %4601  ;;  %v1393_v35 = vmul.f32 1.442695, %v1305_v41  ;;  %v660_v63 = vpop.f32.mrf.mxu1 }
 0x2d8   : > { %v4604_v6 = vpop.eup %4603  ;;  %v1395_v54 = vmul.f32 1.442695, %v1306_v11  ;;  %v1385_v34 = vmul.f32 1.442695, %v1301_v61  ;;  %v1300_v11 = vsub.f32 %v5409_v40, %v5532_v55  ;;  %v1293_v61 = vsub.f32 %v5375_v52, %v5505_v19 }
 0x2d9   : > { %4605 = vpow2.f32 %v1405_v29  ;;  %1276 = vmax.xlane.f32.xlu2 %v1275_v4  ;;  %v1389_v29 = vmul.f32 1.442695, %v1303_v5  ;;  %v1387_v4 = vmul.f32 1.442695, %v1302_v49  ;;  %v1379_v5 = vmul.f32 1.442695, %v1298_v33  ;;  %v1196_v33 = vpop.xlane.xlu1 %1195 }
 0x2da   : > { %4607 = vpow2.f32 %v1407_v2  ;;  %v1383_v40 = vmul.f32 1.442695, %v1300_v11  ;;  %v1369_v52 = vmul.f32 1.442695, %v1293_v61 }
 0x2db   : > { %4609 = vpow2.f32 %v1397_v44 }
 0x2dc   : > { %4611 = vpow2.f32 %v1399_v42  ;;  %v1297_v42 = vsub.f32 %v5397_v13, %v5524_v24  ;;  %v1295_v13 = vsub.f32 %v5383_v62, %v5513_v3  ;;  %v1294_v62 = vsub.f32 %v5377_v53, %v5505_v19  ;;  %v531_v3 = vpop.f32.mrf.mxu0 }
 0x2dd   : > { %4613 = vpow2.f32 %v1393_v35  ;;  %v1381_v35 = vmul.f32 1.442695, %v1299_v7  ;;  %v1245_v53 = vmax.f32 %v5499_v28, %v5501_v27  ;;  %v1292_v7 = vsub.f32 %v5363_v48, %v5494_v0 }
 0x2de   : > { %v5600_v60 = vpop.f32.mrf.mxu2  ;;  %v5602_v47 = vpop.f32.mrf.mxu3  ;;  %4615 = vpow2.f32 %v1395_v54 }
 0x2df   : > { %v4606_v1 = vpop.eup %4605  ;;  %v1278_v57 = vmax.f32 %v5600_v60, %v5602_v47  ;;  %4617 = vpow2.f32 %v1389_v29  ;;  %v1373_v29 = vmul.f32 1.442695, %v1295_v13  ;;  %v5675_v48 = vpop.f32.mrf.mxu1  ;;  %v1288_v13 = vsub.f32 %v5343_v32, %v1196_v33 }
 0x2e0   : > { %v4608_v59 = vpop.eup %4607  ;;  %v5610_v22 = vpack.c.bf16 %v4606_v1, %v4602_v18  ;;  %v4554_v1 = vld [vmem:[%s7371_s1 + $0x88] sm:$0xff]  ;;  %4619 = vpow2.f32 %v1391_v15  ;;  %v1375_v15 = vmul.f32 1.442695, %v1296_v17 }
 0x2e1   : > { %1279 = vmax.xlane.f32.xlu2 %v1278_v57  ;;  %v5614_v9 = vpack.c.bf16 %v4608_v59, %v4604_v6  ;;  %v4610_v51 = vpop.eup %4609  ;;  %565 = vmatmul.bf16.gmra.mxu0 %v4554_v1  ;;  %4621 = vpow2.f32 %v1385_v34  ;;  %v1377_v6 = vmul.f32 1.442695, %v1297_v42  ;;  %v1254_v59 = vmax.f32 %v5526_v37, %v5528_v56 }
 0x2e2   : > { %1525 = vmatpush.bf16.xpose.msra.mxu2 %v5610_v22  ;;  %v4612_v2 = vpop.eup %4611  ;;  %694 = vmatmul.bf16.gmra.mxu1 %v4554_v1  ;;  %4623 = vpow2.f32 %v1387_v4  ;;  %v5655_v1 = vpack.c.bf16 %v660_v63, %v531_v3  ;;  %v1359_v32 = vmul.f32 1.442695, %v1288_v13 }
 0x2e3   : > { %1544 = vmatpush.bf16.xpose.msra.mxu3 %v5614_v9  ;;  %v4614_v58 = vpop.eup %4613  ;;  %4625 = vpow2.f32 %v1381_v35  ;;  %v1367_v35 = vmul.f32 1.442695, %v1292_v7  ;;  %v7565_v7 = vld [vmem:[#allocation17_spill] sm:$0xff] }
 0x2e4   : > { %v4616_v41 = vpop.eup %4615  ;;  %v5629_v44 = vpack.c.bf16 %v4610_v51, %v4614_v58  ;;  %4627 = vpow2.f32 %v1383_v40  ;;  %v1291_v58 = vsub.f32 %v5361_v46, %v5494_v0  ;;  %v1290_v46 = vsub.f32 %v5355_v39, %v5486_v38  ;;  %v5673_v0 = vpop.f32.mrf.mxu0 }
 0x2e5   : > { %v5633_v18 = vpack.c.bf16 %v4612_v2, %v4616_v41  ;;  %v4618_v55 = vpop.eup %4617  ;;  %4629 = vpow2.f32 %v1377_v6  ;;  %v1371_v2 = vmul.f32 1.442695, %v1294_v62  ;;  %v1289_v41 = vsub.f32 %v5353_v36, %v5486_v38  ;;  %v1193_v6 = vpop.xlane.xlu0 %1192 }
 0x2e6   : > { %v4620_v54 = vpop.eup %4619  ;;  %4631 = vpow2.f32 %v1379_v5  ;;  %v1365_v42 = vmul.f32 1.442695, %v1291_v58  ;;  %v1287_v38 = vsub.f32 %v5341_v31, %v1196_v33  ;;  %v1248_v39 = vmax.f32 %v5507_v26, %v5509_v50 }
 0x2e7   : > { %v4622_v57 = vpop.eup %4621  ;;  %4633 = vpow2.f32 %v1373_v29  ;;  %v1361_v40 = vmul.f32 1.442695, %v1289_v41  ;;  %v1286_v61 = vsub.f32 %v5337_v21, %v1193_v6  ;;  %v665_v29 = vpop.f32.mrf.mxu1  ;;  %v1239_v21 = vmax.f32 %v5482_v30, %v5484_v45 }
 0x2e8   : > { %v4624_v24 = vpop.eup %4623  ;;  %v5645_v12 = vpack.c.bf16 %v4618_v55, %v4622_v57  ;;  %4635 = vpow2.f32 %v1375_v15  ;;  %v1357_v31 = vmul.f32 1.442695, %v1287_v38  ;;  %v7567_v38 = vld [vmem:[#allocation33_spill] sm:$0xff] }
 0x2e9   : > { %1252 = vmax.xlane.f32.xlu2 %v1251_v43  ;;  %v5649_v49 = vpack.c.bf16 %v4620_v54, %v4624_v24  ;;  %v4626_v51 = vpop.eup %4625  ;;  %4637 = vpow2.f32 %v1369_v52  ;;  %v1363_v54 = vmul.f32 1.442695, %v1290_v46  ;;  %v1285_v24 = vsub.f32 %v5335_v20, %v1193_v6 }
 0x2ea   : > { %1526 = vmatpush.bf16.xpose.msra.mxu2 %v5629_v44  ;;  %v4628_v34 = vpop.eup %4627  ;;  %4639 = vpow2.f32 %v1371_v2 }
 0x2eb   : > { %1545 = vmatpush.bf16.xpose.msra.mxu3 %v5633_v18  ;;  %v4630_v4 = vpop.eup %4629  ;;  %4641 = vpow2.f32 %v1365_v42  ;;  %v1353_v15 = vmul.f32 1.442695, %v1285_v24 }
 0x2ec   : > { %v4632_v19 = vpop.eup %4631  ;;  %v5663_v43 = vpack.c.bf16 %v4626_v51, %v4630_v4  ;;  %4643 = vpow2.f32 %v1367_v35  ;;  %v536_v62 = vpop.f32.mrf.mxu0  ;;  %v1355_v51 = vmul.f32 1.442695, %v1286_v61  ;;  %v7563_v4 = vld [vmem:[#allocation19_spill] sm:$0xff] }
 0x2ed   : > { %v5667_v11 = vpack.c.bf16 %v4628_v34, %v4632_v19  ;;  %v4634_v36 = vpop.eup %4633  ;;  %4645 = vpow2.f32 %v1361_v40  ;;  %v5689_v3 = vpack.c.bf16 %v665_v29, %v536_v62  ;;  %v1283_v34 = vsub.f32 %v5323_v14, %v5477_v10  ;;  %v7564_v19 = vld [vmem:[#allocation29_spill] sm:$0xff]  ;;  %v7566_v14 = vld [vmem:[#allocation18_spill] sm:$0xff] }
 0x2ee   : > { %v4636_v55 = vpop.eup %4635  ;;  %4647 = vpow2.f32 %v1363_v54  ;;  %v1284_v58 = vsub.f32 %v7563_v4, %v5477_v10  ;;  %v1281_v41 = vsub.f32 %v7565_v7, %v7564_v19  ;;  %v1282_v42 = vsub.f32 %v7566_v14, %v7564_v19 }
 0x2ef   : > { %v4638_v5 = vpop.eup %4637  ;;  %4649 = vpow2.f32 %v1357_v31  ;;  %v1349_v33 = vmul.f32 1.442695, %v1283_v34  ;;  %v5709_v35 = vpop.f32.mrf.mxu1 }
 0x2f0   : > { %v4640_v57 = vpop.eup %4639  ;;  %4651 = vpow2.f32 %v1359_v32  ;;  %v1347_v54 = vmul.f32 1.442695, %v1282_v42 }
 0x2f1   : > { %1255 = vmax.xlane.f32.xlu2 %v1254_v59  ;;  %v5681_v59 = vpack.c.bf16 %v4634_v36, %v4638_v5  ;;  %v5684_v17 = vpack.c.bf16 %v4636_v55, %v4640_v57  ;;  %v4642_v63 = vpop.eup %4641  ;;  %4653 = vpow2.f32 %v1353_v15  ;;  %v1351_v36 = vmul.f32 1.442695, %v1284_v58 }
 0x2f2   : > { %1527 = vmatpush.bf16.xpose.msra.mxu2 %v5645_v12  ;;  %v4644_v20 = vpop.eup %4643  ;;  %4655 = vpow2.f32 %v1355_v51  ;;  %v1345_v55 = vmul.f32 1.442695, %v1281_v41  ;;  %v7571_v51 = vld [vmem:[#allocation30_spill] sm:$0xff] }
 0x2f3   : > { %1546 = vmatpush.bf16.xpose.msra.mxu3 %v5649_v49  ;;  %v4646_v52 = vpop.eup %4645  ;;  %4657 = vpow2.f32 %v1349_v33 }
 0x2f4   : > { %v4648_v2 = vpop.eup %4647  ;;  %v5707_v10 = vpop.f32.mrf.mxu0  ;;  %4659 = vpow2.f32 %v1351_v36 }
 0x2f5   : > { %v5701_v46 = vpack.c.bf16 %v4644_v20, %v4648_v2  ;;  %v4650_v40 = vpop.eup %4649  ;;  %4661 = vpow2.f32 %v1345_v55  ;;  %v7570_v20 = vld [vmem:[#allocation31_spill] sm:$0xff] }
 0x2f6   : > { %v4652_v6 = vpop.eup %4651  ;;  %4663 = vpow2.f32 %v1347_v54  ;;  %v7579_v55 = vld [vmem:[#allocation3_spill] sm:$0xff] }
 0x2f7   : > { %v4654_v5 = vpop.eup %4653 }
 0x2f8   : > { %v4656_v13 = vpop.eup %4655  ;;  %v5713_v24 = vpack.c.bf16 %v4650_v40, %v4654_v5 }
 0x2f9   : > { %1246 = vmax.xlane.f32.xlu2 %v1245_v53  ;;  %v5697_v53 = vpack.c.bf16 %v4642_v63, %v4646_v52  ;;  %v5715_v61 = vpack.c.bf16 %v4652_v6, %v4656_v13  ;;  %v4658_v32 = vpop.eup %4657  ;;  %v1236_v52 = vmax.f32 %v7571_v51, %v7570_v20  ;;  %v7581_v13 = vld [vmem:[#allocation5_spill] sm:$0xff] }
 0x2fa   : > { %1528 = vmatpush.bf16.xpose.msra.mxu2 %v5663_v43  ;;  %v4660_v63 = vpop.eup %4659 }
 0x2fb   : > { %1547 = vmatpush.bf16.xpose.msra.mxu3 %v5667_v11  ;;  %v4662_v15 = vpop.eup %4661 }
 0x2fc   : > { %v4664_v34 = vpop.eup %4663 }
 0x2fd   : > { %v5725_v2 = vpack.c.bf16 %v4660_v63, %v4664_v34  ;;  %v4555_v63 = vld [vmem:[%s7371_s1 + $0x90] sm:$0xff] }
 0x2fe   : > { %570 = vmatmul.bf16.gmra.mxu0 %v4555_v63  ;;  %699 = vmatmul.bf16.gmra.mxu1 %v4555_v63  ;;  %v4556_v63 = vld [vmem:[%s7371_s1 + $0x98] sm:$0xff] }
 0x2ff   : > { %7573 = vst [vmem:[#allocation17_spill] sm:$0xff] %v5725_v2 }
 0x300   : > { %v541_v31 = vpop.f32.mrf.mxu0  ;;  %v670_v62 = vpop.f32.mrf.mxu1 }
 0x301   : > { %1249 = vmax.xlane.f32.xlu2 %v1248_v39  ;;  %v7568_v39 = vld [vmem:[#allocation32_spill] sm:$0xff]  ;;  %v5719_v29 = vpack.c.bf16 %v670_v62, %v541_v31 }
 0x302   : > { %1529 = vmatpush.bf16.xpose.msra.mxu2 %v5681_v59  ;;  %v1242_v57 = vmax.f32 %v7568_v39, %v7567_v38 }
 0x303   : > { %1548 = vmatpush.bf16.xpose.msra.mxu3 %v5684_v17  ;;  %7569 = vst [vmem:[#allocation19_spill] sm:$0xff] %v5719_v29 }
 0x308   : > { %v5729_v4 = vpop.f32.mrf.mxu0  ;;  %v5731_v58 = vpop.f32.mrf.mxu1 }
 0x309   : > { %1240 = vmax.xlane.f32.xlu2 %v1239_v21  ;;  %v5723_v21 = vpack.c.bf16 %v4658_v32, %v4662_v15  ;;  %7574 = vst [vmem:[#allocation18_spill] sm:$0xff] %v5729_v4  ;;  %v7584_v15 = vld [vmem:[#allocation12_spill] sm:$0xff] }
 0x30a   : > { %1530 = vmatpush.bf16.xpose.msra.mxu2 %v5697_v53  ;;  %7575 = vst [vmem:[#allocation33_spill] sm:$0xff] %v5731_v58  ;;  %v7590_v4 = vld [vmem:[#allocation44_spill] sm:$0xff] }
 0x30b   : > { %1549 = vmatpush.bf16.xpose.msra.mxu3 %v5701_v46  ;;  %7572 = vst [vmem:[#allocation29_spill] sm:$0xff] %v5723_v21 }
 0x30e   : > { %575 = vmatmul.bf16.gmra.mxu0 %v4556_v63  ;;  %704 = vmatmul.bf16.gmra.mxu1 %v4556_v63  ;;  %v7594_v63 = vld [vmem:[#allocation43_spill] sm:$0xff] }
 0x310   : > { %v546_v7 = vpop.f32.mrf.mxu0  ;;  %v675_v41 = vpop.f32.mrf.mxu1 }
 0x311   : > { %1243 = vmax.xlane.f32.xlu2 %v1242_v57  ;;  %v5737_v42 = vpack.c.bf16 %v675_v41, %v546_v7 }
 0x312   : > { %1531 = vmatpush.bf16.xpose.msra.mxu2 %v5713_v24 }
 0x313   : > { %1550 = vmatpush.bf16.xpose.msra.mxu3 %v5715_v61  ;;  %7576 = vst [vmem:[#allocation32_spill] sm:$0xff] %v5737_v42  ;;  %v7589_v42 = vld [vmem:[#allocation23_spill] sm:$0xff] }
 0x318   : > { %v5739_v33 = vpop.f32.mrf.mxu0  ;;  %v5741_v36 = vpop.f32.mrf.mxu1 }
 0x319   : > { %1237 = vmax.xlane.f32.xlu2 %v1236_v52  ;;  %7577 = vst [vmem:[#allocation31_spill] sm:$0xff] %v5739_v33  ;;  %v7591_v33 = vld [vmem:[#allocation45_spill] sm:$0xff] }
 0x31a   : > { %1532 = vmatpush.bf16.xpose.msra.mxu2 %v5723_v21  ;;  %7578 = vst [vmem:[#allocation30_spill] sm:$0xff] %v5741_v36 }
 0x31b   : > { %1551 = vmatpush.bf16.xpose.msra.mxu3 %v5725_v2 }
 0x31c   : > { %v5733_v19 = vpop.xlane.xlu2 %1258 }
 0x320   : > { %v551_v6 = vpop.f32.mrf.mxu0  ;;  %v680_v54 = vpop.f32.mrf.mxu1 }
 0x321   : > { %v5749_v57 = vpack.c.bf16 %v680_v54, %v551_v6  ;;  %v7586_v6 = vld [vmem:[#allocation20_spill] sm:$0xff] }
 0x323   : > { %7580 = vst [vmem:[#allocation46_spill] sm:$0xff] %v5749_v57 }
 0x324   : > { %v5735_v14 = vpop.xlane.xlu2 %1261 }
 0x328   : > { %v5753_v31 = vpop.f32.mrf.mxu0  ;;  %v5755_v62 = vpop.f32.mrf.mxu1 }
 0x329   : > { %7582 = vst [vmem:[#allocation47_spill] sm:$0xff] %v5753_v31 }
 0x32a   : > { %7583 = vst [vmem:[#allocation48_spill] sm:$0xff] %v5755_v62 }
 0x32c   : > { %v5743_v40 = vpop.xlane.xlu2 %1264 }
 0x330   : > { %v556_v52 = vpop.f32.mrf.mxu0  ;;  %v685_v34 = vpop.f32.mrf.mxu1 }
 0x331   : > { %1667 = vrot.lane.b32.xlu2 %v7579_v55, %s5137_s21  ;;  %v5762_v41 = vpack.c.bf16 %v685_v34, %v556_v52 }
 0x333   : > { %7585 = vst [vmem:[#allocation49_spill] sm:$0xff] %v5762_v41 }
 0x334   : > { %v5747_v5 = vpop.xlane.xlu2 %1267 }
 0x338   : > { %v5766_v54 = vpop.f32.mrf.mxu0  ;;  %v5768_v57 = vpop.f32.mrf.mxu1 }
 0x339   : > { %1671 = vrot.lane.b32.xlu2 %v7581_v13, %s5137_s21  ;;  %7587 = vst [vmem:[#allocation50_spill] sm:$0xff] %v5766_v54 }
 0x33a   : > { %7588 = vst [vmem:[#allocation51_spill] sm:$0xff] %v5768_v57 }
 0x33c   : > { %v1271_v32 = vpop.xlane.xlu2 %1270 }
 0x33d   : > { %v1338_v13 = vsub.f32 %v7594_v63, %v1271_v32 }
 0x341   : > { %1677 = vrot.lane.b32.xlu2 %v7584_v15, %s5137_s21 }
 0x344   : > { %v1274_v7 = vpop.xlane.xlu2 %1273 }
 0x347   : > { %v561_v34 = vpop.f32.mrf.mxu0  ;;  %v690_v41 = vpop.f32.mrf.mxu1 }
 0x349   : > { %1683 = vrot.lane.b32.xlu2 %v7586_v6, %s5137_s21  ;;  %v1340_v6 = vsub.f32 %v7591_v33, %v1274_v7 }
 0x34c   : > { %v1277_v62 = vpop.xlane.xlu2 %1276 }
 0x34d   : > { %v1341_v31 = vsub.f32 %v5591_v23, %v1277_v62  ;;  %v1342_v29 = vsub.f32 %v5593_v16, %v1277_v62  ;;  %v1339_v16 = vsub.f32 %v7590_v4, %v1274_v7  ;;  %v1463_v4 = vmul.f32 1.442695, %v1340_v6 }
 0x34f   : > { %v1465_v52 = vmul.f32 1.442695, %v1341_v31  ;;  %v1467_v54 = vmul.f32 1.442695, %v1342_v29  ;;  %v7593_v31 = vld [vmem:[#allocation26_spill] sm:$0xff]  ;;  %v842_v29 = vpack.c.bf16 %v690_v41, %v561_v34  ;;  %v7595_v41 = vld [vmem:[#allocation40_spill] sm:$0xff] }
 0x350   : > { %v7596_v34 = vld [vmem:[#allocation38_spill] sm:$0xff] }
 0x351   : > { %1689 = vrot.lane.b32.xlu2 %v7589_v42, %s5137_s21  ;;  %4665 = vpow2.f32 %v1465_v52  ;;  %v7592_v42 = vld [vmem:[#allocation42_spill] sm:$0xff]  ;;  %v1509_v7 = vunpack.c.l.b16 %v842_v29  ;;  %v1333_v6 = vsub.f32 %v7596_v34, %v5743_v40  ;;  %v7601_v34 = vld [vmem:[#allocation37_spill] sm:$0xff] }
 0x352   : > { %4667 = vpow2.f32 %v1467_v54  ;;  %v1337_v15 = vsub.f32 %v7592_v42, %v1271_v32  ;;  %v1510_v54 = vunpack.c.h.b16 %v842_v29  ;;  %v1335_v32 = vsub.f32 %v7595_v41, %v5747_v5 }
 0x354   : > { %v1280_v58 = vpop.xlane.xlu2 %1279  ;;  %v1457_v33 = vmul.f32 1.442695, %v1337_v15  ;;  %v1453_v41 = vmul.f32 1.442695, %v1335_v32 }
 0x355   : > { %v1343_v57 = vsub.f32 %v5600_v60, %v1280_v58  ;;  %v1344_v23 = vsub.f32 %v5602_v47, %v1280_v58  ;;  %v1461_v60 = vmul.f32 1.442695, %v1339_v16  ;;  %v563_v47 = vpop.f32.mrf.mxu0  ;;  %v692_v58 = vpop.f32.mrf.mxu1  ;;  %v7597_v16 = vld [vmem:[#allocation41_spill] sm:$0xff] }
 0x356   : > { %v1336_v63 = vsub.f32 %v7597_v16, %v5747_v5  ;;  %v1332_v16 = vsub.f32 %v7601_v34, %v5735_v14  ;;  %v4558_v34 = vld [vmem:[%s7371_s1 + $0xa8] sm:$0xff] }
 0x357   : > { %v1469_v62 = vmul.f32 1.442695, %v1343_v57  ;;  %v1471_v36 = vmul.f32 1.442695, %v1344_v23  ;;  %v843_v57 = vpack.c.bf16 %v692_v58, %v563_v47  ;;  %v4666_v23 = vpop.eup %4665 }
 0x358   : > { %v4668_v42 = vpop.eup %4667 }
 0x359   : > { %4669 = vpow2.f32 %v1469_v62  ;;  %1695 = vrot.lane.b32.xlu2 %v7593_v31, %s5137_s21  ;;  %v1459_v62 = vmul.f32 1.442695, %v1338_v13  ;;  %v1511_v55 = vunpack.c.l.b16 %v843_v57  ;;  %v1512_v2 = vunpack.c.h.b16 %v843_v57  ;;  %v4557_v13 = vld [vmem:[%s7371_s1 + $0xa0] sm:$0xff] }
 0x35a   : > { %4671 = vpow2.f32 %v1471_v36  ;;  %580 = vmatmul.bf16.gmra.mxu0 %v4557_v13  ;;  %709 = vmatmul.bf16.gmra.mxu1 %v4557_v13  ;;  %v7602_v13 = vld [vmem:[#allocation35_spill] sm:$0xff] }
 0x35b   : > { %4673 = vpow2.f32 %v1461_v60  ;;  %v5796_v47 = vpack.c.b16 %v1511_v55, %v1509_v7  ;;  %v5798_v58 = vpack.c.b16 %v1512_v2, %v1510_v54  ;;  %v7598_v60 = vld [vmem:[#allocation39_spill] sm:$0xff]  ;;  %v1449_v55 = vmul.f32 1.442695, %v1333_v6 }
 0x35c   : > { %v5785_v52 = vpop.xlane.xlu2 %1252  ;;  %4675 = vpow2.f32 %v1463_v4  ;;  %v1334_v57 = vsub.f32 %v7598_v60, %v5743_v40  ;;  %v1455_v4 = vmul.f32 1.442695, %v1336_v63  ;;  %v7599_v40 = vld [vmem:[#allocation34_spill] sm:$0xff] }
 0x35d   : > { %4677 = vpow2.f32 %v1457_v33  ;;  %1533 = vmatmul.bf16.vlgmr.msra.gmra.mxu2 %v5796_v47  ;;  %1552 = vmatmul.bf16.vlgmr.msra.gmra.mxu3 %v5798_v58  ;;  %v1329_v7 = vsub.f32 %v7599_v40, %v5733_v19 }
 0x35e   : > { %4679 = vpow2.f32 %v1459_v62  ;;  %v566_v5 = vpop.f32.mrf.mxu0  ;;  %v1451_v54 = vmul.f32 1.442695, %v1334_v57  ;;  %v7600_v62 = vld [vmem:[#allocation36_spill] sm:$0xff] }
 0x35f   : > { %v4670_v31 = vpop.eup %4669  ;;  %v1331_v32 = vsub.f32 %v7600_v62, %v5735_v14  ;;  %4681 = vpow2.f32 %v1453_v41  ;;  %v1441_v60 = vmul.f32 1.442695, %v1329_v7  ;;  %v1447_v62 = vmul.f32 1.442695, %v1332_v16 }
 0x360   : > { %v4672_v36 = vpop.eup %4671  ;;  %v1503_v15 = vpack.c.bf16 %v4670_v31, %v4666_v23  ;;  %v695_v31 = vpop.f32.mrf.mxu1  ;;  %4683 = vpow2.f32 %v1455_v4  ;;  %v1325_v16 = vsub.f32 %v5518_v8, %v5785_v52 }
 0x361   : > { %v1504_v29 = vpack.c.bf16 %v4672_v36, %v4668_v42  ;;  %v4674_v33 = vpop.eup %4673  ;;  %4685 = vpow2.f32 %v1449_v55  ;;  %v1445_v57 = vmul.f32 1.442695, %v1331_v32 }
 0x362   : > { %1563 = vmatpush.bf16.xpose.msrb.mxu2 %v1503_v15  ;;  %1627 = vmatpush.bf16.xpose.msrb.mxu0 %v1503_v15  ;;  %v4676_v2 = vpop.eup %4675  ;;  %v844_v15 = vpack.c.bf16 %v695_v31, %v566_v5  ;;  %4687 = vpow2.f32 %v1451_v54 }
 0x363   : > { %1582 = vmatpush.bf16.xpose.msrb.mxu3 %v1504_v29  ;;  %1640 = vmatpush.bf16.xpose.msrb.mxu1 %v1504_v29  ;;  %v4678_v42 = vpop.eup %4677  ;;  %v1330_v29 = vsub.f32 %v7602_v13, %v5733_v19  ;;  %4689 = vpow2.f32 %v1441_v60  ;;  %v1433_v60 = vmul.f32 1.442695, %v1325_v16 }
 0x364   : > { %v1256_v23 = vpop.xlane.xlu2 %1255  ;;  %v4680_v36 = vpop.eup %4679  ;;  %v1501_v6 = vpack.c.bf16 %v4674_v33, %v4678_v42  ;;  %v1513_v33 = vunpack.c.l.b16 %v844_v15  ;;  %v1514_v55 = vunpack.c.h.b16 %v844_v15  ;;  %4691 = vpow2.f32 %v1445_v57 }
 0x365   : > { %v1502_v63 = vpack.c.bf16 %v4676_v2, %v4680_v36  ;;  %v4682_v4 = vpop.eup %4681  ;;  %v1443_v5 = vmul.f32 1.442695, %v1330_v29  ;;  %v1327_v54 = vsub.f32 %v5526_v37, %v1256_v23  ;;  %4693 = vpow2.f32 %v1447_v62 }
 0x366   : > { %v568_v41 = vpop.f32.mrf.mxu0  ;;  %v4684_v2 = vpop.eup %4683  ;;  %v1328_v32 = vsub.f32 %v5528_v56, %v1256_v23  ;;  %v1326_v37 = vsub.f32 %v5520_v25, %v5785_v52 }
 0x367   : > { %v4686_v7 = vpop.eup %4685  ;;  %4695 = vpow2.f32 %v1443_v5  ;;  %v1437_v56 = vmul.f32 1.442695, %v1327_v54 }
 0x368   : > { %v697_v40 = vpop.f32.mrf.mxu1  ;;  %v4688_v42 = vpop.eup %4687  ;;  %v1499_v36 = vpack.c.bf16 %v4682_v4, %v4686_v7  ;;  %v1439_v13 = vmul.f32 1.442695, %v1328_v32 }
 0x369   : > { %v845_v14 = vpack.c.bf16 %v697_v40, %v568_v41  ;;  %v4690_v23 = vpop.eup %4689  ;;  %v1435_v41 = vmul.f32 1.442695, %v1326_v37  ;;  %4697 = vpow2.f32 %v1437_v56 }
 0x36a   : > { %1564 = vmatpush.bf16.xpose.msrb.mxu2 %v1501_v6  ;;  %1628 = vmatpush.bf16.xpose.msrb.mxu0 %v1501_v6  ;;  %v1500_v6 = vpack.c.bf16 %v4684_v2, %v4688_v42  ;;  %v4692_v8 = vpop.eup %4691  ;;  %4699 = vpow2.f32 %v1439_v13 }
 0x36b   : > { %1583 = vmatpush.bf16.xpose.msrb.mxu3 %v1502_v63  ;;  %1641 = vmatpush.bf16.xpose.msrb.mxu1 %v1502_v63  ;;  %v1515_v31 = vunpack.c.l.b16 %v845_v14  ;;  %v1516_v19 = vunpack.c.h.b16 %v845_v14  ;;  %v4694_v57 = vpop.eup %4693  ;;  %v1497_v62 = vpack.c.bf16 %v4692_v8, %v4690_v23  ;;  %4701 = vpow2.f32 %v1433_v60 }
 0x36c   : > { %v1247_v21 = vpop.xlane.xlu2 %1246  ;;  %585 = vmatmul.bf16.gmra.mxu0 %v4558_v34  ;;  %714 = vmatmul.bf16.gmra.mxu1 %v4558_v34  ;;  %4703 = vpow2.f32 %v1435_v41 }
 0x36d   : > { %v5819_v63 = vpack.c.b16 %v1515_v31, %v1513_v33  ;;  %v5821_v15 = vpack.c.b16 %v1516_v19, %v1514_v55  ;;  %v4696_v52 = vpop.eup %4695  ;;  %v1321_v14 = vsub.f32 %v5499_v28, %v1247_v21  ;;  %v1322_v33 = vsub.f32 %v5501_v27, %v1247_v21 }
 0x36e   : > { %v1498_v4 = vpack.c.bf16 %v4694_v57, %v4696_v52  ;;  %v7604_v57 = vld [vmem:[#allocation28_spill] sm:$0xff] }
 0x36f   : > { %1538 = vmatmul.bf16.gmra.mxu2 %v5819_v63  ;;  %1557 = vmatmul.bf16.gmra.mxu3 %v5821_v15  ;;  %v1425_v31 = vmul.f32 1.442695, %v1321_v14  ;;  %v1427_v7 = vmul.f32 1.442695, %v1322_v33 }
 0x372   : > { %1565 = vmatpush.bf16.xpose.msrb.mxu2 %v1499_v36  ;;  %1629 = vmatpush.bf16.xpose.msrb.mxu0 %v1499_v36  ;;  %v1235_v36 = vpop.xlane.xlu1 %1234 }
 0x373   : > { %1584 = vmatpush.bf16.xpose.msrb.mxu3 %v1500_v6  ;;  %1642 = vmatpush.bf16.xpose.msrb.mxu1 %v1500_v6  ;;  %v1314_v41 = vsub.f32 %v7604_v57, %v1235_v36 }
 0x374   : > { %v1250_v29 = vpop.xlane.xlu2 %1249 }
 0x375   : > { %v1323_v25 = vsub.f32 %v5507_v26, %v1250_v29  ;;  %v1324_v40 = vsub.f32 %v5509_v50, %v1250_v29  ;;  %v4698_v26 = vpop.eup %4697 }
 0x376   : > { %v4700_v19 = vpop.eup %4699 }
 0x377   : > { %v1429_v55 = vmul.f32 1.442695, %v1323_v25  ;;  %v1431_v2 = vmul.f32 1.442695, %v1324_v40  ;;  %v4702_v50 = vpop.eup %4701 }
 0x378   : > { %v4704_v28 = vpop.eup %4703  ;;  %v1495_v27 = vpack.c.bf16 %v4698_v26, %v4702_v50 }
 0x379   : > { %4705 = vpow2.f32 %v1429_v55  ;;  %v1496_v21 = vpack.c.bf16 %v4700_v19, %v4704_v28 }
 0x37a   : > { %1566 = vmatpush.bf16.xpose.msrb.mxu2 %v1497_v62  ;;  %1630 = vmatpush.bf16.xpose.msrb.mxu0 %v1497_v62  ;;  %4707 = vpow2.f32 %v1431_v2 }
 0x37b   : > { %1585 = vmatpush.bf16.xpose.msrb.mxu3 %v1498_v4  ;;  %1643 = vmatpush.bf16.xpose.msrb.mxu1 %v1498_v4  ;;  %4709 = vpow2.f32 %v1425_v31 }
 0x37c   : > { %v1241_v5 = vpop.xlane.xlu2 %1240  ;;  %4711 = vpow2.f32 %v1427_v7 }
 0x37d   : > { %v1317_v54 = vsub.f32 %v5482_v30, %v1241_v5  ;;  %v1318_v42 = vsub.f32 %v5484_v45, %v1241_v5  ;;  %v7603_v45 = vld [vmem:[#allocation27_spill] sm:$0xff] }
 0x37e   : > { %v1313_v13 = vsub.f32 %v7603_v45, %v1235_v36 }
 0x37f   : > { %v1417_v32 = vmul.f32 1.442695, %v1317_v54  ;;  %v1419_v34 = vmul.f32 1.442695, %v1318_v42  ;;  %v4706_v6 = vpop.eup %4705  ;;  %v7437_v42 = vmov 1065369472  }
 0x380   : > { %v4708_v56 = vpop.eup %4707 }
 0x381   : > { %v4710_v23 = vpop.eup %4709  ;;  %4713 = vpow2.f32 %v1417_v32 }
 0x382   : > { %1567 = vmatpush.bf16.xpose.msrb.mxu2 %v1495_v27  ;;  %1631 = vmatpush.bf16.xpose.msrb.mxu0 %v1495_v27  ;;  %v4712_v60 = vpop.eup %4711  ;;  %4715 = vpow2.f32 %v1419_v34  ;;  %v1493_v25 = vpack.c.bf16 %v4706_v6, %v4710_v23  ;;  %v7609_v27 = vld [vmem:[#allocation29_spill] sm:$0xff]  ;;  %v1666_v23 = vpop.permute.xlu1 %1665 }
 0x383   : > { %1586 = vmatpush.bf16.xpose.msrb.mxu3 %v1496_v21  ;;  %1644 = vmatpush.bf16.xpose.msrb.mxu1 %v1496_v21  ;;  %v1494_v52 = vpack.c.bf16 %v4708_v56, %v4712_v60 }
 0x384   : > { %v1244_v16 = vpop.xlane.xlu2 %1243 }
 0x385   : > { %v1319_v37 = vsub.f32 %v7568_v39, %v1244_v16  ;;  %v1320_v30 = vsub.f32 %v7567_v38, %v1244_v16  ;;  %v1409_v39 = vmul.f32 1.442695, %v1313_v13  ;;  %v1411_v38 = vmul.f32 1.442695, %v1314_v41 }
 0x387   : > { %v1421_v29 = vmul.f32 1.442695, %v1319_v37  ;;  %v1423_v8 = vmul.f32 1.442695, %v1320_v30  ;;  %v4714_v62 = vpop.eup %4713 }
 0x388   : > { %v4716_v33 = vpop.eup %4715 }
 0x389   : > { %4717 = vpow2.f32 %v1421_v29 }
 0x38a   : > { %4719 = vpow2.f32 %v1423_v8  ;;  %1568 = vmatpush.bf16.xpose.msrb.mxu2 %v1493_v25  ;;  %1632 = vmatpush.bf16.xpose.msrb.mxu0 %v1493_v25 }
 0x38b   : > { %1587 = vmatpush.bf16.xpose.msrb.mxu3 %v1494_v52  ;;  %1645 = vmatpush.bf16.xpose.msrb.mxu1 %v1494_v52  ;;  %4721 = vpow2.f32 %v1409_v39  ;;  %v1670_v39 = vpop.permute.xlu0 %1669 }
 0x38c   : > { %v1238_v40 = vpop.xlane.xlu2 %1237  ;;  %4723 = vpow2.f32 %v1411_v38 }
 0x38d   : > { %v1315_v14 = vsub.f32 %v7571_v51, %v1238_v40  ;;  %v1316_v4 = vsub.f32 %v7570_v20, %v1238_v40 }
 0x38f   : > { %v4718_v55 = vpop.eup %4717  ;;  %v1413_v2 = vmul.f32 1.442695, %v1315_v14  ;;  %v1415_v5 = vmul.f32 1.442695, %v1316_v4 }
 0x390   : > { %v4720_v26 = vpop.eup %4719  ;;  %v1491_v31 = vpack.c.bf16 %v4718_v55, %v4714_v62 }
 0x391   : > { %4725 = vpow2.f32 %v1413_v2  ;;  %v1492_v19 = vpack.c.bf16 %v4720_v26, %v4716_v33  ;;  %v4722_v7 = vpop.eup %4721 }
 0x392   : > { %4727 = vpow2.f32 %v1415_v5  ;;  %1569 = vmatpush.bf16.xpose.msrb.mxu2 %v1491_v31  ;;  %1633 = vmatpush.bf16.xpose.msrb.mxu0 %v1491_v31  ;;  %v4724_v50 = vpop.eup %4723 }
 0x393   : > { %1588 = vmatpush.bf16.xpose.msrb.mxu3 %v1492_v19  ;;  %1646 = vmatpush.bf16.xpose.msrb.mxu1 %v1492_v19 }
 0x394   : > { %v1668_v52 = vpop.permute.xlu2 %1667 }
 0x397   : > { %v4726_v51 = vpop.eup %4725 }
 0x398   : > { %v4728_v54 = vpop.eup %4727  ;;  %v1489_v20 = vpack.c.bf16 %v4726_v51, %v4722_v7 }
 0x399   : > { %v1490_v28 = vpack.c.bf16 %v4728_v54, %v4724_v50  ;;  %v1674_v54 = vpop.permute.xlu1 %1673 }
 0x39a   : > { %1570 = vmatpush.bf16.xpose.msrb.mxu2 %v1489_v20  ;;  %1634 = vmatpush.bf16.xpose.msrb.mxu0 %v1489_v20 }
 0x39b   : > { %1589 = vmatpush.bf16.xpose.msrb.mxu3 %v1490_v28  ;;  %1647 = vmatpush.bf16.xpose.msrb.mxu1 %v1490_v28 }
 0x39c   : > { %v1672_v62 = vpop.permute.xlu2 %1671 }
 0x3a1   : > { %1571 = vmatmul.bf16.vlgmr.msrb.gmra.mxu2 %v5796_v47  ;;  %1635 = vmatmul.bf16.vlgmr.msrb.gmra.mxu0 %v7437_v42 }
 0x3a2   : > { %1601 = vmatpush.bf16.xpose.msra.mxu2 %v5610_v22  ;;  %1590 = vmatmul.bf16.vlgmr.msrb.gmra.mxu3 %v5798_v58  ;;  %v571_v22 = vpop.f32.mrf.mxu0 }
 0x3a3   : > { %1614 = vmatpush.bf16.xpose.msra.mxu3 %v5614_v9  ;;  %1648 = vmatmul.bf16.vlgmr.msrb.gmra.mxu1 %v7437_v42  ;;  %v700_v9 = vpop.f32.mrf.mxu1 }
 0x3aa   : > { %1602 = vmatpush.bf16.xpose.msra.mxu2 %v5629_v44  ;;  %v5855_v44 = vpack.c.bf16 %v700_v9, %v571_v22 }
 0x3ab   : > { %1615 = vmatpush.bf16.xpose.msra.mxu3 %v5633_v18  ;;  %v5859_v18 = vpop.f32.mrf.mxu0 }
 0x3ac   : > { %7605 = vst [vmem:[#allocation44_spill] sm:$0xff] %v5855_v44 }
 0x3ad   : > { %7606 = vst [vmem:[#allocation45_spill] sm:$0xff] %v5859_v18 }
 0x3b1   : > { %1576 = vmatmul.bf16.gmra.mxu2 %v5819_v63  ;;  %v1701_v63 = vunpack.c.l.b16 %v5655_v1 }
 0x3b2   : > { %1603 = vmatpush.bf16.xpose.msra.mxu2 %v5645_v12  ;;  %1595 = vmatmul.bf16.gmra.mxu3 %v5821_v15  ;;  %v5861_v12 = vpop.f32.mrf.mxu1 }
 0x3b3   : > { %1616 = vmatpush.bf16.xpose.msra.mxu3 %v5649_v49  ;;  %7607 = vst [vmem:[#allocation42_spill] sm:$0xff] %v5861_v12  ;;  %v833_v49 = vpack.c.bf16 %v5709_v35, %v5707_v10  ;;  %v1702_v10 = vunpack.c.h.b16 %v5655_v1 }
 0x3ba   : > { %1604 = vmatpush.bf16.xpose.msra.mxu2 %v5663_v43  ;;  %v831_v43 = vpack.c.bf16 %v5675_v48, %v5673_v0  ;;  %v705_v47 = vpop.f32.mrf.mxu1  ;;  %v7610_v0 = vld [vmem:[#allocation17_spill] sm:$0xff] }
 0x3bb   : > { %1617 = vmatpush.bf16.xpose.msra.mxu3 %v5667_v11  ;;  %v1705_v11 = vunpack.c.l.b16 %v5689_v3 }
 0x3bc   : > { %v1703_v35 = vunpack.c.l.b16 %v831_v43 }
 0x3be   : > { %v1709_v48 = vpack.c.b16 %v1703_v35, %v1701_v63 }
 0x3c2   : > { %1605 = vmatpush.bf16.xpose.msra.mxu2 %v5681_v59  ;;  %v1706_v59 = vunpack.c.h.b16 %v5689_v3  ;;  %v5879_v32 = vpop.f32.mrf.mxu1 }
 0x3c3   : > { %1618 = vmatpush.bf16.xpose.msra.mxu3 %v5684_v17  ;;  %v1707_v17 = vunpack.c.l.b16 %v833_v49  ;;  %7612 = vst [vmem:[#allocation38_spill] sm:$0xff] %v5879_v32 }
 0x3ca   : > { %1606 = vmatpush.bf16.xpose.msra.mxu2 %v5697_v53  ;;  %v1708_v53 = vunpack.c.h.b16 %v833_v49 }
 0x3cb   : > { %1619 = vmatpush.bf16.xpose.msra.mxu3 %v5701_v46  ;;  %v576_v46 = vpop.f32.mrf.mxu0 }
 0x3cc   : > { %v5871_v58 = vpack.c.bf16 %v705_v47, %v576_v46  ;;  %v1712_v15 = vpack.c.b16 %v1708_v53, %v1706_v59  ;;  %v1676_v46 = vpop.permute.xlu0 %1675 }
 0x3ce   : > { %7608 = vst [vmem:[#allocation43_spill] sm:$0xff] %v5871_v58 }
 0x3d2   : > { %1607 = vmatpush.bf16.xpose.msra.mxu2 %v5713_v24  ;;  %v1704_v24 = vunpack.c.h.b16 %v831_v43 }
 0x3d3   : > { %1620 = vmatpush.bf16.xpose.msra.mxu3 %v5715_v61  ;;  %v1711_v61 = vpack.c.b16 %v1707_v17, %v1705_v11  ;;  %v5877_v21 = vpop.f32.mrf.mxu0 }
 0x3d4   : > { %v1710_v3 = vpack.c.b16 %v1704_v24, %v1702_v10  ;;  %7611 = vst [vmem:[#allocation40_spill] sm:$0xff] %v5877_v21 }
 0x3d7   : > { %v710_v36 = vpop.f32.mrf.mxu1 }
 0x3da   : > { %1608 = vmatpush.bf16.xpose.msra.mxu2 %v7609_v27 }
 0x3db   : > { %1621 = vmatpush.bf16.xpose.msra.mxu3 %v7610_v0  ;;  %v581_v1 = vpop.f32.mrf.mxu0 }
 0x3dc   : > { %v5883_v34 = vpack.c.bf16 %v710_v36, %v581_v1 }
 0x3de   : > { %7613 = vst [vmem:[#allocation41_spill] sm:$0xff] %v5883_v34 }
 0x3df   : > { %v5889_v56 = vpop.f32.mrf.mxu1 }
 0x3e0   : > { %v1534_v16 = vpop.f32.mrf.mxu2  ;;  %v1553_v6 = vpop.f32.mrf.mxu3  ;;  %7615 = vst [vmem:[#allocation34_spill] sm:$0xff] %v5889_v56 }
 0x3e1   : > { %1609 = vmatmul.bf16.vlgmr.msra.gmra.mxu2 %v7437_v42  ;;  %v5885_v37 = vadd.f32 %v1553_v6, %v1534_v16 }
 0x3e2   : > { %1771 = vmatpush.bf16.msrb.mxu2 %v1711_v61  ;;  %1622 = vmatmul.bf16.vlgmr.msra.gmra.mxu3 %v7437_v42  ;;  %v1678_v61 = vpop.permute.xlu2 %1677 }
 0x3e3   : > { %1860 = vmatpush.bf16.msrb.mxu3 %v1712_v15  ;;  %v5887_v30 = vpop.f32.mrf.mxu0  ;;  %v1680_v15 = vpop.permute.xlu1 %1679 }
 0x3e4   : > { %7614 = vst [vmem:[#allocation39_spill] sm:$0xff] %v5887_v30 }
 0x3e6   : > { %1772 = vmatpush.bf16.msrb.mxu2 %v1709_v48 }
 0x3e7   : > { %1861 = vmatpush.bf16.msrb.mxu3 %v1710_v3 }
 0x3e8   : > { %v5893_v45 = vpop.f32.mrf.mxu2  ;;  %v5895_v13 = vpop.f32.mrf.mxu3 }
 0x3e9   : > { %v715_v8 = vpop.f32.mrf.mxu1  ;;  %v1556_v16 = vadd.f32 %v5895_v13, %v5893_v45 }
 0x3eb   : > { %v586_v29 = vpop.f32.mrf.mxu0 }
 0x3ec   : > { %v5897_v60 = vpack.c.bf16 %v715_v8, %v586_v29  ;;  %v1682_v29 = vpop.permute.xlu0 %1681 }
 0x3ee   : > { %7616 = vst [vmem:[#allocation36_spill] sm:$0xff] %v5897_v60 }
 0x3f1   : > { %4405 = vmatmul.msk.bf16.vlgmr.msrb.gmra.mxu2 %vm958_vm0, %v1666_v23  ;;  %v5907_v40 = vpop.f32.mrf.mxu1 }
 0x3f2   : > { %4421 = vmatmul.msk.bf16.vlgmr.msrb.gmra.mxu3 %vm958_vm0, %v1666_v23  ;;  %v1539_v57 = vpop.f32.mrf.mxu2  ;;  %v1558_v41 = vpop.f32.mrf.mxu3  ;;  %7618 = vst [vmem:[#allocation35_spill] sm:$0xff] %v5907_v40 }
 0x3f3   : > { %v5899_v25 = vadd.f32 %v1558_v41, %v1539_v57  ;;  %v5905_v38 = vpop.f32.mrf.mxu0 }
 0x3f4   : > { %7617 = vst [vmem:[#allocation37_spill] sm:$0xff] %v5905_v38 }
 0x3fa   : > { %v1541_v14 = vpop.f32.mrf.mxu2  ;;  %v1560_v4 = vpop.f32.mrf.mxu3 }
 0x3fb   : > { %v1561_v6 = vadd.f32 %v1560_v4, %v1541_v14  ;;  %v1684_v14 = vpop.permute.xlu2 %1683 }
 0x401   : > { %4406 = vmatmul.msk.bf16.gmra.mxu2 %vm958_vm0, %v1668_v52 }
 0x402   : > { %4422 = vmatmul.msk.bf16.gmra.mxu3 %vm958_vm0, %v1668_v52 }
 0x411   : > { %4407 = vmatmul.msk.bf16.gmra.mxu2 %vm958_vm0, %v1670_v39 }
 0x412   : > { %4423 = vmatmul.msk.bf16.gmra.mxu3 %vm958_vm0, %v1670_v39 }
 0x41e   : > { %v1636_v33 = vpop.f32.mrf.mxu0 }
 0x420   : > { %v1649_v55 = vpop.f32.mrf.mxu1 }
 0x421   : > { %4408 = vmatmul.msk.bf16.gmra.mxu2 %vm958_vm0, %v1672_v62  ;;  %v1650_v2 = vadd.f32 %v1649_v55, %v1636_v33 }
 0x422   : > { %4424 = vmatmul.msk.bf16.gmra.mxu3 %vm958_vm0, %v1672_v62 }
 0x423   : > { %4729 = vrcp.f32 %v1650_v2 }
 0x424   : > { %v1572_v5 = vpop.f32.mrf.mxu2 }
 0x425   : > { %v1591_v26 = vpop.f32.mrf.mxu3 }
 0x426   : > { %v1592_v31 = vadd.f32 %v1591_v26, %v1572_v5  ;;  %v1638_v19 = vpop.f32.mrf.mxu0  ;;  %v1686_v5 = vpop.permute.xlu1 %1685 }
 0x428   : > { %v1651_v7 = vpop.f32.mrf.mxu1 }
 0x429   : > { %v4730_v50 = vpop.eup %4729 }
 0x42a   : > { %v1656_v51 = vperm.slane %v4730_v50, 0  ;;  %v1688_v50 = vpop.permute.xlu0 %1687 }
 0x42c   : > { %v5911_v20 = vmul.f32 %v1656_v51, %v1592_v31  ;;  %v1574_v28 = vpop.f32.mrf.mxu2 }
 0x42d   : > { %v1593_v22 = vpop.f32.mrf.mxu3 }
 0x42e   : > { %7619 = vst [vmem:[#allocation27_spill] sm:$0xff] %v5911_v20  ;;  %v1594_v9 = vadd.f32 %v1593_v22, %v1574_v28 }
 0x430   : > { %v5915_v49 = vmul.f32 %v1656_v51, %v1594_v9  ;;  %v1690_v9 = vpop.permute.xlu2 %1689 }
 0x431   : > { %4409 = vmatmul.msk.bf16.gmra.mxu2 %vm958_vm0, %v1674_v54 }
 0x432   : > { %4425 = vmatmul.msk.bf16.gmra.mxu3 %vm958_vm0, %v1674_v54  ;;  %7620 = vst [vmem:[#allocation28_spill] sm:$0xff] %v5915_v49 }
 0x434   : > { %v1577_v11 = vpop.f32.mrf.mxu2 }
 0x435   : > { %v1596_v59 = vpop.f32.mrf.mxu3 }
 0x436   : > { %v1597_v17 = vadd.f32 %v1596_v59, %v1577_v11 }
 0x438   : > { %v5919_v53 = vmul.f32 %v1656_v51, %v1597_v17 }
 0x43a   : > { %7621 = vst [vmem:[#allocation29_spill] sm:$0xff] %v5919_v53 }
 0x43c   : > { %v1579_v47 = vpop.f32.mrf.mxu2 }
 0x43d   : > { %v1598_v63 = vpop.f32.mrf.mxu3 }
 0x43e   : > { %v1599_v10 = vadd.f32 %v1598_v63, %v1579_v47  ;;  %v1692_v47 = vpop.permute.xlu1 %1691 }
 0x440   : > { %v5923_v35 = vmul.f32 %v1656_v51, %v1599_v10 }
 0x441   : > { %4410 = vmatmul.msk.bf16.gmra.mxu2 %vm958_vm0, %v1676_v46 }
 0x442   : > { %4426 = vmatmul.msk.bf16.gmra.mxu3 %vm958_vm0, %v1676_v46  ;;  %7622 = vst [vmem:[#allocation17_spill] sm:$0xff] %v5923_v35 }
 0x451   : > { %4411 = vmatmul.msk.bf16.gmra.mxu2 %vm958_vm0, %v1678_v61 }
 0x452   : > { %4427 = vmatmul.msk.bf16.gmra.mxu3 %vm958_vm0, %v1678_v61 }
 0x461   : > { %4412 = vmatmul.msk.bf16.gmra.mxu2 %vm958_vm0, %v1680_v15 }
 0x462   : > { %4428 = vmatmul.msk.bf16.gmra.mxu3 %vm958_vm0, %v1680_v15 }
 0x464   : > { %v1610_v27 = vpop.f32.mrf.mxu2 }
 0x465   : > { %v1623_v0 = vpop.f32.mrf.mxu3 }
 0x466   : > { %v1624_v48 = vadd.f32 %v1623_v0, %v1610_v27  ;;  %v1694_v27 = vpop.permute.xlu0 %1693 }
 0x468   : > { %4731 = vrcp.f32 %v1624_v48 }
 0x46c   : > { %v1612_v3 = vpop.f32.mrf.mxu2 }
 0x46d   : > { %v1625_v1 = vpop.f32.mrf.mxu3 }
 0x46e   : > { %v4732_v36 = vpop.eup %4731 }
 0x46f   : > { %v1655_v23 = vperm.slane %v4732_v36, 0 }
 0x471   : > { %v5934_v8 = vmul.f32 %v1655_v23, %v5899_v25  ;;  %v5936_v57 = vmul.f32 %v1655_v23, %v1561_v6  ;;  %v5939_v41 = vmul.f32 %v1655_v23, %v5885_v37  ;;  %v5941_v52 = vmul.f32 %v1655_v23, %v1556_v16  ;;  %4413 = vmatmul.msk.bf16.gmra.mxu2 %vm958_vm0, %v1682_v29  ;;  %v1696_v6 = vpop.permute.xlu2 %1695 }
 0x472   : > { %4429 = vmatmul.msk.bf16.gmra.mxu3 %vm958_vm0, %v1682_v29 }
 0x473   : > { %7623 = vst [vmem:[#allocation52_spill] sm:$0xff] %v5934_v8 }
 0x474   : > { %7624 = vst [vmem:[#allocation53_spill] sm:$0xff] %v5936_v57  ;;  %v5949_v39 = vpop.f32.mrf.mxu2 }
 0x475   : > { %7625 = vst [vmem:[#allocation54_spill] sm:$0xff] %v5939_v41  ;;  %v5951_v25 = vpop.f32.mrf.mxu3 }
 0x476   : > { %7626 = vst [vmem:[#allocation55_spill] sm:$0xff] %v5941_v52 }
 0x47c   : > { %v5953_v62 = vpop.f32.mrf.mxu2 }
 0x47d   : > { %v5955_v37 = vpop.f32.mrf.mxu3 }
 0x47e   : > { %7627 = vst [vmem:[#allocation56_spill] sm:$0xff] %v5955_v37 }
 0x481   : > { %4414 = vmatmul.msk.bf16.gmra.mxu2 %vm958_vm0, %v1684_v14 }
 0x482   : > { %4430 = vmatmul.msk.bf16.gmra.mxu3 %vm958_vm0, %v1684_v14 }
 0x484   : > { %v5959_v4 = vpop.f32.mrf.mxu2 }
 0x485   : > { %v5961_v33 = vpop.f32.mrf.mxu3 }
 0x48c   : > { %v5963_v55 = vpop.f32.mrf.mxu2 }
 0x48d   : > { %v5965_v2 = vpop.f32.mrf.mxu3 }
 0x491   : > { %4415 = vmatmul.msk.bf16.gmra.mxu2 %vm958_vm0, %v1686_v5 }
 0x492   : > { %4431 = vmatmul.msk.bf16.gmra.mxu3 %vm958_vm0, %v1686_v5 }
 0x494   : > { %v5969_v26 = vpop.f32.mrf.mxu2 }
 0x495   : > { %v5971_v31 = vpop.f32.mrf.mxu3 }
 0x49c   : > { %v5973_v19 = vpop.f32.mrf.mxu2 }
 0x49d   : > { %v5975_v7 = vpop.f32.mrf.mxu3 }
 0x4a1   : > { %4416 = vmatmul.msk.bf16.gmra.mxu2 %vm958_vm0, %v1688_v50 }
 0x4a2   : > { %4432 = vmatmul.msk.bf16.gmra.mxu3 %vm958_vm0, %v1688_v50 }
 0x4a4   : > { %v5979_v51 = vpop.f32.mrf.mxu2 }
 0x4a5   : > { %v5981_v54 = vpop.f32.mrf.mxu3 }
 0x4a6   : > { %v1961_v14 = vmax.f32 %v5979_v51, %v5981_v54 }
 0x4ac   : > { %v5983_v28 = vpop.f32.mrf.mxu2 }
 0x4ad   : > { %v5985_v22 = vpop.f32.mrf.mxu3 }
 0x4b1   : > { %4417 = vmatmul.msk.bf16.gmra.mxu2 %vm958_vm0, %v1690_v9 }
 0x4b2   : > { %4433 = vmatmul.msk.bf16.gmra.mxu3 %vm958_vm0, %v1690_v9 }
 0x4b4   : > { %v5989_v11 = vpop.f32.mrf.mxu2 }
 0x4b5   : > { %v5991_v59 = vpop.f32.mrf.mxu3 }
 0x4bc   : > { %v5993_v17 = vpop.f32.mrf.mxu2 }
 0x4bd   : > { %v5995_v46 = vpop.f32.mrf.mxu3 }
 0x4c1   : > { %4418 = vmatmul.msk.bf16.gmra.mxu2 %vm958_vm0, %v1692_v47 }
 0x4c2   : > { %4434 = vmatmul.msk.bf16.gmra.mxu3 %vm958_vm0, %v1692_v47 }
 0x4c4   : > { %v5999_v63 = vpop.f32.mrf.mxu2 }
 0x4c5   : > { %v6001_v10 = vpop.f32.mrf.mxu3 }
 0x4cc   : > { %v6003_v61 = vpop.f32.mrf.mxu2 }
 0x4cd   : > { %v6005_v15 = vpop.f32.mrf.mxu3 }
 0x4ce   : > { %v1976_v16 = vmax.f32 %v6003_v61, %v6005_v15 }
 0x4d1   : > { %4419 = vmatmul.msk.bf16.gmra.mxu2 %vm958_vm0, %v1694_v27 }
 0x4d2   : > { %4435 = vmatmul.msk.bf16.gmra.mxu3 %vm958_vm0, %v1694_v27 }
 0x4d4   : > { %v6009_v0 = vpop.f32.mrf.mxu2 }
 0x4d5   : > { %v6011_v48 = vpop.f32.mrf.mxu3 }
 0x4d6   : > { %v1979_v3 = vmax.f32 %v6009_v0, %v6011_v48 }
 0x4d8   : > { %1980 = vmax.xlane.f32.xlu2 %v1979_v3 }
 0x4dc   : > { %v6015_v1 = vpop.f32.mrf.mxu2 }
 0x4dd   : > { %v6017_v36 = vpop.f32.mrf.mxu3 }
 0x4de   : > { %v1982_v47 = vmax.f32 %v6015_v1, %v6017_v36 }
 0x4e0   : > { %1977 = vmax.xlane.f32.xlu2 %v1976_v16 }
 0x4e1   : > { %4420 = vmatmul.msk.bf16.gmra.mxu2 %vm958_vm0, %v1696_v6 }
 0x4e2   : > { %4436 = vmatmul.msk.bf16.gmra.mxu3 %vm958_vm0, %v1696_v6  ;;  %v1967_v6 = vmax.f32 %v5989_v11, %v5991_v59 }
 0x4e4   : > { %v1809_v23 = vpop.f32.mrf.mxu2 }
 0x4e5   : > { %v6023_v29 = vpop.f32.mrf.mxu3 }
 0x4e6   : > { %v1985_v5 = vmax.f32 %v1809_v23, %v6023_v29 }
 0x4e8   : > { %1962 = vmax.xlane.f32.xlu2 %v1961_v14  ;;  %1986 = vmax.xlane.f32.xlu1 %v1985_v5  ;;  %v1973_v14 = vmax.f32 %v5999_v63, %v6001_v10 }
 0x4ec   : > { %v1811_v50 = vpop.f32.mrf.mxu2 }
 0x4ed   : > { %v6028_v9 = vpop.f32.mrf.mxu3 }
 0x4ee   : > { %v1988_v27 = vmax.f32 %v1811_v50, %v6028_v9 }
 0x4f0   : > { %1983 = vmax.xlane.f32.xlu1 %v1982_v47  ;;  %1989 = vmax.xlane.f32.xlu0 %v1988_v27  ;;  %v1964_v47 = vmax.f32 %v5983_v28, %v5985_v22  ;;  %v1970_v27 = vmax.f32 %v5993_v17, %v5995_v46 }
 0x4f4   : > { %v6033_v3 = vpop.f32.mrf.mxu2 }
 0x4f5   : > { %v6035_v16 = vpop.f32.mrf.mxu3 }
 0x4f8   : > { %1968 = vmax.xlane.f32.xlu1 %v1967_v6  ;;  %1974 = vmax.xlane.f32.xlu0 %v1973_v14  ;;  %v1955_v6 = vmax.f32 %v5969_v26, %v5971_v31  ;;  %v1958_v14 = vmax.f32 %v5973_v19, %v5975_v7 }
 0x4fc   : > { %v6041_v5 = vpop.f32.mrf.mxu2 }
 0x4fd   : > { %7628 = vst [vmem:[#allocation57_spill] sm:$0xff] %v6041_v5  ;;  %v6043_v13 = vpop.f32.mrf.mxu3 }
 0x4fe   : > { %7629 = vst [vmem:[#allocation58_spill] sm:$0xff] %v6043_v13 }
 0x500   : > { %1965 = vmax.xlane.f32.xlu1 %v1964_v47  ;;  %1971 = vmax.xlane.f32.xlu0 %v1970_v27 }
 0x504   : > { %v6049_v45 = vpop.f32.mrf.mxu2 }
 0x505   : > { %7630 = vst [vmem:[#allocation59_spill] sm:$0xff] %v6049_v45  ;;  %v6051_v43 = vpop.f32.mrf.mxu3 }
 0x506   : > { %7631 = vst [vmem:[#allocation60_spill] sm:$0xff] %v6051_v43 }
 0x508   : > { %1956 = vmax.xlane.f32.xlu1 %v1955_v6  ;;  %1959 = vmax.xlane.f32.xlu0 %v1958_v14 }
 0x50c   : > { %v6057_v24 = vpop.f32.mrf.mxu2 }
 0x50d   : > { %7632 = vst [vmem:[#allocation61_spill] sm:$0xff] %v6057_v24  ;;  %v6059_v42 = vpop.f32.mrf.mxu3 }
 0x50e   : > { %7633 = vst [vmem:[#allocation62_spill] sm:$0xff] %v6059_v42 }
 0x514   : > { %v6061_v41 = vpop.f32.mrf.mxu2 }
 0x515   : > { %7634 = vst [vmem:[#allocation63_spill] sm:$0xff] %v6061_v41  ;;  %v6063_v47 = vpop.f32.mrf.mxu3 }
 0x516   : > { %7635 = vst [vmem:[#allocation64_spill] sm:$0xff] %v6063_v47 }
 0x51c   : > { %v6065_v27 = vpop.f32.mrf.mxu2 }
 0x51d   : > { %v6067_v52 = vpop.f32.mrf.mxu3 }
 0x524   : > { %v6069_v8 = vpop.f32.mrf.mxu2 }
 0x525   : > { %v6071_v57 = vpop.f32.mrf.mxu3 }
 0x52c   : > { %v6073_v20 = vpop.f32.mrf.mxu2 }
 0x52d   : > { %v6075_v6 = vpop.f32.mrf.mxu3 }
 0x534   : > { %v6077_v14 = vpop.f32.mrf.mxu2 }
 0x535   : > { %v6079_v49 = vpop.f32.mrf.mxu3 }
 0x53c   : > { %v6081_v53 = vpop.f32.mrf.mxu2 }
 0x53d   : > { %v6083_v35 = vpop.f32.mrf.mxu3 }
 0x544   : > { %v6085_v60 = vpop.f32.mrf.mxu2 }
 0x545   : > { %v6087_v40 = vpop.f32.mrf.mxu3 }
 0x54b   : > { %v1981_v5 = vpop.xlane.xlu2 %1980 }
 0x54c   : > { %v6089_v38 = vpop.f32.mrf.mxu2 }
 0x54d   : > { %v6091_v34 = vpop.f32.mrf.mxu3 }
 0x554   : > { %v6093_v56 = vpop.f32.mrf.mxu2 }
 0x555   : > { %7636 = vst [vmem:[#allocation65_spill] sm:$0xff] %v6093_v56  ;;  %v6095_v30 = vpop.f32.mrf.mxu3 }
 0x556   : > { %7637 = vst [vmem:[#allocation66_spill] sm:$0xff] %v6095_v30  ;;  %v2027_v58 = vmax.f32 %v6093_v56, %v6095_v30 }
 0x558   : > { %2028 = vmax.xlane.f32.xlu2 %v2027_v58 }
 0x55b   : > { %v1987_v32 = vpop.xlane.xlu1 %1986 }
 0x55c   : > { %v6099_v21 = vpop.f32.mrf.mxu2  ;;  %v2067_v18 = vsub.f32 %v1809_v23, %v1987_v32  ;;  %v2068_v24 = vsub.f32 %v6023_v29, %v1987_v32  ;;  %v2064_v23 = vsub.f32 %v6011_v48, %v1981_v5 }
 0x55d   : > { %v6101_v44 = vpop.f32.mrf.mxu3 }
 0x55e   : > { %7638 = vst [vmem:[#allocation67_spill] sm:$0xff] %v6101_v44  ;;  %v2030_v12 = vmax.f32 %v6099_v21, %v6101_v44  ;;  %v2159_v13 = vmul.f32 1.442695, %v2067_v18  ;;  %v2161_v58 = vmul.f32 1.442695, %v2068_v24  ;;  %v2021_v44 = vmax.f32 %v6085_v60, %v6087_v40 }
 0x55f   : > { %v2063_v24 = vsub.f32 %v6009_v0, %v1981_v5  ;;  %v2153_v48 = vmul.f32 1.442695, %v2064_v23 }
 0x560   : > { %2031 = vmax.xlane.f32.xlu1 %v2030_v12  ;;  %4733 = vpow2.f32 %v2159_v13 }
 0x561   : > { %4735 = vpow2.f32 %v2161_v58 }
 0x563   : > { %v1990_v42 = vpop.xlane.xlu0 %1989  ;;  %v1984_v41 = vpop.xlane.xlu1 %1983 }
 0x564   : > { %v2069_v47 = vsub.f32 %v1811_v50, %v1990_v42  ;;  %v2070_v30 = vsub.f32 %v6028_v9, %v1990_v42  ;;  %v6107_v56 = vpop.f32.mrf.mxu2  ;;  %v2065_v18 = vsub.f32 %v6015_v1, %v1984_v41  ;;  %v2066_v42 = vsub.f32 %v6017_v36, %v1984_v41  ;;  %v1978_v36 = vpop.xlane.xlu2 %1977 }
 0x565   : > { %v6109_v45 = vpop.f32.mrf.mxu3  ;;  %v2151_v1 = vmul.f32 1.442695, %v2063_v24  ;;  %v1949_v41 = vmax.f32 %v5959_v4, %v5961_v33  ;;  %v2061_v24 = vsub.f32 %v6003_v61, %v1978_v36  ;;  %v2062_v23 = vsub.f32 %v6005_v15, %v1978_v36 }
 0x566   : > { %v2163_v43 = vmul.f32 1.442695, %v2069_v47  ;;  %v2033_v12 = vmax.f32 %v6107_v56, %v6109_v45  ;;  %v2165_v32 = vmul.f32 1.442695, %v2070_v30  ;;  %v2155_v50 = vmul.f32 1.442695, %v2065_v18  ;;  %v4734_v13 = vpop.eup %4733 }
 0x567   : > { %v2157_v9 = vmul.f32 1.442695, %v2066_v42  ;;  %v4736_v0 = vpop.eup %4735  ;;  %v2024_v61 = vmax.f32 %v6089_v38, %v6091_v34  ;;  %v1952_v15 = vmax.f32 %v5963_v55, %v5965_v2 }
 0x568   : > { %2022 = vmax.xlane.f32.xlu1 %v2021_v44  ;;  %2034 = vmax.xlane.f32.xlu0 %v2033_v12  ;;  %4737 = vpow2.f32 %v2163_v43  ;;  %v1946_v44 = vmax.f32 %v5953_v62, %v5955_v37 }
 0x569   : > { %4739 = vpow2.f32 %v2165_v32 }
 0x56a   : > { %4741 = vpow2.f32 %v2155_v50 }
 0x56b   : > { %v1975_v29 = vpop.xlane.xlu0 %1974  ;;  %v1969_v5 = vpop.xlane.xlu1 %1968  ;;  %4743 = vpow2.f32 %v2157_v9 }
 0x56c   : > { %v6119_v47 = vpop.f32.mrf.mxu2  ;;  %v2059_v12 = vsub.f32 %v5999_v63, %v1975_v29  ;;  %v2060_v18 = vsub.f32 %v6001_v10, %v1975_v29  ;;  %4745 = vpow2.f32 %v2151_v1  ;;  %v2147_v10 = vmul.f32 1.442695, %v2061_v24 }
 0x56d   : > { %v6121_v30 = vpop.f32.mrf.mxu3  ;;  %4747 = vpow2.f32 %v2153_v48  ;;  %v2009_v29 = vmax.f32 %v6069_v8, %v6071_v57  ;;  %v2149_v1 = vmul.f32 1.442695, %v2062_v23 }
 0x56e   : > { %v2036_v43 = vmax.f32 %v6119_v47, %v6121_v30  ;;  %v4738_v58 = vpop.eup %4737  ;;  %v2143_v63 = vmul.f32 1.442695, %v2059_v12  ;;  %v2145_v50 = vmul.f32 1.442695, %v2060_v18  ;;  %v2055_v12 = vsub.f32 %v5989_v11, %v1969_v5 }
 0x56f   : > { %v4740_v32 = vpop.eup %4739  ;;  %v6131_v42 = vpack.c.bf16 %v4738_v58, %v4734_v13  ;;  %v2056_v18 = vsub.f32 %v5991_v59, %v1969_v5  ;;  %v1943_v59 = vmax.f32 %v5949_v39, %v5951_v25 }
 0x570   : > { %1947 = vmax.xlane.f32.xlu1 %v1946_v44  ;;  %1950 = vmax.xlane.f32.xlu0 %v1949_v41  ;;  %v6134_v37 = vpack.c.bf16 %v4740_v32, %v4736_v0  ;;  %v4742_v44 = vpop.eup %4741  ;;  %4749 = vpow2.f32 %v2143_v63  ;;  %v2135_v63 = vmul.f32 1.442695, %v2055_v12 }
 0x571   : > { %2037 = vmax.xlane.f32.xlu2 %v2036_v43  ;;  %2283 = vmatpush.bf16.xpose.msra.mxu0 %v6131_v42  ;;  %v4744_v13 = vpop.eup %4743  ;;  %4751 = vpow2.f32 %v2145_v50  ;;  %v2015_v50 = vmax.f32 %v6077_v14, %v6079_v49 }
 0x572   : > { %2302 = vmatpush.bf16.xpose.msra.mxu1 %v6134_v37  ;;  %v4746_v41 = vpop.eup %4745  ;;  %4753 = vpow2.f32 %v2147_v10 }
 0x573   : > { %v1972_v9 = vpop.xlane.xlu0 %1971  ;;  %v4748_v0 = vpop.eup %4747  ;;  %v6147_v58 = vpack.c.bf16 %v4742_v44, %v4746_v41  ;;  %4755 = vpow2.f32 %v2149_v1  ;;  %v2137_v44 = vmul.f32 1.442695, %v2056_v18  ;;  %v2012_v18 = vmax.f32 %v6073_v20, %v6075_v6 }
 0x574   : > { %v2057_v43 = vsub.f32 %v5993_v17, %v1972_v9  ;;  %v1966_v48 = vpop.xlane.xlu1 %1965  ;;  %v2058_v36 = vsub.f32 %v5995_v46, %v1972_v9  ;;  %v6150_v32 = vpack.c.bf16 %v4744_v13, %v4748_v0  ;;  %v2006_v46 = vmax.f32 %v6065_v27, %v6067_v52  ;;  %v1963_v9 = vpop.xlane.xlu2 %1962 }
 0x575   : > { %v2053_v10 = vsub.f32 %v5983_v28, %v1966_v48  ;;  %v2051_v1 = vsub.f32 %v5979_v51, %v1963_v9  ;;  %v2052_v41 = vsub.f32 %v5981_v54, %v1963_v9  ;;  %v1991_v51 = vmax.f32 %v6033_v3, %v6035_v16 }
 0x576   : > { %v2139_v17 = vmul.f32 1.442695, %v2057_v43  ;;  %v2141_v24 = vmul.f32 1.442695, %v2058_v36  ;;  %v4750_v23 = vpop.eup %4749 }
 0x577   : > { %v4752_v11 = vpop.eup %4751  ;;  %v2131_v28 = vmul.f32 1.442695, %v2053_v10  ;;  %v2127_v36 = vmul.f32 1.442695, %v2051_v1  ;;  %v7640_v10 = vld [vmem:[#allocation60_spill] sm:$0xff] }
 0x578   : > { %2010 = vmax.xlane.f32.xlu1 %v2009_v29  ;;  %2025 = vmax.xlane.f32.xlu0 %v2024_v61  ;;  %v4754_v5 = vpop.eup %4753  ;;  %4757 = vpow2.f32 %v2139_v17  ;;  %v2054_v61 = vsub.f32 %v5985_v22, %v1966_v48  ;;  %v2129_v17 = vmul.f32 1.442695, %v2052_v41  ;;  %v7642_v1 = vld [vmem:[#allocation64_spill] sm:$0xff]  ;;  %v7643_v41 = vld [vmem:[#allocation63_spill] sm:$0xff] }
 0x579   : > { %1953 = vmax.xlane.f32.xlu2 %v1952_v15  ;;  %2284 = vmatpush.bf16.xpose.msra.mxu0 %v6147_v58  ;;  %v4756_v29 = vpop.eup %4755  ;;  %4759 = vpow2.f32 %v2141_v24  ;;  %v6163_v13 = vpack.c.bf16 %v4754_v5, %v4750_v23  ;;  %v2018_v23 = vmax.f32 %v6081_v53, %v6083_v35 }
 0x57a   : > { %2303 = vmatpush.bf16.xpose.msra.mxu1 %v6150_v32  ;;  %4761 = vpow2.f32 %v2135_v63  ;;  %v6166_v15 = vpack.c.bf16 %v4756_v29, %v4752_v11  ;;  %v2133_v0 = vmul.f32 1.442695, %v2054_v61  ;;  %v7641_v29 = vld [vmem:[#allocation59_spill] sm:$0xff] }
 0x57b   : > { %4763 = vpow2.f32 %v2137_v44  ;;  %v1960_v22 = vpop.xlane.xlu0 %1959 }
 0x57c   : > { %v1957_v43 = vpop.xlane.xlu1 %1956  ;;  %4765 = vpow2.f32 %v2131_v28 }
 0x57d   : > { %v2047_v12 = vsub.f32 %v5969_v26, %v1957_v43  ;;  %v2048_v24 = vsub.f32 %v5971_v31, %v1957_v43  ;;  %4767 = vpow2.f32 %v2133_v0  ;;  %v2003_v43 = vmax.f32 %v7643_v41, %v7642_v1 }
 0x57e   : > { %v4758_v48 = vpop.eup %4757  ;;  %4769 = vpow2.f32 %v2127_v36 }
 0x57f   : > { %v4760_v54 = vpop.eup %4759  ;;  %v2119_v9 = vmul.f32 1.442695, %v2047_v12  ;;  %4771 = vpow2.f32 %v2129_v17  ;;  %v2121_v31 = vmul.f32 1.442695, %v2048_v24 }
 0x580   : > { %2007 = vmax.xlane.f32.xlu1 %v2006_v46  ;;  %2016 = vmax.xlane.f32.xlu0 %v2015_v50  ;;  %v4762_v63 = vpop.eup %4761  ;;  %v2049_v46 = vsub.f32 %v5973_v19, %v1960_v22  ;;  %v2050_v50 = vsub.f32 %v5975_v7, %v1960_v22  ;;  %v1997_v7 = vmax.f32 %v7641_v29, %v7640_v10 }
 0x581   : > { %1944 = vmax.xlane.f32.xlu2 %v1943_v59  ;;  %2285 = vmatpush.bf16.xpose.msra.mxu0 %v6163_v13  ;;  %v4764_v26 = vpop.eup %4763  ;;  %v6181_v11 = vpack.c.bf16 %v4758_v48, %v4762_v63  ;;  %4773 = vpow2.f32 %v2119_v9  ;;  %v7649_v63 = vld [vmem:[#allocation61_spill] sm:$0xff]  ;;  %v7652_v9 = vld [vmem:[#allocation3_spill] sm:$0xff] }
 0x582   : > { %2304 = vmatpush.bf16.xpose.msra.mxu1 %v6166_v15  ;;  %v6183_v44 = vpack.c.bf16 %v4760_v54, %v4764_v26  ;;  %v2123_v59 = vmul.f32 1.442695, %v2049_v46  ;;  %v2125_v19 = vmul.f32 1.442695, %v2050_v50  ;;  %v4766_v5 = vpop.eup %4765  ;;  %4775 = vpow2.f32 %v2121_v31  ;;  %v7647_v54 = vld [vmem:[#allocation57_spill] sm:$0xff]  ;;  %v7653_v31 = vld [vmem:[#allocation10_spill] sm:$0xff] }
 0x583   : > { %v4768_v61 = vpop.eup %4767 }
 0x584   : > { %7639 = vst [vmem:[#allocation68_spill] sm:$0xff] %v6183_v44  ;;  %v4770_v28 = vpop.eup %4769  ;;  %4777 = vpow2.f32 %v2123_v59  ;;  %v7654_v59 = vld [vmem:[#allocation4_spill] sm:$0xff] }
 0x585   : > { %v4772_v0 = vpop.eup %4771  ;;  %4779 = vpow2.f32 %v2125_v19  ;;  %v6191_v22 = vpack.c.bf16 %v4766_v5, %v4770_v28  ;;  %v7655_v19 = vld [vmem:[#allocation2_spill] sm:$0xff]  ;;  %v7656_v5 = vld [vmem:[#allocation16_spill] sm:$0xff]  ;;  %v7660_v28 = vld [vmem:[#allocation13_spill] sm:$0xff] }
 0x586   : > { %v6193_v48 = vpack.c.bf16 %v4768_v61, %v4772_v0  ;;  %v7658_v61 = vld [vmem:[#allocation5_spill] sm:$0xff]  ;;  %v7661_v0 = vld [vmem:[#allocation12_spill] sm:$0xff] }
 0x587   : > { %7644 = vst [vmem:[#allocation60_spill] sm:$0xff] %v6191_v22  ;;  %v4774_v36 = vpop.eup %4773 }
 0x588   : > { %1992 = vmax.xlane.f32.xlu1 %v1991_v51  ;;  %2013 = vmax.xlane.f32.xlu0 %v2012_v18  ;;  %7645 = vst [vmem:[#allocation59_spill] sm:$0xff] %v6193_v48  ;;  %v4776_v12 = vpop.eup %4775  ;;  %v7646_v18 = vld [vmem:[#allocation58_spill] sm:$0xff] }
 0x589   : > { %2019 = vmax.xlane.f32.xlu2 %v2018_v23  ;;  %2286 = vmatpush.bf16.xpose.msra.mxu0 %v6181_v11  ;;  %v1994_v17 = vmax.f32 %v7647_v54, %v7646_v18  ;;  %v7648_v23 = vld [vmem:[#allocation62_spill] sm:$0xff] }
 0x58a   : > { %2305 = vmatpush.bf16.xpose.msra.mxu1 %v6183_v44  ;;  %v4778_v51 = vpop.eup %4777  ;;  %v2000_v46 = vmax.f32 %v7649_v63, %v7648_v23 }
 0x58b   : > { %v4780_v24 = vpop.eup %4779  ;;  %v6201_v26 = vpack.c.bf16 %v4778_v51, %v4774_v36  ;;  %v7662_v36 = vld [vmem:[#allocation24_spill] sm:$0xff] }
 0x58c   : > { %v6203_v50 = vpack.c.bf16 %v4780_v24, %v4776_v12  ;;  %v7663_v12 = vld [vmem:[#allocation21_spill] sm:$0xff]  ;;  %v7664_v51 = vld [vmem:[#allocation20_spill] sm:$0xff]  ;;  %v7666_v24 = vld [vmem:[#allocation23_spill] sm:$0xff] }
 0x58d   : > { %7650 = vst [vmem:[#allocation64_spill] sm:$0xff] %v6201_v26 }
 0x58e   : > { %7651 = vst [vmem:[#allocation63_spill] sm:$0xff] %v6203_v50 }
 0x590   : > { %1998 = vmax.xlane.f32.xlu0 %v1997_v7  ;;  %v7657_v7 = vld [vmem:[#allocation6_spill] sm:$0xff] }
 0x591   : > { %2004 = vmax.xlane.f32.xlu2 %v2003_v43  ;;  %2287 = vmatpush.bf16.xpose.msra.mxu0 %v6191_v22  ;;  %v7659_v43 = vld [vmem:[#allocation22_spill] sm:$0xff] }
 0x592   : > { %2306 = vmatpush.bf16.xpose.msra.mxu1 %v6193_v48  ;;  %v7670_v48 = vld [vmem:[#allocation67_spill] sm:$0xff] }
 0x598   : > { %1995 = vmax.xlane.f32.xlu0 %v1994_v17  ;;  %v7665_v17 = vld [vmem:[#allocation25_spill] sm:$0xff] }
 0x599   : > { %2001 = vmax.xlane.f32.xlu2 %v2000_v46  ;;  %2288 = vmatpush.bf16.xpose.msra.mxu0 %v6201_v26 }
 0x59a   : > { %2307 = vmatpush.bf16.xpose.msra.mxu1 %v6203_v50 }
 0x5a1   : > { %2425 = vrot.lane.b32.xlu1 %v7652_v9, %s5139_s22 }
 0x5a9   : > { %2433 = vrot.lane.b32.xlu1 %v7653_v31, %s5139_s22 }
 0x5ac   : > { %2427 = vrot.lane.b32.xlu0 %v7654_v59, %s5139_s22 }
 0x5b1   : > { %2423 = vrot.lane.b32.xlu2 %v7655_v19, %s5139_s22  ;;  %2439 = vrot.lane.b32.xlu1 %v7656_v5, %s5139_s22  ;;  %v7667_v5 = vld [vmem:[#allocation26_spill] sm:$0xff] }
 0x5b4   : > { %2431 = vrot.lane.b32.xlu0 %v7657_v7, %s5139_s22 }
 0x5b9   : > { %2429 = vrot.lane.b32.xlu2 %v7658_v61, %s5139_s22  ;;  %2445 = vrot.lane.b32.xlu1 %v7659_v43, %s5139_s22 }
 0x5bc   : > { %2437 = vrot.lane.b32.xlu0 %v7660_v28, %s5139_s22 }
 0x5c1   : > { %2435 = vrot.lane.b32.xlu2 %v7661_v0, %s5139_s22  ;;  %2451 = vrot.lane.b32.xlu1 %v7662_v36, %s5139_s22  ;;  %v7668_v0 = vld [vmem:[#allocation65_spill] sm:$0xff] }
 0x5c4   : > { %2443 = vrot.lane.b32.xlu0 %v7663_v12, %s5139_s22 }
 0x5c9   : > { %2441 = vrot.lane.b32.xlu2 %v7664_v51, %s5139_s22 }
 0x5cb   : > { %v2029_v7 = vpop.xlane.xlu2 %2028 }
 0x5cc   : > { %2449 = vrot.lane.b32.xlu0 %v7665_v17, %s5139_s22  ;;  %v2095_v17 = vsub.f32 %v7668_v0, %v2029_v7 }
 0x5ce   : > { %v2215_v44 = vmul.f32 1.442695, %v2095_v17 }
 0x5d1   : > { %2447 = vrot.lane.b32.xlu2 %v7666_v24, %s5139_s22  ;;  %v7669_v24 = vld [vmem:[#allocation66_spill] sm:$0xff] }
 0x5d2   : > { %v2096_v9 = vsub.f32 %v7669_v24, %v2029_v7 }
 0x5d3   : > { %v2032_v46 = vpop.xlane.xlu1 %2031 }
 0x5d9   : > { %2453 = vrot.lane.b32.xlu2 %v7667_v5, %s5139_s22  ;;  %v2097_v5 = vsub.f32 %v6099_v21, %v2032_v46 }
 0x5db   : > { %v2035_v31 = vpop.xlane.xlu0 %2034  ;;  %v2023_v28 = vpop.xlane.xlu1 %2022  ;;  %v2219_v0 = vmul.f32 1.442695, %v2097_v5 }
 0x5dc   : > { %v2099_v43 = vsub.f32 %v6107_v56, %v2035_v31  ;;  %v2100_v59 = vsub.f32 %v6109_v45, %v2035_v31  ;;  %v2098_v56 = vsub.f32 %v7670_v48, %v2032_v46  ;;  %v2217_v31 = vmul.f32 1.442695, %v2096_v9 }
 0x5de   : > { %v2223_v61 = vmul.f32 1.442695, %v2099_v43  ;;  %v2225_v50 = vmul.f32 1.442695, %v2100_v59  ;;  %v2221_v7 = vmul.f32 1.442695, %v2098_v56 }
 0x5e0   : > { %4781 = vpow2.f32 %v2223_v61  ;;  %v2091_v61 = vsub.f32 %v6085_v60, %v2023_v28 }
 0x5e1   : > { %4783 = vpow2.f32 %v2225_v50 }
 0x5e3   : > { %v1951_v19 = vpop.xlane.xlu0 %1950  ;;  %v1948_v59 = vpop.xlane.xlu1 %1947 }
 0x5e4   : > { %v2038_v36 = vpop.xlane.xlu2 %2037  ;;  %v2043_v45 = vsub.f32 %v5959_v4, %v1951_v19  ;;  %v2092_v4 = vsub.f32 %v6087_v40, %v2023_v28 }
 0x5e5   : > { %v2101_v12 = vsub.f32 %v6119_v47, %v2038_v36  ;;  %v2102_v51 = vsub.f32 %v6121_v30, %v2038_v36  ;;  %v2044_v47 = vsub.f32 %v5961_v33, %v1951_v19 }
 0x5e6   : > { %v2111_v36 = vmul.f32 1.442695, %v2043_v45  ;;  %v4782_v33 = vpop.eup %4781 }
 0x5e7   : > { %v2227_v26 = vmul.f32 1.442695, %v2101_v12  ;;  %v2229_v22 = vmul.f32 1.442695, %v2102_v51  ;;  %v2113_v50 = vmul.f32 1.442695, %v2044_v47  ;;  %v4784_v19 = vpop.eup %4783 }
 0x5e8   : > { %v2209_v51 = vmul.f32 1.442695, %v2092_v4 }
 0x5e9   : > { %4785 = vpow2.f32 %v2227_v26  ;;  %v2041_v26 = vsub.f32 %v5953_v62, %v1948_v59 }
 0x5ea   : > { %4787 = vpow2.f32 %v2229_v22  ;;  %v7671_v22 = vld [vmem:[#allocation56_spill] sm:$0xff] }
 0x5eb   : > { %v2026_v30 = vpop.xlane.xlu0 %2025  ;;  %4789 = vpow2.f32 %v2215_v44  ;;  %v2042_v5 = vsub.f32 %v7671_v22, %v1948_v59  ;;  %v2107_v62 = vmul.f32 1.442695, %v2041_v26 }
 0x5ec   : > { %v1954_v43 = vpop.xlane.xlu2 %1953  ;;  %4791 = vpow2.f32 %v2217_v31  ;;  %v2093_v60 = vsub.f32 %v6089_v38, %v2026_v30  ;;  %v2094_v40 = vsub.f32 %v6091_v34, %v2026_v30 }
 0x5ed   : > { %v2045_v21 = vsub.f32 %v5963_v55, %v1954_v43  ;;  %v2046_v48 = vsub.f32 %v5965_v2, %v1954_v43  ;;  %4793 = vpow2.f32 %v2219_v0  ;;  %v2207_v2 = vmul.f32 1.442695, %v2091_v61 }
 0x5ee   : > { %4795 = vpow2.f32 %v2221_v7  ;;  %v2109_v45 = vmul.f32 1.442695, %v2042_v5  ;;  %v2211_v0 = vmul.f32 1.442695, %v2093_v60  ;;  %v2213_v43 = vmul.f32 1.442695, %v2094_v40 }
 0x5ef   : > { %v2115_v9 = vmul.f32 1.442695, %v2045_v21  ;;  %v2117_v55 = vmul.f32 1.442695, %v2046_v48  ;;  %v4786_v12 = vpop.eup %4785  ;;  %4797 = vpow2.f32 %v2111_v36  ;;  %v7672_v5 = vld [vmem:[#allocation45_spill] sm:$0xff] }
 0x5f0   : > { %v4788_v44 = vpop.eup %4787  ;;  %4799 = vpow2.f32 %v2113_v50  ;;  %v6241_v28 = vpack.c.bf16 %v4786_v12, %v4782_v33 }
 0x5f1   : > { %v4790_v17 = vpop.eup %4789  ;;  %4801 = vpow2.f32 %v2115_v9  ;;  %v6243_v24 = vpack.c.bf16 %v4788_v44, %v4784_v19 }
 0x5f2   : > { %v4792_v56 = vpop.eup %4791  ;;  %4803 = vpow2.f32 %v2117_v55  ;;  %2385 = vmatpush.bf16.xpose.msra.mxu2 %v6241_v28  ;;  %v7673_v55 = vld [vmem:[#allocation42_spill] sm:$0xff] }
 0x5f3   : > { %v2017_v31 = vpop.xlane.xlu0 %2016  ;;  %v4794_v47 = vpop.eup %4793  ;;  %4805 = vpow2.f32 %v2207_v2  ;;  %2398 = vmatpush.bf16.xpose.msra.mxu3 %v6243_v24  ;;  %v847_v12 = vpack.c.bf16 %v7673_v55, %v7672_v5 }
 0x5f4   : > { %v1945_v46 = vpop.xlane.xlu2 %1944  ;;  %v4796_v30 = vpop.eup %4795  ;;  %4807 = vpow2.f32 %v2209_v51  ;;  %v2088_v4 = vsub.f32 %v6079_v49, %v2017_v31 }
 0x5f5   : > { %v2039_v38 = vsub.f32 %v5949_v39, %v1945_v46  ;;  %v2040_v34 = vsub.f32 %v5951_v25, %v1945_v46  ;;  %v4798_v7 = vpop.eup %4797  ;;  %4809 = vpow2.f32 %v2107_v62  ;;  %v2087_v39 = vsub.f32 %v6077_v14, %v2017_v31  ;;  %v2011_v51 = vpop.xlane.xlu1 %2010  ;;  %v7674_v31 = vld [vmem:[#allocation44_spill] sm:$0xff] }
 0x5f6   : > { %v4800_v21 = vpop.eup %4799  ;;  %4811 = vpow2.f32 %v2109_v45  ;;  %v6253_v25 = vpack.c.bf16 %v4794_v47, %v4790_v17  ;;  %v6257_v9 = vpack.c.bf16 %v4796_v30, %v4792_v56  ;;  %v2201_v40 = vmul.f32 1.442695, %v2088_v4 }
 0x5f7   : > { %v2103_v59 = vmul.f32 1.442695, %v2039_v38  ;;  %v2105_v48 = vmul.f32 1.442695, %v2040_v34  ;;  %v4802_v61 = vpop.eup %4801  ;;  %4813 = vpow2.f32 %v2211_v0  ;;  %v2199_v2 = vmul.f32 1.442695, %v2087_v39 }
 0x5f8   : > { %v4804_v36 = vpop.eup %4803  ;;  %4815 = vpow2.f32 %v2213_v43  ;;  %v6251_v50 = vpack.c.bf16 %v4802_v61, %v4798_v7  ;;  %v2267_v38 = vunpack.c.l.b16 %v7674_v31  ;;  %v2269_v47 = vunpack.c.l.b16 %v847_v12 }
 0x5f9   : > { %v4806_v33 = vpop.eup %4805  ;;  %4817 = vpow2.f32 %v2103_v59  ;;  %v6255_v26 = vpack.c.bf16 %v4804_v36, %v4800_v21  ;;  %v2083_v7 = vsub.f32 %v6069_v8, %v2011_v51  ;;  %v2270_v61 = vunpack.c.h.b16 %v847_v12 }
 0x5fa   : > { %v4808_v22 = vpop.eup %4807  ;;  %4819 = vpow2.f32 %v2105_v48  ;;  %2289 = vmatpush.bf16.xpose.msra.mxu0 %v6251_v50  ;;  %2386 = vmatpush.bf16.xpose.msra.mxu2 %v6253_v25  ;;  %v2268_v48 = vunpack.c.h.b16 %v7674_v31  ;;  %v6287_v4 = vpack.c.b16 %v2269_v47, %v2267_v38  ;;  %v7677_v38 = vld [vmem:[#allocation43_spill] sm:$0xff] }
 0x5fb   : > { %v4810_v49 = vpop.eup %4809  ;;  %2308 = vmatpush.bf16.xpose.msra.mxu1 %v6255_v26  ;;  %2399 = vmatpush.bf16.xpose.msra.mxu3 %v6257_v9  ;;  %v2014_v17 = vpop.xlane.xlu0 %2013  ;;  %4821 = vpow2.f32 %v2199_v2  ;;  %v2271_v47 = vunpack.c.l.b16 %v7677_v38 }
 0x5fc   : > { %v2020_v19 = vpop.xlane.xlu2 %2019  ;;  %v4812_v44 = vpop.eup %4811  ;;  %v2085_v0 = vsub.f32 %v6073_v20, %v2014_v17  ;;  %4823 = vpow2.f32 %v2201_v40  ;;  %v2086_v30 = vsub.f32 %v6075_v6, %v2014_v17  ;;  %v2084_v20 = vsub.f32 %v6071_v57, %v2011_v51  ;;  %v7675_v40 = vld [vmem:[#allocation40_spill] sm:$0xff]  ;;  %v7676_v17 = vld [vmem:[#allocation38_spill] sm:$0xff] }
 0x5fd   : > { %v2089_v14 = vsub.f32 %v6081_v53, %v2020_v19  ;;  %v2090_v60 = vsub.f32 %v6083_v35, %v2020_v19  ;;  %v4814_v62 = vpop.eup %4813  ;;  %v2191_v57 = vmul.f32 1.442695, %v2083_v7  ;;  %v6289_v19 = vpack.c.b16 %v2270_v61, %v2268_v48 }
 0x5fe   : > { %v4816_v56 = vpop.eup %4815  ;;  %v6272_v43 = vpack.c.bf16 %v4814_v62, %v4806_v33  ;;  %v2195_v39 = vmul.f32 1.442695, %v2085_v0  ;;  %v2197_v8 = vmul.f32 1.442695, %v2086_v30  ;;  %v849_v62 = vpack.c.bf16 %v7676_v17, %v7675_v40 }
 0x5ff   : > { %v2203_v46 = vmul.f32 1.442695, %v2089_v14  ;;  %v2205_v45 = vmul.f32 1.442695, %v2090_v60  ;;  %v4818_v53 = vpop.eup %4817  ;;  %v6277_v21 = vpack.c.bf16 %v4816_v56, %v4808_v22  ;;  %v2193_v22 = vmul.f32 1.442695, %v2084_v20  ;;  %v2008_v14 = vpop.xlane.xlu1 %2007 }
 0x600   : > { %v4820_v34 = vpop.eup %4819  ;;  %v6270_v35 = vpack.c.bf16 %v4810_v49, %v4818_v53  ;;  %v2082_v60 = vsub.f32 %v6067_v52, %v2008_v14  ;;  %v2272_v7 = vunpack.c.h.b16 %v7677_v38  ;;  %v2274_v48 = vunpack.c.h.b16 %v849_v62 }
 0x601   : > { %4825 = vpow2.f32 %v2203_v46  ;;  %v6275_v59 = vpack.c.bf16 %v4812_v44, %v4820_v34  ;;  %v4822_v36 = vpop.eup %4821 }
 0x602   : > { %4827 = vpow2.f32 %v2205_v45  ;;  %2290 = vmatpush.bf16.xpose.msra.mxu0 %v6270_v35  ;;  %2387 = vmatpush.bf16.xpose.msra.mxu2 %v6272_v43  ;;  %v4824_v33 = vpop.eup %4823  ;;  %v2189_v56 = vmul.f32 1.442695, %v2082_v60 }
 0x603   : > { %2309 = vmatpush.bf16.xpose.msra.mxu1 %v6275_v59  ;;  %2400 = vmatpush.bf16.xpose.msra.mxu3 %v6277_v21  ;;  %4829 = vpow2.f32 %v2195_v39  ;;  %v1999_v44 = vpop.xlane.xlu0 %1998 }
 0x604   : > { %v2005_v6 = vpop.xlane.xlu2 %2004  ;;  %4831 = vpow2.f32 %v2197_v8  ;;  %v2075_v34 = vsub.f32 %v7641_v29, %v1999_v44  ;;  %v2076_v61 = vsub.f32 %v7640_v10, %v1999_v44 }
 0x605   : > { %v2079_v5 = vsub.f32 %v7643_v41, %v2005_v6  ;;  %v2080_v12 = vsub.f32 %v7642_v1, %v2005_v6  ;;  %4833 = vpow2.f32 %v2191_v57 }
 0x606   : > { %4835 = vpow2.f32 %v2193_v22  ;;  %v2175_v39 = vmul.f32 1.442695, %v2075_v34  ;;  %v2177_v57 = vmul.f32 1.442695, %v2076_v61 }
 0x607   : > { %v4826_v49 = vpop.eup %4825  ;;  %v2183_v41 = vmul.f32 1.442695, %v2079_v5  ;;  %v2185_v1 = vmul.f32 1.442695, %v2080_v12 }
 0x608   : > { %v4828_v55 = vpop.eup %4827 }
 0x609   : > { %v6296_v2 = vpack.c.bf16 %v4828_v55, %v4824_v33  ;;  %2291 = vmatmul.bf16.vlgmr.msra.gmra.mxu0 %v6287_v4  ;;  %v4830_v51 = vpop.eup %4829  ;;  %4837 = vpow2.f32 %v2183_v41  ;;  %v2278_v33 = vpack.c.b16 %v2274_v48, %v2272_v7 }
 0x60a   : > { %2321 = vmatpush.bf16.xpose.msrb.mxu0 %v6241_v28  ;;  %v6293_v28 = vpack.c.bf16 %v4826_v49, %v4822_v36  ;;  %2310 = vmatmul.bf16.vlgmr.msra.gmra.mxu1 %v6289_v19  ;;  %v4832_v52 = vpop.eup %4831  ;;  %4839 = vpow2.f32 %v2185_v1  ;;  %v1993_v36 = vpop.xlane.xlu1 %1992 }
 0x60b   : > { %2340 = vmatpush.bf16.xpose.msrb.mxu1 %v6243_v24  ;;  %v2081_v24 = vsub.f32 %v6065_v27, %v2008_v14  ;;  %2401 = vmatpush.bf16.xpose.msra.mxu3 %v6296_v2  ;;  %v4834_v45 = vpop.eup %4833  ;;  %v1996_v20 = vpop.xlane.xlu0 %1995  ;;  %v2072_v55 = vsub.f32 %v6035_v16, %v1993_v36 }
 0x60c   : > { %2388 = vmatpush.bf16.xpose.msra.mxu2 %v6293_v28  ;;  %v2002_v27 = vpop.xlane.xlu2 %2001  ;;  %v4836_v31 = vpop.eup %4835  ;;  %v2253_v0 = vpack.c.bf16 %v4830_v51, %v4834_v45  ;;  %v2073_v10 = vsub.f32 %v7647_v54, %v1996_v20  ;;  %v2074_v49 = vsub.f32 %v7646_v18, %v1996_v20 }
 0x60d   : > { %v2187_v46 = vmul.f32 1.442695, %v2081_v24  ;;  %v2077_v53 = vsub.f32 %v7649_v63, %v2002_v27  ;;  %v2254_v30 = vpack.c.bf16 %v4832_v52, %v4836_v31  ;;  %v7687_v52 = vld [vmem:[#allocation33_spill] sm:$0xff] }
 0x60e   : > { %v2171_v12 = vmul.f32 1.442695, %v2073_v10  ;;  %v2173_v54 = vmul.f32 1.442695, %v2074_v49 }
 0x60f   : > { %4841 = vpow2.f32 %v2187_v46  ;;  %v2179_v63 = vmul.f32 1.442695, %v2077_v53  ;;  %v7685_v46 = vld [vmem:[#allocation30_spill] sm:$0xff] }
 0x610   : > { %4843 = vpow2.f32 %v2189_v56  ;;  %v7688_v56 = vld [vmem:[#allocation32_spill] sm:$0xff] }
 0x611   : > { %4845 = vpow2.f32 %v2179_v63  ;;  %v2463_v45 = vunpack.c.l.b16 %v7688_v56  ;;  %v2464_v53 = vunpack.c.h.b16 %v7688_v56 }
 0x612   : > { %2322 = vmatpush.bf16.xpose.msrb.mxu0 %v6253_v25  ;;  %v2078_v25 = vsub.f32 %v7648_v23, %v2002_v27  ;;  %v4838_v23 = vpop.eup %4837 }
 0x613   : > { %2341 = vmatpush.bf16.xpose.msrb.mxu1 %v6257_v9  ;;  %v2273_v9 = vunpack.c.l.b16 %v849_v62  ;;  %2402 = vmatpush.bf16.xpose.msra.mxu3 %v2254_v30  ;;  %v4840_v29 = vpop.eup %4839  ;;  %v7678_v62 = vmov 1065369472  }
 0x614   : > { %2389 = vmatpush.bf16.xpose.msra.mxu2 %v2253_v0  ;;  %v2181_v6 = vmul.f32 1.442695, %v2078_v25  ;;  %v2424_v20 = vpop.permute.xlu2 %2423 }
 0x615   : > { %v6315_v8 = vpack.c.b16 %v2273_v9, %v2271_v47  ;;  %v4842_v22 = vpop.eup %4841  ;;  %v7689_v47 = vld [vmem:[#allocation19_spill] sm:$0xff] }
 0x616   : > { %v4844_v14 = vpop.eup %4843  ;;  %4847 = vpow2.f32 %v2181_v6  ;;  %v2251_v5 = vpack.c.bf16 %v4842_v22, %v4838_v23  ;;  %v2459_v25 = vunpack.c.l.b16 %v7689_v47 }
 0x617   : > { %4849 = vpow2.f32 %v2175_v39  ;;  %v4846_v18 = vpop.eup %4845 }
 0x618   : > { %4851 = vpow2.f32 %v2177_v57 }
 0x619   : > { %2296 = vmatmul.bf16.gmra.mxu0 %v6315_v8  ;;  %4853 = vpow2.f32 %v2171_v12 }
 0x61a   : > { %2323 = vmatpush.bf16.xpose.msrb.mxu0 %v6272_v43  ;;  %v2071_v43 = vsub.f32 %v6033_v3, %v1993_v36  ;;  %2315 = vmatmul.bf16.gmra.mxu1 %v2278_v33  ;;  %v2169_v3 = vmul.f32 1.442695, %v2072_v55  ;;  %4855 = vpow2.f32 %v2173_v54 }
 0x61b   : > { %2342 = vmatpush.bf16.xpose.msrb.mxu1 %v6277_v21  ;;  %v2252_v21 = vpack.c.bf16 %v4844_v14, %v4840_v29 }
 0x61c   : > { %2390 = vmatpush.bf16.xpose.msra.mxu2 %v2251_v5  ;;  %v2167_v24 = vmul.f32 1.442695, %v2071_v43  ;;  %v4848_v60 = vpop.eup %4847  ;;  %v2430_v14 = vpop.permute.xlu2 %2429 }
 0x61d   : > { %2403 = vmatpush.bf16.xpose.msra.mxu3 %v2252_v21  ;;  %v4850_v44 = vpop.eup %4849 }
 0x61e   : > { %v4852_v41 = vpop.eup %4851  ;;  %v2249_v1 = vpack.c.bf16 %v4846_v18, %v4850_v44  ;;  %4857 = vpow2.f32 %v2167_v24  ;;  %v2428_v29 = vpop.permute.xlu0 %2427 }
 0x61f   : > { %v2250_v16 = vpack.c.bf16 %v4848_v60, %v4852_v41  ;;  %4859 = vpow2.f32 %v2169_v3  ;;  %v4854_v27 = vpop.eup %4853 }
 0x622   : > { %2324 = vmatpush.bf16.xpose.msrb.mxu0 %v6293_v28  ;;  %v4856_v28 = vpop.eup %4855 }
 0x623   : > { %2343 = vmatpush.bf16.xpose.msrb.mxu1 %v6296_v2 }
 0x624   : > { %2391 = vmatpush.bf16.xpose.msra.mxu2 %v2249_v1  ;;  %v4858_v51 = vpop.eup %4857 }
 0x625   : > { %2404 = vmatpush.bf16.xpose.msra.mxu3 %v2250_v16  ;;  %v4860_v2 = vpop.eup %4859  ;;  %v2247_v40 = vpack.c.bf16 %v4854_v27, %v4858_v51 }
 0x626   : > { %v2248_v17 = vpack.c.bf16 %v4856_v28, %v4860_v2  ;;  %v2432_v44 = vpop.permute.xlu0 %2431 }
 0x62a   : > { %2325 = vmatpush.bf16.xpose.msrb.mxu0 %v2253_v0  ;;  %v2460_v0 = vunpack.c.h.b16 %v7689_v47 }
 0x62b   : > { %2344 = vmatpush.bf16.xpose.msrb.mxu1 %v2254_v30 }
 0x62c   : > { %2392 = vmatpush.bf16.xpose.msra.mxu2 %v2247_v40 }
 0x62d   : > { %2405 = vmatpush.bf16.xpose.msra.mxu3 %v2248_v17 }
 0x632   : > { %2326 = vmatpush.bf16.xpose.msrb.mxu0 %v2251_v5 }
 0x633   : > { %2345 = vmatpush.bf16.xpose.msrb.mxu1 %v2252_v21  ;;  %2393 = vmatmul.bf16.vlgmr.msra.gmra.mxu2 %v7678_v62 }
 0x634   : > { %2406 = vmatmul.bf16.vlgmr.msra.gmra.mxu3 %v7678_v62 }
 0x63a   : > { %2327 = vmatpush.bf16.xpose.msrb.mxu0 %v2249_v1 }
 0x63b   : > { %2346 = vmatpush.bf16.xpose.msrb.mxu1 %v2250_v16 }
 0x642   : > { %2328 = vmatpush.bf16.xpose.msrb.mxu0 %v2247_v40 }
 0x643   : > { %2347 = vmatpush.bf16.xpose.msrb.mxu1 %v2248_v17 }
 0x649   : > { %2329 = vmatmul.bf16.vlgmr.msrb.gmra.mxu0 %v6287_v4  ;;  %v7681_v4 = vld [vmem:[#allocation59_spill] sm:$0xff] }
 0x64a   : > { %2359 = vmatpush.bf16.xpose.msra.mxu0 %v6131_v42  ;;  %2348 = vmatmul.bf16.vlgmr.msrb.gmra.mxu1 %v6289_v19  ;;  %v7679_v42 = vld [vmem:[#allocation68_spill] sm:$0xff] }
 0x64b   : > { %2372 = vmatpush.bf16.xpose.msra.mxu1 %v6134_v37  ;;  %v7680_v37 = vld [vmem:[#allocation60_spill] sm:$0xff] }
 0x64c   : > { %v7682_v19 = vld [vmem:[#allocation64_spill] sm:$0xff] }
 0x652   : > { %2360 = vmatpush.bf16.xpose.msra.mxu0 %v6147_v58  ;;  %v7683_v58 = vld [vmem:[#allocation63_spill] sm:$0xff] }
 0x653   : > { %2373 = vmatpush.bf16.xpose.msra.mxu1 %v6150_v32  ;;  %v7684_v32 = vld [vmem:[#allocation31_spill] sm:$0xff] }
 0x659   : > { %2334 = vmatmul.bf16.gmra.mxu0 %v6315_v8  ;;  %v2426_v8 = vpop.permute.xlu1 %2425 }
 0x65a   : > { %2361 = vmatpush.bf16.xpose.msra.mxu0 %v6163_v13  ;;  %2353 = vmatmul.bf16.gmra.mxu1 %v2278_v33  ;;  %v837_v13 = vpack.c.bf16 %v7685_v46, %v7684_v32 }
 0x65b   : > { %2374 = vmatpush.bf16.xpose.msra.mxu1 %v6166_v15  ;;  %v7686_v15 = vld [vmem:[#allocation18_spill] sm:$0xff] }
 0x65c   : > { %v2465_v31 = vunpack.c.l.b16 %v837_v13  ;;  %v2466_v38 = vunpack.c.h.b16 %v837_v13  ;;  %v2438_v13 = vpop.permute.xlu0 %2437 }
 0x65e   : > { %v2469_v30 = vpack.c.b16 %v2465_v31, %v2463_v45  ;;  %v2470_v7 = vpack.c.b16 %v2466_v38, %v2464_v53 }
 0x662   : > { %2362 = vmatpush.bf16.xpose.msra.mxu0 %v6181_v11  ;;  %v835_v11 = vpack.c.bf16 %v7687_v52, %v7686_v15 }
 0x663   : > { %2375 = vmatpush.bf16.xpose.msra.mxu1 %v7679_v42  ;;  %v2434_v42 = vpop.permute.xlu1 %2433 }
 0x664   : > { %v2461_v9 = vunpack.c.l.b16 %v835_v11  ;;  %v2462_v34 = vunpack.c.h.b16 %v835_v11 }
 0x66a   : > { %2363 = vmatpush.bf16.xpose.msra.mxu0 %v7680_v37 }
 0x66b   : > { %2376 = vmatpush.bf16.xpose.msra.mxu1 %v7681_v4 }
 0x672   : > { %2364 = vmatpush.bf16.xpose.msra.mxu0 %v7682_v19  ;;  %v2436_v19 = vpop.permute.xlu2 %2435 }
 0x673   : > { %2377 = vmatpush.bf16.xpose.msra.mxu1 %v7683_v58 }
 0x67a   : > { %2365 = vmatpush.bf16.xpose.msra.mxu0 %v6251_v50  ;;  %v2467_v50 = vpack.c.b16 %v2461_v9, %v2459_v25 }
 0x67b   : > { %2378 = vmatpush.bf16.xpose.msra.mxu1 %v6255_v26  ;;  %v2468_v26 = vpack.c.b16 %v2462_v34, %v2460_v0 }
 0x682   : > { %2366 = vmatpush.bf16.xpose.msra.mxu0 %v6270_v35 }
 0x683   : > { %2379 = vmatpush.bf16.xpose.msra.mxu1 %v6275_v59 }
 0x686   : > { %v2292_v48 = vpop.f32.mrf.mxu0 }
 0x687   : > { %v2311_v61 = vpop.f32.mrf.mxu1 }
 0x688   : > { %v6355_v63 = vadd.f32 %v2311_v61, %v2292_v48 }
 0x689   : > { %2367 = vmatmul.bf16.vlgmr.msra.gmra.mxu0 %v7678_v62 }
 0x68a   : > { %2529 = vmatpush.bf16.msrb.mxu0 %v2469_v30  ;;  %2380 = vmatmul.bf16.vlgmr.msra.gmra.mxu1 %v7678_v62 }
 0x68b   : > { %2618 = vmatpush.bf16.msrb.mxu1 %v2470_v7  ;;  %v2440_v7 = vpop.permute.xlu1 %2439 }
 0x68e   : > { %2530 = vmatpush.bf16.msrb.mxu0 %v2467_v50  ;;  %v2294_v35 = vpop.f32.mrf.mxu0 }
 0x68f   : > { %2619 = vmatpush.bf16.msrb.mxu1 %v2468_v26  ;;  %v2313_v59 = vpop.f32.mrf.mxu1 }
 0x690   : > { %v2314_v56 = vadd.f32 %v2313_v59, %v2294_v35 }
 0x696   : > { %v2297_v6 = vpop.f32.mrf.mxu0 }
 0x697   : > { %v2316_v23 = vpop.f32.mrf.mxu1 }
 0x698   : > { %v2317_v39 = vadd.f32 %v2316_v23, %v2297_v6  ;;  %v2444_v23 = vpop.permute.xlu0 %2443 }
 0x699   : > { %4437 = vmatmul.msk.bf16.vlgmr.msrb.gmra.mxu0 %vm958_vm0, %v2424_v20 }
 0x69a   : > { %4453 = vmatmul.msk.bf16.vlgmr.msrb.gmra.mxu1 %vm958_vm0, %v2424_v20 }
 0x69e   : > { %v2299_v22 = vpop.f32.mrf.mxu0 }
 0x69f   : > { %v2318_v10 = vpop.f32.mrf.mxu1 }
 0x6a0   : > { %v2319_v45 = vadd.f32 %v2318_v10, %v2299_v22 }
 0x6a9   : > { %4438 = vmatmul.msk.bf16.gmra.mxu0 %vm958_vm0, %v2426_v8 }
 0x6aa   : > { %4454 = vmatmul.msk.bf16.gmra.mxu1 %vm958_vm0, %v2426_v8 }
 0x6b6   : > { %v2394_v36 = vpop.f32.mrf.mxu2 }
 0x6b7   : > { %v2407_v57 = vpop.f32.mrf.mxu3 }
 0x6b8   : > { %v2408_v33 = vadd.f32 %v2407_v57, %v2394_v36  ;;  %v2446_v57 = vpop.permute.xlu1 %2445 }
 0x6b9   : > { %4439 = vmatmul.msk.bf16.gmra.mxu0 %vm958_vm0, %v2428_v29 }
 0x6ba   : > { %4455 = vmatmul.msk.bf16.gmra.mxu1 %vm958_vm0, %v2428_v29  ;;  %4861 = vrcp.f32 %v2408_v33 }
 0x6be   : > { %v2396_v49 = vpop.f32.mrf.mxu2 }
 0x6bf   : > { %v2409_v5 = vpop.f32.mrf.mxu3 }
 0x6c0   : > { %v4862_v43 = vpop.eup %4861 }
 0x6c1   : > { %v2414_v21 = vperm.slane %v4862_v43, 0 }
 0x6c6   : > { %v2330_v55 = vpop.f32.mrf.mxu0 }
 0x6c7   : > { %v2349_v12 = vpop.f32.mrf.mxu1 }
 0x6c8   : > { %v2350_v54 = vadd.f32 %v2349_v12, %v2330_v55  ;;  %v2450_v12 = vpop.permute.xlu0 %2449 }
 0x6c9   : > { %4440 = vmatmul.msk.bf16.gmra.mxu0 %vm958_vm0, %v2430_v14 }
 0x6ca   : > { %4456 = vmatmul.msk.bf16.gmra.mxu1 %vm958_vm0, %v2430_v14  ;;  %v6365_v18 = vmul.f32 %v2414_v21, %v2350_v54 }
 0x6cc   : > { %7690 = vst [vmem:[#allocation58_spill] sm:$0xff] %v6365_v18 }
 0x6ce   : > { %v2332_v24 = vpop.f32.mrf.mxu0 }
 0x6cf   : > { %v2351_v60 = vpop.f32.mrf.mxu1 }
 0x6d0   : > { %v2352_v3 = vadd.f32 %v2351_v60, %v2332_v24 }
 0x6d2   : > { %v6367_v41 = vmul.f32 %v2414_v21, %v2352_v3 }
 0x6d4   : > { %7691 = vst [vmem:[#allocation57_spill] sm:$0xff] %v6367_v41 }
 0x6d6   : > { %v2335_v16 = vpop.f32.mrf.mxu0 }
 0x6d7   : > { %v2354_v27 = vpop.f32.mrf.mxu1 }
 0x6d8   : > { %v2355_v28 = vadd.f32 %v2354_v27, %v2335_v16  ;;  %v2452_v16 = vpop.permute.xlu1 %2451 }
 0x6d9   : > { %4441 = vmatmul.msk.bf16.gmra.mxu0 %vm958_vm0, %v2432_v44 }
 0x6da   : > { %4457 = vmatmul.msk.bf16.gmra.mxu1 %vm958_vm0, %v2432_v44  ;;  %v6373_v51 = vmul.f32 %v2414_v21, %v2355_v28 }
 0x6dc   : > { %7692 = vst [vmem:[#allocation62_spill] sm:$0xff] %v6373_v51 }
 0x6de   : > { %v2337_v2 = vpop.f32.mrf.mxu0 }
 0x6df   : > { %v2356_v40 = vpop.f32.mrf.mxu1 }
 0x6e0   : > { %v2357_v17 = vadd.f32 %v2356_v40, %v2337_v2 }
 0x6e2   : > { %v6375_v37 = vmul.f32 %v2414_v21, %v2357_v17 }
 0x6e4   : > { %7693 = vst [vmem:[#allocation61_spill] sm:$0xff] %v6375_v37 }
 0x6e9   : > { %4442 = vmatmul.msk.bf16.gmra.mxu0 %vm958_vm0, %v2434_v42 }
 0x6ea   : > { %4458 = vmatmul.msk.bf16.gmra.mxu1 %vm958_vm0, %v2434_v42 }
 0x6f9   : > { %4443 = vmatmul.msk.bf16.gmra.mxu0 %vm958_vm0, %v2436_v19 }
 0x6fa   : > { %4459 = vmatmul.msk.bf16.gmra.mxu1 %vm958_vm0, %v2436_v19 }
 0x706   : > { %v2368_v58 = vpop.f32.mrf.mxu0 }
 0x707   : > { %v2381_v32 = vpop.f32.mrf.mxu1 }
 0x708   : > { %v2382_v46 = vadd.f32 %v2381_v32, %v2368_v58 }
 0x709   : > { %4444 = vmatmul.msk.bf16.gmra.mxu0 %vm958_vm0, %v2438_v13 }
 0x70a   : > { %4863 = vrcp.f32 %v2382_v46  ;;  %4460 = vmatmul.msk.bf16.gmra.mxu1 %vm958_vm0, %v2438_v13 }
 0x70e   : > { %v2370_v15 = vpop.f32.mrf.mxu0 }
 0x70f   : > { %v2383_v52 = vpop.f32.mrf.mxu1 }
 0x710   : > { %v4864_v11 = vpop.eup %4863 }
 0x711   : > { %v2413_v53 = vperm.slane %v4864_v11, 0 }
 0x713   : > { %v6385_v31 = vmul.f32 %v2413_v53, %v2317_v39  ;;  %v6387_v38 = vmul.f32 %v2413_v53, %v2319_v45  ;;  %v6390_v47 = vmul.f32 %v2413_v53, %v6355_v63  ;;  %v6392_v25 = vmul.f32 %v2413_v53, %v2314_v56  ;;  %v2442_v63 = vpop.permute.xlu2 %2441 }
 0x715   : > { %7694 = vst [vmem:[#allocation65_spill] sm:$0xff] %v6385_v31 }
 0x716   : > { %7695 = vst [vmem:[#allocation66_spill] sm:$0xff] %v6387_v38  ;;  %v6398_v34 = vpop.f32.mrf.mxu0 }
 0x717   : > { %7696 = vst [vmem:[#allocation67_spill] sm:$0xff] %v6390_v47  ;;  %v6400_v30 = vpop.f32.mrf.mxu1 }
 0x718   : > { %7697 = vst [vmem:[#allocation56_spill] sm:$0xff] %v6392_v25 }
 0x719   : > { %4445 = vmatmul.msk.bf16.gmra.mxu0 %vm958_vm0, %v2440_v7 }
 0x71a   : > { %4461 = vmatmul.msk.bf16.gmra.mxu1 %vm958_vm0, %v2440_v7 }
 0x71b   : > { %v2448_v49 = vpop.permute.xlu2 %2447 }
 0x71e   : > { %v6404_v50 = vpop.f32.mrf.mxu0 }
 0x71f   : > { %v6406_v26 = vpop.f32.mrf.mxu1 }
 0x723   : > { %v2454_v19 = vpop.permute.xlu2 %2453 }
 0x726   : > { %v6408_v48 = vpop.f32.mrf.mxu0 }
 0x727   : > { %v6410_v61 = vpop.f32.mrf.mxu1 }
 0x729   : > { %4446 = vmatmul.msk.bf16.gmra.mxu0 %vm958_vm0, %v2442_v63 }
 0x72a   : > { %4462 = vmatmul.msk.bf16.gmra.mxu1 %vm958_vm0, %v2442_v63 }
 0x72e   : > { %v6414_v20 = vpop.f32.mrf.mxu0 }
 0x72f   : > { %v6416_v35 = vpop.f32.mrf.mxu1 }
 0x736   : > { %v6418_v59 = vpop.f32.mrf.mxu0 }
 0x737   : > { %v6420_v6 = vpop.f32.mrf.mxu1 }
 0x739   : > { %4447 = vmatmul.msk.bf16.gmra.mxu0 %vm958_vm0, %v2444_v23 }
 0x73a   : > { %4463 = vmatmul.msk.bf16.gmra.mxu1 %vm958_vm0, %v2444_v23 }
 0x73e   : > { %v6424_v39 = vpop.f32.mrf.mxu0 }
 0x73f   : > { %v6426_v8 = vpop.f32.mrf.mxu1 }
 0x746   : > { %v6428_v29 = vpop.f32.mrf.mxu0 }
 0x747   : > { %v6430_v36 = vpop.f32.mrf.mxu1 }
 0x748   : > { %v2719_v58 = vmax.f32 %v6428_v29, %v6430_v36 }
 0x749   : > { %4448 = vmatmul.msk.bf16.gmra.mxu0 %vm958_vm0, %v2446_v57 }
 0x74a   : > { %4464 = vmatmul.msk.bf16.gmra.mxu1 %vm958_vm0, %v2446_v57 }
 0x74e   : > { %v6434_v33 = vpop.f32.mrf.mxu0 }
 0x74f   : > { %v6436_v22 = vpop.f32.mrf.mxu1 }
 0x750   : > { %v2722_v23 = vmax.f32 %v6434_v33, %v6436_v22 }
 0x756   : > { %v6438_v10 = vpop.f32.mrf.mxu0 }
 0x757   : > { %v6440_v14 = vpop.f32.mrf.mxu1 }
 0x758   : > { %v2725_v45 = vmax.f32 %v6438_v10, %v6440_v14 }
 0x759   : > { %4449 = vmatmul.msk.bf16.gmra.mxu0 %vm958_vm0, %v2448_v49 }
 0x75a   : > { %4465 = vmatmul.msk.bf16.gmra.mxu1 %vm958_vm0, %v2448_v49 }
 0x75e   : > { %v6444_v5 = vpop.f32.mrf.mxu0 }
 0x75f   : > { %v6446_v43 = vpop.f32.mrf.mxu1 }
 0x760   : > { %v2728_v63 = vmax.f32 %v6444_v5, %v6446_v43 }
 0x766   : > { %v6448_v21 = vpop.f32.mrf.mxu0 }
 0x767   : > { %v6450_v55 = vpop.f32.mrf.mxu1 }
 0x768   : > { %v2731_v56 = vmax.f32 %v6448_v21, %v6450_v55 }
 0x769   : > { %4450 = vmatmul.msk.bf16.gmra.mxu0 %vm958_vm0, %v2450_v12 }
 0x76a   : > { %4466 = vmatmul.msk.bf16.gmra.mxu1 %vm958_vm0, %v2450_v12  ;;  %v2716_v12 = vmax.f32 %v6424_v39, %v6426_v8 }
 0x76e   : > { %v6454_v54 = vpop.f32.mrf.mxu0 }
 0x76f   : > { %v6456_v24 = vpop.f32.mrf.mxu1 }
 0x770   : > { %v2734_v2 = vmax.f32 %v6454_v54, %v6456_v24 }
 0x776   : > { %v6458_v60 = vpop.f32.mrf.mxu0 }
 0x777   : > { %v6460_v3 = vpop.f32.mrf.mxu1 }
 0x778   : > { %v2737_v44 = vmax.f32 %v6458_v60, %v6460_v3 }
 0x779   : > { %4451 = vmatmul.msk.bf16.gmra.mxu0 %vm958_vm0, %v2452_v16 }
 0x77a   : > { %4467 = vmatmul.msk.bf16.gmra.mxu1 %vm958_vm0, %v2452_v16  ;;  %2738 = vmax.xlane.f32.xlu2 %v2737_v44  ;;  %v2713_v44 = vmax.f32 %v6418_v59, %v6420_v6 }
 0x77e   : > { %v6466_v27 = vpop.f32.mrf.mxu0 }
 0x77f   : > { %v6468_v28 = vpop.f32.mrf.mxu1 }
 0x780   : > { %v2740_v15 = vmax.f32 %v6466_v27, %v6468_v28 }
 0x782   : > { %2735 = vmax.xlane.f32.xlu2 %v2734_v2 }
 0x786   : > { %v6472_v40 = vpop.f32.mrf.mxu0 }
 0x787   : > { %v6474_v17 = vpop.f32.mrf.mxu1 }
 0x788   : > { %v2743_v42 = vmax.f32 %v6472_v40, %v6474_v17 }
 0x789   : > { %4452 = vmatmul.msk.bf16.gmra.mxu0 %vm958_vm0, %v2454_v19 }
 0x78a   : > { %4468 = vmatmul.msk.bf16.gmra.mxu1 %vm958_vm0, %v2454_v19  ;;  %2720 = vmax.xlane.f32.xlu2 %v2719_v58 }
 0x78b   : > { %2744 = vmax.xlane.f32.xlu0 %v2743_v42 }
 0x78e   : > { %v6482_v32 = vpop.f32.mrf.mxu0 }
 0x78f   : > { %v6484_v46 = vpop.f32.mrf.mxu1 }
 0x790   : > { %v2746_v13 = vmax.f32 %v6482_v32, %v6484_v46 }
 0x792   : > { %2747 = vmax.xlane.f32.xlu1 %v2746_v13 }
 0x793   : > { %2741 = vmax.xlane.f32.xlu0 %v2740_v15 }
 0x796   : > { %v6490_v52 = vpop.f32.mrf.mxu0 }
 0x797   : > { %v6492_v11 = vpop.f32.mrf.mxu1 }
 0x79a   : > { %2732 = vmax.xlane.f32.xlu1 %v2731_v56 }
 0x79b   : > { %2726 = vmax.xlane.f32.xlu0 %v2725_v45 }
 0x79e   : > { %v6498_v53 = vpop.f32.mrf.mxu0 }
 0x79f   : > { %7698 = vst [vmem:[#allocation45_spill] sm:$0xff] %v6498_v53  ;;  %v6500_v7 = vpop.f32.mrf.mxu1 }
 0x7a0   : > { %7699 = vst [vmem:[#allocation42_spill] sm:$0xff] %v6500_v7 }
 0x7a2   : > { %2729 = vmax.xlane.f32.xlu1 %v2728_v63 }
 0x7a3   : > { %2723 = vmax.xlane.f32.xlu0 %v2722_v23 }
 0x7a6   : > { %v6506_v57 = vpop.f32.mrf.mxu0 }
 0x7a7   : > { %v6508_v49 = vpop.f32.mrf.mxu1 }
 0x7aa   : > { %2717 = vmax.xlane.f32.xlu1 %v2716_v12 }
 0x7ab   : > { %2714 = vmax.xlane.f32.xlu0 %v2713_v44 }
 0x7ae   : > { %v6514_v16 = vpop.f32.mrf.mxu0 }
 0x7af   : > { %7700 = vst [vmem:[#allocation44_spill] sm:$0xff] %v6514_v16  ;;  %v6516_v2 = vpop.f32.mrf.mxu1 }
 0x7b0   : > { %7701 = vst [vmem:[#allocation40_spill] sm:$0xff] %v6516_v2 }
 0x7b6   : > { %v6518_v42 = vpop.f32.mrf.mxu0 }
 0x7b7   : > { %7702 = vst [vmem:[#allocation38_spill] sm:$0xff] %v6518_v42  ;;  %v6520_v19 = vpop.f32.mrf.mxu1 }
 0x7b8   : > { %7703 = vst [vmem:[#allocation43_spill] sm:$0xff] %v6520_v19 }
 0x7be   : > { %v6522_v58 = vpop.f32.mrf.mxu0 }
 0x7bf   : > { %v6524_v13 = vpop.f32.mrf.mxu1 }
 0x7c6   : > { %v6526_v15 = vpop.f32.mrf.mxu0 }
 0x7c7   : > { %v6528_v56 = vpop.f32.mrf.mxu1 }
 0x7ce   : > { %v6530_v45 = vpop.f32.mrf.mxu0 }
 0x7cf   : > { %v6532_v63 = vpop.f32.mrf.mxu1 }
 0x7d6   : > { %v6534_v23 = vpop.f32.mrf.mxu0 }
 0x7d7   : > { %v6536_v12 = vpop.f32.mrf.mxu1 }
 0x7de   : > { %v6538_v44 = vpop.f32.mrf.mxu0 }
 0x7df   : > { %v6540_v9 = vpop.f32.mrf.mxu1 }
 0x7e6   : > { %v6542_v0 = vpop.f32.mrf.mxu0 }
 0x7e7   : > { %7704 = vst [vmem:[#allocation68_spill] sm:$0xff] %v6542_v0  ;;  %v6544_v1 = vpop.f32.mrf.mxu1 }
 0x7e8   : > { %7705 = vst [vmem:[#allocation60_spill] sm:$0xff] %v6544_v1 }
 0x7ed   : > { %v2739_v16 = vpop.xlane.xlu2 %2738 }
 0x7ee   : > { %v6546_v4 = vpop.f32.mrf.mxu0 }
 0x7ef   : > { %v6548_v47 = vpop.f32.mrf.mxu1 }
 0x7f6   : > { %v6550_v25 = vpop.f32.mrf.mxu0 }
 0x7f7   : > { %7706 = vst [vmem:[#allocation59_spill] sm:$0xff] %v6550_v25  ;;  %v6552_v31 = vpop.f32.mrf.mxu1 }
 0x7f8   : > { %7707 = vst [vmem:[#allocation64_spill] sm:$0xff] %v6552_v31  ;;  %v2785_v38 = vmax.f32 %v6550_v25, %v6552_v31 }
 0x7fa   : > { %2786 = vmax.xlane.f32.xlu2 %v2785_v38 }
 0x7fe   : > { %v2745_v18 = vpop.xlane.xlu0 %2744  ;;  %v6556_v41 = vpop.f32.mrf.mxu0 }
 0x7ff   : > { %7708 = vst [vmem:[#allocation63_spill] sm:$0xff] %v6556_v41  ;;  %v6558_v51 = vpop.f32.mrf.mxu1  ;;  %v2825_v62 = vsub.f32 %v6472_v40, %v2745_v18  ;;  %v2826_v2 = vsub.f32 %v6474_v17, %v2745_v18  ;;  %v2821_v17 = vsub.f32 %v6458_v60, %v2739_v16 }
 0x800   : > { %7709 = vst [vmem:[#allocation31_spill] sm:$0xff] %v6558_v51  ;;  %v2788_v37 = vmax.f32 %v6556_v41, %v6558_v51  ;;  %v2779_v51 = vmax.f32 %v6542_v0, %v6544_v1 }
 0x801   : > { %v2917_v53 = vmul.f32 1.442695, %v2825_v62  ;;  %v2919_v41 = vmul.f32 1.442695, %v2826_v2 }
 0x802   : > { %2789 = vmax.xlane.f32.xlu0 %v2788_v37 }
 0x803   : > { %4865 = vpow2.f32 %v2917_v53 }
 0x805   : > { %v2748_v7 = vpop.xlane.xlu1 %2747 }
 0x806   : > { %v2742_v42 = vpop.xlane.xlu0 %2741  ;;  %v2827_v31 = vsub.f32 %v6482_v32, %v2748_v7  ;;  %v2828_v38 = vsub.f32 %v6484_v46, %v2748_v7  ;;  %v6566_v25 = vpop.f32.mrf.mxu0  ;;  %v2822_v7 = vsub.f32 %v6460_v3, %v2739_v16 }
 0x807   : > { %v6568_v19 = vpop.f32.mrf.mxu1  ;;  %v2823_v37 = vsub.f32 %v6466_v27, %v2742_v42  ;;  %v2824_v32 = vsub.f32 %v6468_v28, %v2742_v42  ;;  %v2909_v27 = vmul.f32 1.442695, %v2821_v17  ;;  %v2707_v28 = vmax.f32 %v6408_v48, %v6410_v61 }
 0x808   : > { %7710 = vst [vmem:[#allocation30_spill] sm:$0xff] %v6568_v19  ;;  %v2921_v40 = vmul.f32 1.442695, %v2827_v31  ;;  %v2791_v62 = vmax.f32 %v6566_v25, %v6568_v19  ;;  %v2923_v18 = vmul.f32 1.442695, %v2828_v38  ;;  %v2736_v31 = vpop.xlane.xlu2 %2735 }
 0x809   : > { %v2913_v46 = vmul.f32 1.442695, %v2823_v37  ;;  %v4866_v1 = vpop.eup %4865  ;;  %v2915_v0 = vmul.f32 1.442695, %v2824_v32  ;;  %v2911_v16 = vmul.f32 1.442695, %v2822_v7 }
 0x80a   : > { %4867 = vpow2.f32 %v2921_v40  ;;  %2780 = vmax.xlane.f32.xlu0 %v2779_v51  ;;  %2792 = vmax.xlane.f32.xlu1 %v2791_v62  ;;  %v2704_v51 = vmax.f32 %v6404_v50, %v6406_v26  ;;  %v2819_v40 = vsub.f32 %v6454_v54, %v2736_v31 }
 0x80b   : > { %4869 = vpow2.f32 %v2919_v41 }
 0x80c   : > { %4871 = vpow2.f32 %v2923_v18  ;;  %v2905_v7 = vmul.f32 1.442695, %v2819_v40 }
 0x80d   : > { %v2733_v2 = vpop.xlane.xlu1 %2732  ;;  %4873 = vpow2.f32 %v2913_v46 }
 0x80e   : > { %v6578_v19 = vpop.f32.mrf.mxu0  ;;  %v2817_v41 = vsub.f32 %v6448_v21, %v2733_v2  ;;  %v2727_v42 = vpop.xlane.xlu0 %2726  ;;  %4875 = vpow2.f32 %v2909_v27  ;;  %v2818_v21 = vsub.f32 %v6450_v55, %v2733_v2  ;;  %v2767_v55 = vmax.f32 %v6526_v15, %v6528_v56 }
 0x80f   : > { %v6580_v53 = vpop.f32.mrf.mxu1  ;;  %4877 = vpow2.f32 %v2915_v0  ;;  %v2782_v2 = vmax.f32 %v6546_v4, %v6548_v47  ;;  %v2814_v40 = vsub.f32 %v6440_v14, %v2727_v42  ;;  %v2701_v14 = vmax.f32 %v6398_v34, %v6400_v30 }
 0x810   : > { %v4868_v60 = vpop.eup %4867  ;;  %v2794_v3 = vmax.f32 %v6578_v19, %v6580_v53  ;;  %v2901_v18 = vmul.f32 1.442695, %v2817_v41  ;;  %4879 = vpow2.f32 %v2911_v16  ;;  %v2903_v54 = vmul.f32 1.442695, %v2818_v21 }
 0x811   : > { %v6589_v38 = vpack.c.bf16 %v4868_v60, %v4866_v1  ;;  %v4870_v37 = vpop.eup %4869  ;;  %v2820_v1 = vsub.f32 %v6456_v24, %v2736_v31  ;;  %v2710_v24 = vmax.f32 %v6414_v20, %v6416_v35  ;;  %v2813_v41 = vsub.f32 %v6438_v10, %v2727_v42  ;;  %v2721_v10 = vpop.xlane.xlu2 %2720 }
 0x812   : > { %2705 = vmax.xlane.f32.xlu0 %v2704_v51  ;;  %2708 = vmax.xlane.f32.xlu1 %v2707_v28  ;;  %v4872_v62 = vpop.eup %4871  ;;  %4881 = vpow2.f32 %v2901_v18  ;;  %v2895_v42 = vmul.f32 1.442695, %v2814_v40  ;;  %v2770_v40 = vmax.f32 %v6530_v45, %v6532_v63 }
 0x813   : > { %2795 = vmax.xlane.f32.xlu2 %v2794_v3  ;;  %3041 = vmatpush.bf16.xpose.msrb.mxu2 %v6589_v38  ;;  %v6594_v17 = vpack.c.bf16 %v4872_v62, %v4870_v37  ;;  %v4874_v46 = vpop.eup %4873  ;;  %v2907_v31 = vmul.f32 1.442695, %v2820_v1  ;;  %4883 = vpow2.f32 %v2905_v7  ;;  %v2893_v21 = vmul.f32 1.442695, %v2813_v41 }
 0x814   : > { %v4876_v27 = vpop.eup %4875  ;;  %4885 = vpow2.f32 %v2903_v54 }
 0x815   : > { %v2730_v32 = vpop.xlane.xlu1 %2729  ;;  %3060 = vmatpush.bf16.xpose.msrb.mxu3 %v6594_v17  ;;  %v4878_v51 = vpop.eup %4877  ;;  %v6605_v60 = vpack.c.bf16 %v4874_v46, %v4876_v27  ;;  %4887 = vpow2.f32 %v2907_v31  ;;  %v2809_v27 = vsub.f32 %v6428_v29, %v2721_v10 }
 0x816   : > { %v2815_v0 = vsub.f32 %v6444_v5, %v2730_v32  ;;  %v4880_v3 = vpop.eup %4879  ;;  %v2724_v5 = vpop.xlane.xlu0 %2723  ;;  %v2816_v28 = vsub.f32 %v6446_v43, %v2730_v32  ;;  %v2764_v43 = vmax.f32 %v6522_v58, %v6524_v13  ;;  %v2773_v32 = vmax.f32 %v6534_v23, %v6536_v12 }
 0x817   : > { %v6610_v37 = vpack.c.bf16 %v4878_v51, %v4880_v3  ;;  %v2811_v46 = vsub.f32 %v6434_v33, %v2724_v5  ;;  %v2885_v29 = vmul.f32 1.442695, %v2809_v27  ;;  %v7711_v27 = vld [vmem:[#allocation43_spill] sm:$0xff] }
 0x818   : > { %v2897_v16 = vmul.f32 1.442695, %v2815_v0  ;;  %v4882_v62 = vpop.eup %4881  ;;  %v2899_v18 = vmul.f32 1.442695, %v2816_v28  ;;  %v2812_v0 = vsub.f32 %v6436_v22, %v2724_v5 }
 0x819   : > { %v4884_v1 = vpop.eup %4883 }
 0x81a   : > { %2768 = vmax.xlane.f32.xlu0 %v2767_v55  ;;  %2783 = vmax.xlane.f32.xlu1 %v2782_v2  ;;  %4889 = vpow2.f32 %v2897_v16  ;;  %v4886_v7 = vpop.eup %4885  ;;  %v6621_v54 = vpack.c.bf16 %v4884_v1, %v4882_v62  ;;  %v2889_v55 = vmul.f32 1.442695, %v2811_v46  ;;  %v2891_v3 = vmul.f32 1.442695, %v2812_v0 }
 0x81b   : > { %2711 = vmax.xlane.f32.xlu2 %v2710_v24  ;;  %3042 = vmatpush.bf16.xpose.msrb.mxu2 %v6605_v60  ;;  %4891 = vpow2.f32 %v2893_v21  ;;  %v4888_v33 = vpop.eup %4887  ;;  %v2810_v24 = vsub.f32 %v6430_v36, %v2721_v10  ;;  %v2749_v16 = vmax.f32 %v6490_v52, %v6492_v11  ;;  %v2776_v62 = vmax.f32 %v6538_v44, %v6540_v9 }
 0x81c   : > { %4893 = vpow2.f32 %v2899_v18  ;;  %v6626_v51 = vpack.c.bf16 %v4888_v33, %v4886_v7  ;;  %v7712_v33 = vld [vmem:[#allocation38_spill] sm:$0xff] }
 0x81d   : > { %3061 = vmatpush.bf16.xpose.msrb.mxu3 %v6610_v37  ;;  %v2718_v2 = vpop.xlane.xlu1 %2717  ;;  %4895 = vpow2.f32 %v2895_v42  ;;  %v2887_v21 = vmul.f32 1.442695, %v2810_v24  ;;  %v2755_v42 = vmax.f32 %v6506_v57, %v6508_v49  ;;  %v2761_v0 = vmax.f32 %v7712_v33, %v7711_v27 }
 0x81e   : > { %v2715_v31 = vpop.xlane.xlu0 %2714  ;;  %v2807_v28 = vsub.f32 %v6424_v39, %v2718_v2  ;;  %4897 = vpow2.f32 %v2889_v55 }
 0x81f   : > { %v2805_v5 = vsub.f32 %v6418_v59, %v2715_v31  ;;  %4899 = vpow2.f32 %v2885_v29  ;;  %v2806_v39 = vsub.f32 %v6420_v6, %v2715_v31  ;;  %v2808_v59 = vsub.f32 %v6426_v8, %v2718_v2 }
 0x820   : > { %v4890_v41 = vpop.eup %4889  ;;  %4901 = vpow2.f32 %v2891_v3  ;;  %v2881_v1 = vmul.f32 1.442695, %v2807_v28  ;;  %v7715_v3 = vld [vmem:[#allocation42_spill] sm:$0xff]  ;;  %v7716_v28 = vld [vmem:[#allocation45_spill] sm:$0xff] }
 0x821   : > { %v4892_v22 = vpop.eup %4891  ;;  %v2877_v46 = vmul.f32 1.442695, %v2805_v5  ;;  %4903 = vpow2.f32 %v2887_v21  ;;  %v2879_v7 = vmul.f32 1.442695, %v2806_v39  ;;  %v2883_v6 = vmul.f32 1.442695, %v2808_v59 }
 0x822   : > { %2765 = vmax.xlane.f32.xlu0 %v2764_v43  ;;  %2774 = vmax.xlane.f32.xlu1 %v2773_v32  ;;  %v4894_v36 = vpop.eup %4893  ;;  %v6638_v10 = vpack.c.bf16 %v4890_v41, %v4892_v22  ;;  %4905 = vpow2.f32 %v2881_v1  ;;  %v2752_v22 = vmax.f32 %v7716_v28, %v7715_v3  ;;  %v7721_v39 = vld [vmem:[#allocation3_spill] sm:$0xff]  ;;  %v7723_v59 = vld [vmem:[#allocation12_spill] sm:$0xff]  ;;  %v7724_v1 = vld [vmem:[#allocation2_spill] sm:$0xff] }
 0x823   : > { %2702 = vmax.xlane.f32.xlu2 %v2701_v14  ;;  %3043 = vmatpush.bf16.xpose.msrb.mxu2 %v6621_v54  ;;  %v4896_v18 = vpop.eup %4895  ;;  %4907 = vpow2.f32 %v2877_v46  ;;  %v7725_v46 = vld [vmem:[#allocation4_spill] sm:$0xff] }
 0x824   : > { %v6643_v43 = vpack.c.bf16 %v4894_v36, %v4896_v18  ;;  %v4898_v32 = vpop.eup %4897  ;;  %4909 = vpow2.f32 %v2879_v7  ;;  %v7722_v18 = vld [vmem:[#allocation5_spill] sm:$0xff]  ;;  %v7727_v7 = vld [vmem:[#allocation6_spill] sm:$0xff] }
 0x825   : > { %3062 = vmatpush.bf16.xpose.msrb.mxu3 %v6626_v51  ;;  %v4900_v14 = vpop.eup %4899  ;;  %4911 = vpow2.f32 %v2883_v6  ;;  %v7728_v6 = vld [vmem:[#allocation10_spill] sm:$0xff] }
 0x826   : > { %v4902_v8 = vpop.eup %4901  ;;  %v6650_v55 = vpack.c.bf16 %v4898_v32, %v4900_v14  ;;  %v7726_v32 = vld [vmem:[#allocation20_spill] sm:$0xff]  ;;  %v7729_v14 = vld [vmem:[#allocation23_spill] sm:$0xff] }
 0x827   : > { %v4904_v2 = vpop.eup %4903 }
 0x828   : > { %7713 = vst [vmem:[#allocation18_spill] sm:$0xff] %v6650_v55  ;;  %v6653_v24 = vpack.c.bf16 %v4902_v8, %v4904_v2  ;;  %v4906_v31 = vpop.eup %4905  ;;  %v7731_v8 = vld [vmem:[#allocation16_spill] sm:$0xff]  ;;  %v7733_v2 = vld [vmem:[#allocation21_spill] sm:$0xff] }
 0x829   : > { %v4908_v41 = vpop.eup %4907 }
 0x82a   : > { %2750 = vmax.xlane.f32.xlu0 %v2749_v16  ;;  %2771 = vmax.xlane.f32.xlu1 %v2770_v40  ;;  %7714 = vst [vmem:[#allocation33_spill] sm:$0xff] %v6653_v24  ;;  %v4910_v29 = vpop.eup %4909  ;;  %v7717_v16 = vld [vmem:[#allocation40_spill] sm:$0xff] }
 0x82b   : > { %2777 = vmax.xlane.f32.xlu2 %v2776_v62  ;;  %3044 = vmatpush.bf16.xpose.msrb.mxu2 %v6638_v10  ;;  %v4912_v5 = vpop.eup %4911  ;;  %v7718_v40 = vld [vmem:[#allocation44_spill] sm:$0xff]  ;;  %v6660_v62 = vpack.c.bf16 %v4906_v31, %v4908_v41  ;;  %v7734_v31 = vld [vmem:[#allocation22_spill] sm:$0xff]  ;;  %v7735_v41 = vld [vmem:[#allocation25_spill] sm:$0xff] }
 0x82c   : > { %v2758_v36 = vmax.f32 %v7718_v40, %v7717_v16  ;;  %v6663_v21 = vpack.c.bf16 %v4912_v5, %v4910_v29  ;;  %v7736_v29 = vld [vmem:[#allocation24_spill] sm:$0xff] }
 0x82d   : > { %3063 = vmatpush.bf16.xpose.msrb.mxu3 %v6643_v43  ;;  %7719 = vst [vmem:[#allocation32_spill] sm:$0xff] %v6660_v62 }
 0x82e   : > { %7720 = vst [vmem:[#allocation19_spill] sm:$0xff] %v6663_v21 }
 0x832   : > { %2756 = vmax.xlane.f32.xlu1 %v2755_v42  ;;  %v7730_v42 = vld [vmem:[#allocation13_spill] sm:$0xff] }
 0x833   : > { %2762 = vmax.xlane.f32.xlu2 %v2761_v0  ;;  %3045 = vmatpush.bf16.xpose.msrb.mxu2 %v6650_v55  ;;  %v7732_v0 = vld [vmem:[#allocation26_spill] sm:$0xff] }
 0x835   : > { %3064 = vmatpush.bf16.xpose.msrb.mxu3 %v6653_v24 }
 0x83a   : > { %2753 = vmax.xlane.f32.xlu1 %v2752_v22 }
 0x83b   : > { %2759 = vmax.xlane.f32.xlu2 %v2758_v36  ;;  %3046 = vmatpush.bf16.xpose.msrb.mxu2 %v6660_v62  ;;  %v7741_v62 = vld [vmem:[#allocation31_spill] sm:$0xff] }
 0x83d   : > { %3065 = vmatpush.bf16.xpose.msrb.mxu3 %v6663_v21 }
 0x83e   : > { %3183 = vrot.lane.b32.xlu0 %v7721_v39, %s5140_s23 }
 0x846   : > { %3187 = vrot.lane.b32.xlu0 %v7722_v18, %s5140_s23 }
 0x84e   : > { %3193 = vrot.lane.b32.xlu0 %v7723_v59, %s5140_s23  ;;  %v7737_v59 = vld [vmem:[#allocation30_spill] sm:$0xff] }
 0x853   : > { %3181 = vrot.lane.b32.xlu2 %v7724_v1, %s5140_s23  ;;  %3185 = vrot.lane.b32.xlu1 %v7725_v46, %s5140_s23 }
 0x856   : > { %3199 = vrot.lane.b32.xlu0 %v7726_v32, %s5140_s23 }
 0x85b   : > { %3189 = vrot.lane.b32.xlu2 %v7727_v7, %s5140_s23  ;;  %3191 = vrot.lane.b32.xlu1 %v7728_v6, %s5140_s23 }
 0x85e   : > { %3205 = vrot.lane.b32.xlu0 %v7729_v14, %s5140_s23  ;;  %v7738_v14 = vld [vmem:[#allocation59_spill] sm:$0xff] }
 0x863   : > { %3195 = vrot.lane.b32.xlu2 %v7730_v42, %s5140_s23  ;;  %3197 = vrot.lane.b32.xlu1 %v7731_v8, %s5140_s23 }
 0x866   : > { %3211 = vrot.lane.b32.xlu0 %v7732_v0, %s5140_s23  ;;  %v7739_v0 = vld [vmem:[#allocation64_spill] sm:$0xff] }
 0x86b   : > { %3201 = vrot.lane.b32.xlu2 %v7733_v2, %s5140_s23  ;;  %3203 = vrot.lane.b32.xlu1 %v7734_v31, %s5140_s23 }
 0x86d   : > { %v2787_v36 = vpop.xlane.xlu2 %2786 }
 0x86e   : > { %v2853_v42 = vsub.f32 %v7738_v14, %v2787_v36  ;;  %v2854_v2 = vsub.f32 %v7739_v0, %v2787_v36 }
 0x870   : > { %v2973_v55 = vmul.f32 1.442695, %v2853_v42 }
 0x873   : > { %3207 = vrot.lane.b32.xlu2 %v7735_v41, %s5140_s23  ;;  %3209 = vrot.lane.b32.xlu1 %v7736_v29, %s5140_s23  ;;  %v7740_v41 = vld [vmem:[#allocation63_spill] sm:$0xff] }
 0x875   : > { %v2790_v22 = vpop.xlane.xlu0 %2789 }
 0x876   : > { %v2855_v29 = vsub.f32 %v7740_v41, %v2790_v22 }
 0x87d   : > { %v2793_v5 = vpop.xlane.xlu1 %2792  ;;  %v2781_v18 = vpop.xlane.xlu0 %2780 }
 0x87e   : > { %v2857_v39 = vsub.f32 %v6566_v25, %v2793_v5  ;;  %v2858_v1 = vsub.f32 %v7737_v59, %v2793_v5  ;;  %v2856_v25 = vsub.f32 %v7741_v62, %v2790_v22  ;;  %v2975_v59 = vmul.f32 1.442695, %v2854_v2  ;;  %v7742_v22 = vld [vmem:[#allocation68_spill] sm:$0xff] }
 0x880   : > { %v2981_v8 = vmul.f32 1.442695, %v2857_v39  ;;  %v2983_v31 = vmul.f32 1.442695, %v2858_v1  ;;  %v2979_v36 = vmul.f32 1.442695, %v2856_v25 }
 0x882   : > { %4913 = vpow2.f32 %v2981_v8 }
 0x883   : > { %4915 = vpow2.f32 %v2983_v31 }
 0x885   : > { %v2709_v46 = vpop.xlane.xlu1 %2708  ;;  %v2706_v1 = vpop.xlane.xlu0 %2705 }
 0x886   : > { %v2796_v32 = vpop.xlane.xlu2 %2795  ;;  %v2801_v5 = vsub.f32 %v6408_v48, %v2709_v46  ;;  %v7743_v48 = vld [vmem:[#allocation60_spill] sm:$0xff] }
 0x887   : > { %v2859_v7 = vsub.f32 %v6578_v19, %v2796_v32  ;;  %v2860_v6 = vsub.f32 %v6580_v53, %v2796_v32  ;;  %v2802_v19 = vsub.f32 %v6410_v61, %v2709_v46  ;;  %v2977_v32 = vmul.f32 1.442695, %v2855_v29 }
 0x888   : > { %v2869_v14 = vmul.f32 1.442695, %v2801_v5  ;;  %v2850_v42 = vsub.f32 %v7743_v48, %v2781_v18  ;;  %v4914_v61 = vpop.eup %4913 }
 0x889   : > { %v2985_v21 = vmul.f32 1.442695, %v2859_v7  ;;  %v2987_v24 = vmul.f32 1.442695, %v2860_v6  ;;  %v2849_v6 = vsub.f32 %v7742_v22, %v2781_v18  ;;  %v2871_v8 = vmul.f32 1.442695, %v2802_v19  ;;  %v4916_v0 = vpop.eup %4915 }
 0x88a   : > { %v2967_v41 = vmul.f32 1.442695, %v2850_v42 }
 0x88b   : > { %4917 = vpow2.f32 %v2985_v21  ;;  %v2799_v21 = vsub.f32 %v6404_v50, %v2706_v1 }
 0x88c   : > { %4919 = vpow2.f32 %v2987_v24  ;;  %v2800_v24 = vsub.f32 %v6406_v26, %v2706_v1 }
 0x88d   : > { %v2784_v53 = vpop.xlane.xlu1 %2783  ;;  %4921 = vpow2.f32 %v2973_v55  ;;  %v2865_v50 = vmul.f32 1.442695, %v2799_v21 }
 0x88e   : > { %v2712_v39 = vpop.xlane.xlu2 %2711  ;;  %4923 = vpow2.f32 %v2975_v59  ;;  %v2851_v55 = vsub.f32 %v6546_v4, %v2784_v53  ;;  %v2852_v18 = vsub.f32 %v6548_v47, %v2784_v53  ;;  %v2867_v19 = vmul.f32 1.442695, %v2800_v24 }
 0x88f   : > { %v2803_v7 = vsub.f32 %v6414_v20, %v2712_v39  ;;  %v2804_v62 = vsub.f32 %v6416_v35, %v2712_v39  ;;  %4925 = vpow2.f32 %v2977_v32  ;;  %v2965_v35 = vmul.f32 1.442695, %v2849_v6 }
 0x890   : > { %4927 = vpow2.f32 %v2979_v36  ;;  %v2969_v36 = vmul.f32 1.442695, %v2851_v55  ;;  %v2971_v1 = vmul.f32 1.442695, %v2852_v18  ;;  %v2769_v55 = vpop.xlane.xlu0 %2768 }
 0x891   : > { %v2873_v46 = vmul.f32 1.442695, %v2803_v7  ;;  %v2875_v20 = vmul.f32 1.442695, %v2804_v62  ;;  %v4918_v2 = vpop.eup %4917  ;;  %4929 = vpow2.f32 %v2869_v14 }
 0x892   : > { %v4920_v31 = vpop.eup %4919  ;;  %4931 = vpow2.f32 %v2871_v8  ;;  %v6700_v29 = vpack.c.bf16 %v4918_v2, %v4914_v61 }
 0x893   : > { %v4922_v25 = vpop.eup %4921  ;;  %4933 = vpow2.f32 %v2873_v46  ;;  %v6702_v5 = vpack.c.bf16 %v4920_v31, %v4916_v0 }
 0x894   : > { %v4924_v26 = vpop.eup %4923  ;;  %4935 = vpow2.f32 %v2875_v20  ;;  %3143 = vmatpush.bf16.xpose.msra.mxu0 %v6700_v29 }
 0x895   : > { %v2775_v32 = vpop.xlane.xlu1 %2774  ;;  %v4926_v39 = vpop.eup %4925  ;;  %4937 = vpow2.f32 %v2965_v35  ;;  %3156 = vmatpush.bf16.xpose.msra.mxu1 %v6702_v5 }
 0x896   : > { %v2703_v59 = vpop.xlane.xlu2 %2702  ;;  %v4928_v53 = vpop.eup %4927  ;;  %4939 = vpow2.f32 %v2967_v41  ;;  %v2846_v42 = vsub.f32 %v6536_v12, %v2775_v32 }
 0x897   : > { %v2797_v4 = vsub.f32 %v6398_v34, %v2703_v59  ;;  %v2798_v47 = vsub.f32 %v6400_v30, %v2703_v59  ;;  %v4930_v7 = vpop.eup %4929  ;;  %4941 = vpow2.f32 %v2865_v50  ;;  %v2845_v34 = vsub.f32 %v6534_v23, %v2775_v32  ;;  %v7745_v32 = vld [vmem:[#allocation34_spill] sm:$0xff] }
 0x898   : > { %v4932_v22 = vpop.eup %4931  ;;  %4943 = vpow2.f32 %v2867_v19  ;;  %v6712_v30 = vpack.c.bf16 %v4926_v39, %v4922_v25  ;;  %v6716_v46 = vpack.c.bf16 %v4928_v53, %v4924_v26  ;;  %v2959_v31 = vmul.f32 1.442695, %v2846_v42  ;;  %v7744_v19 = vld [vmem:[#allocation39_spill] sm:$0xff] }
 0x899   : > { %v2861_v62 = vmul.f32 1.442695, %v2797_v4  ;;  %v2863_v6 = vmul.f32 1.442695, %v2798_v47  ;;  %v4934_v14 = vpop.eup %4933  ;;  %4945 = vpow2.f32 %v2969_v36  ;;  %v2957_v20 = vmul.f32 1.442695, %v2845_v34 }
 0x89a   : > { %v4936_v48 = vpop.eup %4935  ;;  %4947 = vpow2.f32 %v2971_v1  ;;  %v6710_v8 = vpack.c.bf16 %v4934_v14, %v4930_v7  ;;  %v2841_v53 = vsub.f32 %v6526_v15, %v2769_v55 }
 0x89b   : > { %v4938_v61 = vpop.eup %4937  ;;  %4949 = vpow2.f32 %v2861_v62  ;;  %v6714_v21 = vpack.c.bf16 %v4936_v48, %v4932_v22  ;;  %v2842_v62 = vsub.f32 %v6528_v56, %v2769_v55 }
 0x89c   : > { %v4940_v24 = vpop.eup %4939  ;;  %4951 = vpow2.f32 %v2863_v6  ;;  %3047 = vmatpush.bf16.xpose.msrb.mxu2 %v6710_v8  ;;  %3144 = vmatpush.bf16.xpose.msra.mxu0 %v6712_v30  ;;  %v2949_v42 = vmul.f32 1.442695, %v2841_v53 }
 0x89d   : > { %v4942_v12 = vpop.eup %4941  ;;  %3066 = vmatpush.bf16.xpose.msrb.mxu3 %v6714_v21  ;;  %3157 = vmatpush.bf16.xpose.msra.mxu1 %v6716_v46  ;;  %v2772_v41 = vpop.xlane.xlu1 %2771  ;;  %4953 = vpow2.f32 %v2957_v20 }
 0x89e   : > { %v2778_v0 = vpop.xlane.xlu2 %2777  ;;  %v4944_v35 = vpop.eup %4943  ;;  %v2843_v4 = vsub.f32 %v6530_v45, %v2772_v41  ;;  %4955 = vpow2.f32 %v2959_v31  ;;  %v2844_v36 = vsub.f32 %v6532_v63, %v2772_v41  ;;  %v7746_v63 = vld [vmem:[#allocation41_spill] sm:$0xff] }
 0x89f   : > { %v2847_v23 = vsub.f32 %v6538_v44, %v2778_v0  ;;  %v2848_v2 = vsub.f32 %v6540_v9, %v2778_v0  ;;  %v4946_v18 = vpop.eup %4945  ;;  %v851_v44 = vpack.c.bf16 %v7745_v32, %v7744_v19  ;;  %v3025_v22 = vunpack.c.l.b16 %v7746_v63  ;;  %v7748_v32 = vld [vmem:[#allocation35_spill] sm:$0xff] }
 0x8a0   : > { %v4948_v50 = vpop.eup %4947  ;;  %v6730_v47 = vpack.c.bf16 %v4946_v18, %v4938_v61  ;;  %v2953_v14 = vmul.f32 1.442695, %v2843_v4  ;;  %v3026_v15 = vunpack.c.h.b16 %v7746_v63  ;;  %v2955_v48 = vmul.f32 1.442695, %v2844_v36 }
 0x8a1   : > { %v2961_v25 = vmul.f32 1.442695, %v2847_v23  ;;  %v2963_v59 = vmul.f32 1.442695, %v2848_v2  ;;  %v4950_v26 = vpop.eup %4949  ;;  %v6735_v7 = vpack.c.bf16 %v4948_v50, %v4940_v24  ;;  %v3027_v6 = vunpack.c.l.b16 %v851_v44  ;;  %v2766_v24 = vpop.xlane.xlu0 %2765 }
 0x8a2   : > { %v4952_v39 = vpop.eup %4951  ;;  %v6728_v9 = vpack.c.bf16 %v4942_v12, %v4950_v26  ;;  %v3028_v34 = vunpack.c.h.b16 %v851_v44  ;;  %v2951_v0 = vmul.f32 1.442695, %v2842_v62  ;;  %v2840_v41 = vsub.f32 %v6524_v13, %v2766_v24  ;;  %v7747_v13 = vld [vmem:[#allocation37_spill] sm:$0xff] }
 0x8a3   : > { %4957 = vpow2.f32 %v2961_v25  ;;  %v6733_v1 = vpack.c.bf16 %v4944_v35, %v4952_v39  ;;  %v4954_v56 = vpop.eup %4953  ;;  %v6746_v12 = vpack.c.b16 %v3027_v6, %v3025_v22  ;;  %v853_v44 = vpack.c.bf16 %v7748_v32, %v7747_v13  ;;  %v7759_v32 = vld [vmem:[#allocation49_spill] sm:$0xff] }
 0x8a4   : > { %4959 = vpow2.f32 %v2963_v59  ;;  %3048 = vmatpush.bf16.xpose.msrb.mxu2 %v6728_v9  ;;  %3145 = vmatpush.bf16.xpose.msra.mxu0 %v6730_v47  ;;  %v4956_v61 = vpop.eup %4955  ;;  %v6749_v35 = vpack.c.b16 %v3028_v34, %v3026_v15  ;;  %v2947_v26 = vmul.f32 1.442695, %v2840_v41 }
 0x8a5   : > { %3067 = vmatpush.bf16.xpose.msrb.mxu3 %v6733_v1  ;;  %3158 = vmatpush.bf16.xpose.msra.mxu1 %v6735_v7  ;;  %4961 = vpow2.f32 %v2953_v14  ;;  %v2757_v18 = vpop.xlane.xlu1 %2756  ;;  %v3031_v22 = vunpack.c.l.b16 %v853_v44  ;;  %v3032_v14 = vunpack.c.h.b16 %v853_v44  ;;  %v3222_v44 = vunpack.c.h.b16 %v7759_v32 }
 0x8a6   : > { %v2763_v45 = vpop.xlane.xlu2 %2762  ;;  %4963 = vpow2.f32 %v2955_v48  ;;  %v2834_v62 = vsub.f32 %v6508_v49, %v2757_v18 }
 0x8a7   : > { %v2837_v20 = vsub.f32 %v7712_v33, %v2763_v45  ;;  %v2838_v55 = vsub.f32 %v7711_v27, %v2763_v45  ;;  %4965 = vpow2.f32 %v2949_v42  ;;  %v7749_v45 = vld [vmem:[#allocation36_spill] sm:$0xff] }
 0x8a8   : > { %4967 = vpow2.f32 %v2951_v0  ;;  %v3029_v63 = vunpack.c.l.b16 %v7749_v45  ;;  %v2935_v49 = vmul.f32 1.442695, %v2834_v62 }
 0x8a9   : > { %v4958_v23 = vpop.eup %4957  ;;  %v2941_v33 = vmul.f32 1.442695, %v2837_v20  ;;  %v2943_v27 = vmul.f32 1.442695, %v2838_v55 }
 0x8aa   : > { %v4960_v2 = vpop.eup %4959  ;;  %v3035_v0 = vpack.c.b16 %v3031_v22, %v3029_v63 }
 0x8ab   : > { %3049 = vmatmul.bf16.vlgmr.msrb.gmra.mxu2 %v6746_v12  ;;  %v6756_v31 = vpack.c.bf16 %v4960_v2, %v4956_v61  ;;  %v4962_v25 = vpop.eup %4961  ;;  %4969 = vpow2.f32 %v2941_v33 }
 0x8ac   : > { %3079 = vmatpush.bf16.xpose.msra.mxu2 %v6700_v29  ;;  %v6752_v29 = vpack.c.bf16 %v4958_v23, %v4954_v56  ;;  %3068 = vmatmul.bf16.vlgmr.msrb.gmra.mxu3 %v6749_v35  ;;  %v4964_v59 = vpop.eup %4963  ;;  %4971 = vpow2.f32 %v2943_v27  ;;  %v2751_v56 = vpop.xlane.xlu0 %2750 }
 0x8ad   : > { %3098 = vmatpush.bf16.xpose.msra.mxu3 %v6702_v5  ;;  %v2839_v5 = vsub.f32 %v6522_v58, %v2766_v24  ;;  %3159 = vmatpush.bf16.xpose.msra.mxu1 %v6756_v31  ;;  %v4966_v19 = vpop.eup %4965  ;;  %v2754_v15 = vpop.xlane.xlu1 %2753  ;;  %v2830_v55 = vsub.f32 %v6492_v11, %v2751_v56 }
 0x8ae   : > { %3146 = vmatpush.bf16.xpose.msra.mxu0 %v6752_v29  ;;  %v2760_v58 = vpop.xlane.xlu2 %2759  ;;  %v4968_v39 = vpop.eup %4967  ;;  %v3011_v53 = vpack.c.bf16 %v4962_v25, %v4966_v19  ;;  %v2831_v61 = vsub.f32 %v7716_v28, %v2754_v15  ;;  %v2832_v23 = vsub.f32 %v7715_v3, %v2754_v15  ;;  %v7750_v19 = vmov 1065369472  }
 0x8af   : > { %v2945_v50 = vmul.f32 1.442695, %v2839_v5  ;;  %v2835_v4 = vsub.f32 %v7718_v40, %v2760_v58  ;;  %v2836_v36 = vsub.f32 %v7717_v16, %v2760_v58  ;;  %v3030_v40 = vunpack.c.h.b16 %v7749_v45 }
 0x8b0   : > { %v2929_v5 = vmul.f32 1.442695, %v2831_v61  ;;  %v2931_v28 = vmul.f32 1.442695, %v2832_v23  ;;  %v2927_v33 = vmul.f32 1.442695, %v2830_v55 }
 0x8b1   : > { %4973 = vpow2.f32 %v2945_v50  ;;  %v2937_v6 = vmul.f32 1.442695, %v2835_v4  ;;  %v2939_v34 = vmul.f32 1.442695, %v2836_v36  ;;  %v3036_v20 = vpack.c.b16 %v3032_v14, %v3030_v40  ;;  %v7760_v36 = vld [vmem:[#allocation46_spill] sm:$0xff] }
 0x8b2   : > { %4975 = vpow2.f32 %v2947_v26 }
 0x8b3   : > { %4977 = vpow2.f32 %v2937_v6 }
 0x8b4   : > { %3080 = vmatpush.bf16.xpose.msra.mxu2 %v6712_v30  ;;  %v2833_v30 = vsub.f32 %v6506_v57, %v2757_v18  ;;  %v4970_v57 = vpop.eup %4969  ;;  %4979 = vpow2.f32 %v2939_v34  ;;  %v3184_v15 = vpop.permute.xlu0 %3183 }
 0x8b5   : > { %3099 = vmatpush.bf16.xpose.msra.mxu3 %v6716_v46  ;;  %v3012_v46 = vpack.c.bf16 %v4964_v59, %v4968_v39  ;;  %v4972_v48 = vpop.eup %4971 }
 0x8b6   : > { %3147 = vmatpush.bf16.xpose.msra.mxu0 %v3011_v53  ;;  %v2933_v16 = vmul.f32 1.442695, %v2833_v30  ;;  %v3218_v30 = vunpack.c.h.b16 %v7760_v36  ;;  %v3182_v22 = vpop.permute.xlu2 %3181 }
 0x8b7   : > { %3160 = vmatpush.bf16.xpose.msra.mxu1 %v3012_v46  ;;  %v4974_v42 = vpop.eup %4973 }
 0x8b8   : > { %v4976_v24 = vpop.eup %4975  ;;  %v3009_v2 = vpack.c.bf16 %v4974_v42, %v4970_v57  ;;  %4981 = vpow2.f32 %v2933_v16 }
 0x8b9   : > { %4983 = vpow2.f32 %v2935_v49  ;;  %v4978_v3 = vpop.eup %4977 }
 0x8ba   : > { %v4980_v18 = vpop.eup %4979  ;;  %4985 = vpow2.f32 %v2929_v5 }
 0x8bb   : > { %3054 = vmatmul.bf16.gmra.mxu2 %v3035_v0  ;;  %4987 = vpow2.f32 %v2931_v28 }
 0x8bc   : > { %3081 = vmatpush.bf16.xpose.msra.mxu2 %v6730_v47  ;;  %v2829_v47 = vsub.f32 %v6490_v52, %v2751_v56  ;;  %3073 = vmatmul.bf16.gmra.mxu3 %v3036_v20 }
 0x8bd   : > { %3100 = vmatpush.bf16.xpose.msra.mxu3 %v6735_v7  ;;  %v3010_v7 = vpack.c.bf16 %v4976_v24, %v4972_v48  ;;  %v3188_v24 = vpop.permute.xlu0 %3187 }
 0x8be   : > { %3148 = vmatpush.bf16.xpose.msra.mxu0 %v3009_v2  ;;  %v2925_v41 = vmul.f32 1.442695, %v2829_v47  ;;  %v4982_v52 = vpop.eup %4981 }
 0x8bf   : > { %3161 = vmatpush.bf16.xpose.msra.mxu1 %v3010_v7  ;;  %v4984_v27 = vpop.eup %4983  ;;  %v3007_v58 = vpack.c.bf16 %v4978_v3, %v4982_v52  ;;  %v3190_v3 = vpop.permute.xlu2 %3189 }
 0x8c0   : > { %4989 = vpow2.f32 %v2925_v41  ;;  %v3008_v11 = vpack.c.bf16 %v4980_v18, %v4984_v27  ;;  %v4986_v25 = vpop.eup %4985 }
 0x8c1   : > { %4991 = vpow2.f32 %v2927_v33 }
 0x8c4   : > { %3082 = vmatpush.bf16.xpose.msra.mxu2 %v6752_v29  ;;  %v4988_v29 = vpop.eup %4987 }
 0x8c5   : > { %3101 = vmatpush.bf16.xpose.msra.mxu3 %v6756_v31  ;;  %v3186_v48 = vpop.permute.xlu1 %3185 }
 0x8c6   : > { %3149 = vmatpush.bf16.xpose.msra.mxu0 %v3007_v58  ;;  %v4990_v50 = vpop.eup %4989 }
 0x8c7   : > { %3162 = vmatpush.bf16.xpose.msra.mxu1 %v3008_v11  ;;  %v4992_v31 = vpop.eup %4991  ;;  %v3005_v59 = vpack.c.bf16 %v4986_v25, %v4990_v50 }
 0x8c8   : > { %v3006_v26 = vpack.c.bf16 %v4988_v29, %v4992_v31 }
 0x8cc   : > { %3083 = vmatpush.bf16.xpose.msra.mxu2 %v3011_v53  ;;  %v3217_v53 = vunpack.c.l.b16 %v7760_v36 }
 0x8cd   : > { %3102 = vmatpush.bf16.xpose.msra.mxu3 %v3012_v46  ;;  %v3192_v50 = vpop.permute.xlu1 %3191 }
 0x8ce   : > { %3150 = vmatpush.bf16.xpose.msra.mxu0 %v3005_v59 }
 0x8cf   : > { %3163 = vmatpush.bf16.xpose.msra.mxu1 %v3006_v26 }
 0x8d4   : > { %3084 = vmatpush.bf16.xpose.msra.mxu2 %v3009_v2 }
 0x8d5   : > { %3103 = vmatpush.bf16.xpose.msra.mxu3 %v3010_v7  ;;  %3151 = vmatmul.bf16.vlgmr.msra.gmra.mxu0 %v7750_v19 }
 0x8d6   : > { %3164 = vmatmul.bf16.vlgmr.msra.gmra.mxu1 %v7750_v19 }
 0x8dc   : > { %3085 = vmatpush.bf16.xpose.msra.mxu2 %v3007_v58 }
 0x8dd   : > { %3104 = vmatpush.bf16.xpose.msra.mxu3 %v3008_v11 }
 0x8e4   : > { %3086 = vmatpush.bf16.xpose.msra.mxu2 %v3005_v59 }
 0x8e5   : > { %3105 = vmatpush.bf16.xpose.msra.mxu3 %v3006_v26 }
 0x8eb   : > { %3087 = vmatmul.bf16.vlgmr.msra.gmra.mxu2 %v6746_v12  ;;  %v7753_v12 = vld [vmem:[#allocation32_spill] sm:$0xff] }
 0x8ec   : > { %3117 = vmatpush.bf16.xpose.msrb.mxu2 %v6589_v38  ;;  %3106 = vmatmul.bf16.vlgmr.msra.gmra.mxu3 %v6749_v35  ;;  %v7751_v38 = vld [vmem:[#allocation18_spill] sm:$0xff]  ;;  %v7754_v35 = vld [vmem:[#allocation19_spill] sm:$0xff] }
 0x8ed   : > { %3130 = vmatpush.bf16.xpose.msrb.mxu3 %v6594_v17  ;;  %v7752_v17 = vld [vmem:[#allocation33_spill] sm:$0xff] }
 0x8f4   : > { %3118 = vmatpush.bf16.xpose.msrb.mxu2 %v6605_v60  ;;  %v7755_v60 = vld [vmem:[#allocation50_spill] sm:$0xff] }
 0x8f5   : > { %3131 = vmatpush.bf16.xpose.msrb.mxu3 %v6610_v37  ;;  %v7756_v37 = vld [vmem:[#allocation51_spill] sm:$0xff] }
 0x8f6   : > { %v841_v13 = vpack.c.bf16 %v7756_v37, %v7755_v60 }
 0x8f8   : > { %v3223_v4 = vunpack.c.l.b16 %v841_v13  ;;  %v3224_v39 = vunpack.c.h.b16 %v841_v13 }
 0x8fa   : > { %v3228_v63 = vpack.c.b16 %v3224_v39, %v3222_v44 }
 0x8fb   : > { %3092 = vmatmul.bf16.gmra.mxu2 %v3035_v0 }
 0x8fc   : > { %3119 = vmatpush.bf16.xpose.msrb.mxu2 %v6621_v54  ;;  %3111 = vmatmul.bf16.gmra.mxu3 %v3036_v20  ;;  %v7757_v54 = vld [vmem:[#allocation47_spill] sm:$0xff] }
 0x8fd   : > { %3132 = vmatpush.bf16.xpose.msrb.mxu3 %v6626_v51  ;;  %v7758_v51 = vld [vmem:[#allocation48_spill] sm:$0xff] }
 0x904   : > { %3120 = vmatpush.bf16.xpose.msrb.mxu2 %v6638_v10  ;;  %v839_v10 = vpack.c.bf16 %v7758_v51, %v7757_v54 }
 0x905   : > { %3133 = vmatpush.bf16.xpose.msrb.mxu3 %v6643_v43  ;;  %v3221_v43 = vunpack.c.l.b16 %v7759_v32 }
 0x906   : > { %v3219_v46 = vunpack.c.l.b16 %v839_v10  ;;  %v3220_v62 = vunpack.c.h.b16 %v839_v10 }
 0x907   : > { %v3227_v45 = vpack.c.b16 %v3223_v4, %v3221_v43  ;;  %v3198_v4 = vpop.permute.xlu1 %3197 }
 0x90c   : > { %3121 = vmatpush.bf16.xpose.msrb.mxu2 %v7751_v38 }
 0x90d   : > { %3134 = vmatpush.bf16.xpose.msrb.mxu3 %v7752_v17 }
 0x914   : > { %3122 = vmatpush.bf16.xpose.msrb.mxu2 %v7753_v12  ;;  %v3194_v12 = vpop.permute.xlu0 %3193 }
 0x915   : > { %3135 = vmatpush.bf16.xpose.msrb.mxu3 %v7754_v35  ;;  %v3196_v35 = vpop.permute.xlu2 %3195 }
 0x91c   : > { %3123 = vmatpush.bf16.xpose.msrb.mxu2 %v6710_v8  ;;  %v3225_v8 = vpack.c.b16 %v3219_v46, %v3217_v53 }
 0x91d   : > { %3136 = vmatpush.bf16.xpose.msrb.mxu3 %v6714_v21  ;;  %v3226_v21 = vpack.c.b16 %v3220_v62, %v3218_v30 }
 0x924   : > { %3124 = vmatpush.bf16.xpose.msrb.mxu2 %v6728_v9 }
 0x925   : > { %3137 = vmatpush.bf16.xpose.msrb.mxu3 %v6733_v1 }
 0x92b   : > { %3125 = vmatmul.bf16.vlgmr.msrb.gmra.mxu2 %v7750_v19 }
 0x92c   : > { %3287 = vmatpush.bf16.msra.mxu2 %v3227_v45  ;;  %3138 = vmatmul.bf16.vlgmr.msrb.gmra.mxu3 %v7750_v19 }
 0x92d   : > { %3376 = vmatpush.bf16.msra.mxu3 %v3228_v63 }
 0x92e   : > { %v3050_v6 = vpop.f32.mrf.mxu2 }
 0x92f   : > { %v3069_v40 = vpop.f32.mrf.mxu3 }
 0x930   : > { %3288 = vmatpush.bf16.msra.mxu2 %v3225_v8  ;;  %v6812_v9 = vadd.f32 %v3069_v40, %v3050_v6 }
 0x931   : > { %3377 = vmatpush.bf16.msra.mxu3 %v3226_v21 }
 0x936   : > { %v3052_v1 = vpop.f32.mrf.mxu2 }
 0x937   : > { %v3071_v14 = vpop.f32.mrf.mxu3 }
 0x938   : > { %v3072_v32 = vadd.f32 %v3071_v14, %v3052_v1  ;;  %v3202_v14 = vpop.permute.xlu2 %3201 }
 0x93b   : > { %4469 = vmatmul.msk.bf16.vlgmr.msra.gmra.mxu2 %vm958_vm0, %v3182_v22 }
 0x93c   : > { %4485 = vmatmul.msk.bf16.vlgmr.msra.gmra.mxu3 %vm958_vm0, %v3182_v22  ;;  %v3200_v22 = vpop.permute.xlu0 %3199 }
 0x93e   : > { %v3055_v34 = vpop.f32.mrf.mxu2 }
 0x93f   : > { %v3074_v57 = vpop.f32.mrf.mxu3 }
 0x940   : > { %v3075_v16 = vadd.f32 %v3074_v57, %v3055_v34 }
 0x946   : > { %v3057_v23 = vpop.f32.mrf.mxu2 }
 0x947   : > { %v3076_v20 = vpop.f32.mrf.mxu3 }
 0x948   : > { %v3077_v43 = vadd.f32 %v3076_v20, %v3057_v23 }
 0x94b   : > { %4470 = vmatmul.msk.bf16.gmra.mxu2 %vm958_vm0, %v3184_v15 }
 0x94c   : > { %4486 = vmatmul.msk.bf16.gmra.mxu3 %vm958_vm0, %v3184_v15 }
 0x952   : > { %v3152_v56 = vpop.f32.mrf.mxu0 }
 0x953   : > { %v3165_v49 = vpop.f32.mrf.mxu1 }
 0x954   : > { %v3166_v42 = vadd.f32 %v3165_v49, %v3152_v56 }
 0x956   : > { %4993 = vrcp.f32 %v3166_v42 }
 0x95a   : > { %v3154_v61 = vpop.f32.mrf.mxu0 }
 0x95b   : > { %4471 = vmatmul.msk.bf16.gmra.mxu2 %vm958_vm0, %v3186_v48  ;;  %v3167_v0 = vpop.f32.mrf.mxu1 }
 0x95c   : > { %4487 = vmatmul.msk.bf16.gmra.mxu3 %vm958_vm0, %v3186_v48  ;;  %v4994_v2 = vpop.eup %4993  ;;  %v3204_v48 = vpop.permute.xlu1 %3203 }
 0x95d   : > { %v3172_v47 = vperm.slane %v4994_v2, 0  ;;  %v3206_v0 = vpop.permute.xlu0 %3205 }
 0x96b   : > { %4472 = vmatmul.msk.bf16.gmra.mxu2 %vm958_vm0, %v3188_v24 }
 0x96c   : > { %4488 = vmatmul.msk.bf16.gmra.mxu3 %vm958_vm0, %v3188_v24 }
 0x96e   : > { %v3088_v7 = vpop.f32.mrf.mxu2 }
 0x96f   : > { %v3107_v55 = vpop.f32.mrf.mxu3 }
 0x970   : > { %v3108_v5 = vadd.f32 %v3107_v55, %v3088_v7 }
 0x972   : > { %v6820_v28 = vmul.f32 %v3172_v47, %v3108_v5 }
 0x974   : > { %7761 = vst [vmem:[#allocation43_spill] sm:$0xff] %v6820_v28 }
 0x976   : > { %v3090_v41 = vpop.f32.mrf.mxu2 }
 0x977   : > { %v3109_v18 = vpop.f32.mrf.mxu3 }
 0x978   : > { %v3110_v33 = vadd.f32 %v3109_v18, %v3090_v41  ;;  %v3210_v41 = vpop.permute.xlu1 %3209 }
 0x97a   : > { %v6824_v52 = vmul.f32 %v3172_v47, %v3110_v33 }
 0x97b   : > { %4473 = vmatmul.msk.bf16.gmra.mxu2 %vm958_vm0, %v3190_v3 }
 0x97c   : > { %4489 = vmatmul.msk.bf16.gmra.mxu3 %vm958_vm0, %v3190_v3  ;;  %7762 = vst [vmem:[#allocation38_spill] sm:$0xff] %v6824_v52 }
 0x97e   : > { %v3093_v58 = vpop.f32.mrf.mxu2 }
 0x97f   : > { %v3112_v11 = vpop.f32.mrf.mxu3 }
 0x980   : > { %v3113_v25 = vadd.f32 %v3112_v11, %v3093_v58 }
 0x982   : > { %v6828_v29 = vmul.f32 %v3172_v47, %v3113_v25 }
 0x984   : > { %7763 = vst [vmem:[#allocation42_spill] sm:$0xff] %v6828_v29 }
 0x986   : > { %v3095_v31 = vpop.f32.mrf.mxu2 }
 0x987   : > { %v3114_v59 = vpop.f32.mrf.mxu3 }
 0x988   : > { %v3115_v26 = vadd.f32 %v3114_v59, %v3095_v31  ;;  %v3212_v31 = vpop.permute.xlu0 %3211 }
 0x98a   : > { %v6832_v38 = vmul.f32 %v3172_v47, %v3115_v26  ;;  %v3208_v47 = vpop.permute.xlu2 %3207 }
 0x98b   : > { %4474 = vmatmul.msk.bf16.gmra.mxu2 %vm958_vm0, %v3192_v50 }
 0x98c   : > { %4490 = vmatmul.msk.bf16.gmra.mxu3 %vm958_vm0, %v3192_v50  ;;  %7764 = vst [vmem:[#allocation45_spill] sm:$0xff] %v6832_v38 }
 0x99b   : > { %4475 = vmatmul.msk.bf16.gmra.mxu2 %vm958_vm0, %v3194_v12 }
 0x99c   : > { %4491 = vmatmul.msk.bf16.gmra.mxu3 %vm958_vm0, %v3194_v12 }
 0x9ab   : > { %4476 = vmatmul.msk.bf16.gmra.mxu2 %vm958_vm0, %v3196_v35 }
 0x9ac   : > { %4492 = vmatmul.msk.bf16.gmra.mxu3 %vm958_vm0, %v3196_v35 }
 0x9ae   : > { %v3126_v60 = vpop.f32.mrf.mxu2 }
 0x9af   : > { %v3139_v37 = vpop.f32.mrf.mxu3 }
 0x9b0   : > { %v3140_v13 = vadd.f32 %v3139_v37, %v3126_v60 }
 0x9b2   : > { %4995 = vrcp.f32 %v3140_v13 }
 0x9b6   : > { %v3128_v54 = vpop.f32.mrf.mxu2 }
 0x9b7   : > { %v3141_v51 = vpop.f32.mrf.mxu3 }
 0x9b8   : > { %v4996_v10 = vpop.eup %4995 }
 0x9b9   : > { %v3171_v44 = vperm.slane %v4996_v10, 0 }
 0x9bb   : > { %v6840_v39 = vmul.f32 %v3171_v44, %v3075_v16  ;;  %v6842_v36 = vmul.f32 %v3171_v44, %v3077_v43  ;;  %v6845_v53 = vmul.f32 %v3171_v44, %v6812_v9  ;;  %v6847_v30 = vmul.f32 %v3171_v44, %v3072_v32  ;;  %4477 = vmatmul.msk.bf16.gmra.mxu2 %vm958_vm0, %v3198_v4 }
 0x9bc   : > { %4493 = vmatmul.msk.bf16.gmra.mxu3 %vm958_vm0, %v3198_v4 }
 0x9bd   : > { %7765 = vst [vmem:[#allocation40_spill] sm:$0xff] %v6840_v39 }
 0x9be   : > { %7766 = vst [vmem:[#allocation44_spill] sm:$0xff] %v6842_v36  ;;  %v6855_v45 = vpop.f32.mrf.mxu2 }
 0x9bf   : > { %7767 = vst [vmem:[#allocation3_spill] sm:$0xff] %v6845_v53  ;;  %v6857_v63 = vpop.f32.mrf.mxu3 }
 0x9c0   : > { %7768 = vst [vmem:[#allocation5_spill] sm:$0xff] %v6847_v30 }
 0x9c6   : > { %v6859_v8 = vpop.f32.mrf.mxu2 }
 0x9c7   : > { %v6861_v21 = vpop.f32.mrf.mxu3 }
 0x9c8   : > { %7769 = vst [vmem:[#allocation12_spill] sm:$0xff] %v6861_v21 }
 0x9cb   : > { %4478 = vmatmul.msk.bf16.gmra.mxu2 %vm958_vm0, %v3200_v22 }
 0x9cc   : > { %4494 = vmatmul.msk.bf16.gmra.mxu3 %vm958_vm0, %v3200_v22 }
 0x9ce   : > { %v6865_v6 = vpop.f32.mrf.mxu2 }
 0x9cf   : > { %v6867_v40 = vpop.f32.mrf.mxu3 }
 0x9d6   : > { %v6869_v9 = vpop.f32.mrf.mxu2 }
 0x9d7   : > { %v6871_v1 = vpop.f32.mrf.mxu3 }
 0x9db   : > { %4479 = vmatmul.msk.bf16.gmra.mxu2 %vm958_vm0, %v3202_v14 }
 0x9dc   : > { %4495 = vmatmul.msk.bf16.gmra.mxu3 %vm958_vm0, %v3202_v14 }
 0x9de   : > { %v6875_v15 = vpop.f32.mrf.mxu2 }
 0x9df   : > { %v6877_v34 = vpop.f32.mrf.mxu3 }
 0x9e6   : > { %v6879_v57 = vpop.f32.mrf.mxu2 }
 0x9e7   : > { %v6881_v16 = vpop.f32.mrf.mxu3 }
 0x9eb   : > { %4480 = vmatmul.msk.bf16.gmra.mxu2 %vm958_vm0, %v3204_v48 }
 0x9ec   : > { %4496 = vmatmul.msk.bf16.gmra.mxu3 %vm958_vm0, %v3204_v48 }
 0x9ee   : > { %v6885_v56 = vpop.f32.mrf.mxu2 }
 0x9ef   : > { %v6887_v49 = vpop.f32.mrf.mxu3 }
 0x9f0   : > { %v3477_v12 = vmax.f32 %v6885_v56, %v6887_v49 }
 0x9f6   : > { %v6889_v42 = vpop.f32.mrf.mxu2 }
 0x9f7   : > { %v6891_v61 = vpop.f32.mrf.mxu3 }
 0x9f8   : > { %v3480_v22 = vmax.f32 %v6889_v42, %v6891_v61 }
 0x9fb   : > { %4481 = vmatmul.msk.bf16.gmra.mxu2 %vm958_vm0, %v3206_v0 }
 0x9fc   : > { %4497 = vmatmul.msk.bf16.gmra.mxu3 %vm958_vm0, %v3206_v0 }
 0x9fe   : > { %v6895_v24 = vpop.f32.mrf.mxu2 }
 0x9ff   : > { %v6897_v23 = vpop.f32.mrf.mxu3 }
 0xa00   : > { %v3483_v32 = vmax.f32 %v6895_v24, %v6897_v23 }
 0xa06   : > { %v6899_v20 = vpop.f32.mrf.mxu2 }
 0xa07   : > { %v6901_v2 = vpop.f32.mrf.mxu3 }
 0xa08   : > { %v3486_v14 = vmax.f32 %v6899_v20, %v6901_v2 }
 0xa0b   : > { %4482 = vmatmul.msk.bf16.gmra.mxu2 %vm958_vm0, %v3208_v47 }
 0xa0c   : > { %4498 = vmatmul.msk.bf16.gmra.mxu3 %vm958_vm0, %v3208_v47  ;;  %v3471_v47 = vmax.f32 %v6875_v15, %v6877_v34 }
 0xa0e   : > { %v6905_v7 = vpop.f32.mrf.mxu2 }
 0xa0f   : > { %v6907_v55 = vpop.f32.mrf.mxu3 }
 0xa10   : > { %v3489_v43 = vmax.f32 %v6905_v7, %v6907_v55 }
 0xa16   : > { %v6909_v5 = vpop.f32.mrf.mxu2 }
 0xa17   : > { %v6911_v3 = vpop.f32.mrf.mxu3 }
 0xa18   : > { %v3492_v50 = vmax.f32 %v6909_v5, %v6911_v3 }
 0xa1b   : > { %4483 = vmatmul.msk.bf16.gmra.mxu2 %vm958_vm0, %v3210_v41 }
 0xa1c   : > { %4499 = vmatmul.msk.bf16.gmra.mxu3 %vm958_vm0, %v3210_v41  ;;  %v3474_v41 = vmax.f32 %v6879_v57, %v6881_v16 }
 0xa1e   : > { %v6915_v18 = vpop.f32.mrf.mxu2 }
 0xa1f   : > { %v6917_v33 = vpop.f32.mrf.mxu3 }
 0xa20   : > { %v3495_v58 = vmax.f32 %v6915_v18, %v6917_v33 }
 0xa22   : > { %3496 = vmax.xlane.f32.xlu0 %v3495_v58 }
 0xa26   : > { %v6921_v11 = vpop.f32.mrf.mxu2 }
 0xa27   : > { %v6923_v25 = vpop.f32.mrf.mxu3 }
 0xa28   : > { %v3498_v13 = vmax.f32 %v6921_v11, %v6923_v25 }
 0xa2a   : > { %3493 = vmax.xlane.f32.xlu0 %v3492_v50 }
 0xa2b   : > { %4484 = vmatmul.msk.bf16.gmra.mxu2 %vm958_vm0, %v3212_v31 }
 0xa2c   : > { %4500 = vmatmul.msk.bf16.gmra.mxu3 %vm958_vm0, %v3212_v31 }
 0xa2e   : > { %v3325_v59 = vpop.f32.mrf.mxu2 }
 0xa2f   : > { %v6929_v26 = vpop.f32.mrf.mxu3 }
 0xa30   : > { %v3501_v35 = vmax.f32 %v3325_v59, %v6929_v26 }
 0xa32   : > { %3478 = vmax.xlane.f32.xlu0 %v3477_v12  ;;  %3502 = vmax.xlane.f32.xlu2 %v3501_v35 }
 0xa36   : > { %v6934_v60 = vpop.f32.mrf.mxu2 }
 0xa37   : > { %v6936_v37 = vpop.f32.mrf.mxu3 }
 0xa38   : > { %v3504_v54 = vmax.f32 %v6934_v60, %v6936_v37 }
 0xa3a   : > { %3499 = vmax.xlane.f32.xlu2 %v3498_v13  ;;  %3505 = vmax.xlane.f32.xlu1 %v3504_v54 }
 0xa3e   : > { %v6942_v51 = vpop.f32.mrf.mxu2 }
 0xa3f   : > { %v6944_v10 = vpop.f32.mrf.mxu3 }
 0xa42   : > { %3484 = vmax.xlane.f32.xlu2 %v3483_v32  ;;  %3490 = vmax.xlane.f32.xlu1 %v3489_v43 }
 0xa46   : > { %v6950_v44 = vpop.f32.mrf.mxu2 }
 0xa47   : > { %7770 = vst [vmem:[#allocation2_spill] sm:$0xff] %v6950_v44  ;;  %v6952_v4 = vpop.f32.mrf.mxu3 }
 0xa48   : > { %7771 = vst [vmem:[#allocation4_spill] sm:$0xff] %v6952_v4 }
 0xa4a   : > { %3481 = vmax.xlane.f32.xlu2 %v3480_v22  ;;  %3487 = vmax.xlane.f32.xlu1 %v3486_v14 }
 0xa4e   : > { %v6958_v48 = vpop.f32.mrf.mxu2 }
 0xa4f   : > { %7772 = vst [vmem:[#allocation20_spill] sm:$0xff] %v6958_v48  ;;  %v6960_v0 = vpop.f32.mrf.mxu3 }
 0xa52   : > { %3472 = vmax.xlane.f32.xlu2 %v3471_v47  ;;  %3475 = vmax.xlane.f32.xlu1 %v3474_v41 }
 0xa56   : > { %v6966_v58 = vpop.f32.mrf.mxu2 }
 0xa57   : > { %7773 = vst [vmem:[#allocation6_spill] sm:$0xff] %v6966_v58  ;;  %v6968_v50 = vpop.f32.mrf.mxu3 }
 0xa58   : > { %7774 = vst [vmem:[#allocation10_spill] sm:$0xff] %v6968_v50 }
 0xa5e   : > { %v6970_v31 = vpop.f32.mrf.mxu2 }
 0xa5f   : > { %7775 = vst [vmem:[#allocation23_spill] sm:$0xff] %v6970_v31  ;;  %v6972_v12 = vpop.f32.mrf.mxu3 }
 0xa60   : > { %7776 = vst [vmem:[#allocation13_spill] sm:$0xff] %v6972_v12 }
 0xa66   : > { %v6974_v35 = vpop.f32.mrf.mxu2 }
 0xa67   : > { %v6976_v13 = vpop.f32.mrf.mxu3 }
 0xa6e   : > { %v6978_v54 = vpop.f32.mrf.mxu2 }
 0xa6f   : > { %v6980_v32 = vpop.f32.mrf.mxu3 }
 0xa76   : > { %v6982_v43 = vpop.f32.mrf.mxu2 }
 0xa77   : > { %v6984_v22 = vpop.f32.mrf.mxu3 }
 0xa7e   : > { %v6986_v14 = vpop.f32.mrf.mxu2 }
 0xa7f   : > { %v6988_v47 = vpop.f32.mrf.mxu3 }
 0xa86   : > { %v6990_v41 = vpop.f32.mrf.mxu2 }
 0xa87   : > { %v6992_v62 = vpop.f32.mrf.mxu3 }
 0xa8e   : > { %v6994_v46 = vpop.f32.mrf.mxu2 }
 0xa8f   : > { %v6996_v27 = vpop.f32.mrf.mxu3 }
 0xa90   : > { %7777 = vst [vmem:[#allocation16_spill] sm:$0xff] %v6996_v27 }
 0xa95   : > { %v3497_v44 = vpop.xlane.xlu0 %3496 }
 0xa96   : > { %v6998_v17 = vpop.f32.mrf.mxu2 }
 0xa97   : > { %v7000_v53 = vpop.f32.mrf.mxu3 }
 0xa9e   : > { %v7002_v30 = vpop.f32.mrf.mxu2 }
 0xa9f   : > { %7778 = vst [vmem:[#allocation26_spill] sm:$0xff] %v7002_v30  ;;  %v7004_v39 = vpop.f32.mrf.mxu3 }
 0xaa0   : > { %7779 = vst [vmem:[#allocation21_spill] sm:$0xff] %v7004_v39  ;;  %v3543_v36 = vmax.f32 %v7002_v30, %v7004_v39 }
 0xaa2   : > { %3544 = vmax.xlane.f32.xlu0 %v3543_v36 }
 0xaa5   : > { %v3503_v28 = vpop.xlane.xlu2 %3502 }
 0xaa6   : > { %v7008_v52 = vpop.f32.mrf.mxu2  ;;  %v3583_v19 = vsub.f32 %v3325_v59, %v3503_v28  ;;  %v3584_v58 = vsub.f32 %v6929_v26, %v3503_v28 }
 0xaa7   : > { %v7010_v29 = vpop.f32.mrf.mxu3 }
 0xaa8   : > { %7780 = vst [vmem:[#allocation22_spill] sm:$0xff] %v7010_v29  ;;  %v3546_v38 = vmax.f32 %v7008_v52, %v7010_v29  ;;  %v3675_v4 = vmul.f32 1.442695, %v3583_v19  ;;  %v3677_v39 = vmul.f32 1.442695, %v3584_v58  ;;  %v3537_v29 = vmax.f32 %v6994_v46, %v6996_v27 }
 0xaaa   : > { %3547 = vmax.xlane.f32.xlu2 %v3546_v38  ;;  %4997 = vpow2.f32 %v3675_v4 }
 0xaab   : > { %4999 = vpow2.f32 %v3677_v39  ;;  %v3465_v39 = vmax.f32 %v6865_v6, %v6867_v40 }
 0xaad   : > { %v3506_v50 = vpop.xlane.xlu1 %3505  ;;  %v3500_v31 = vpop.xlane.xlu2 %3499 }
 0xaae   : > { %v3585_v12 = vsub.f32 %v6934_v60, %v3506_v50  ;;  %v3586_v36 = vsub.f32 %v6936_v37, %v3506_v50  ;;  %v7017_v30 = vpop.f32.mrf.mxu2  ;;  %v3581_v19 = vsub.f32 %v6921_v11, %v3500_v31  ;;  %v3582_v26 = vsub.f32 %v6923_v25, %v3500_v31 }
 0xaaf   : > { %v7019_v48 = vpop.f32.mrf.mxu3  ;;  %v3579_v60 = vsub.f32 %v6915_v18, %v3497_v44  ;;  %v3580_v37 = vsub.f32 %v6917_v33, %v3497_v44  ;;  %v3494_v44 = vpop.xlane.xlu0 %3493 }
 0xab0   : > { %v3679_v59 = vmul.f32 1.442695, %v3585_v12  ;;  %v3549_v28 = vmax.f32 %v7017_v30, %v7019_v48  ;;  %v3681_v38 = vmul.f32 1.442695, %v3586_v36  ;;  %v3671_v50 = vmul.f32 1.442695, %v3581_v19  ;;  %v4998_v4 = vpop.eup %4997 }
 0xab1   : > { %v3673_v12 = vmul.f32 1.442695, %v3582_v26  ;;  %v3667_v11 = vmul.f32 1.442695, %v3579_v60  ;;  %v5000_v33 = vpop.eup %4999  ;;  %v3669_v25 = vmul.f32 1.442695, %v3580_v37  ;;  %v3577_v60 = vsub.f32 %v6909_v5, %v3494_v44 }
 0xab2   : > { %3538 = vmax.xlane.f32.xlu2 %v3537_v29  ;;  %3550 = vmax.xlane.f32.xlu1 %v3549_v28  ;;  %5001 = vpow2.f32 %v3679_v59  ;;  %v3462_v29 = vmax.f32 %v6859_v8, %v6861_v21  ;;  %v3578_v37 = vsub.f32 %v6911_v3, %v3494_v44 }
 0xab3   : > { %5003 = vpow2.f32 %v3681_v38  ;;  %v3663_v5 = vmul.f32 1.442695, %v3577_v60 }
 0xab4   : > { %5005 = vpow2.f32 %v3671_v50  ;;  %v3665_v3 = vmul.f32 1.442695, %v3578_v37 }
 0xab5   : > { %v3491_v58 = vpop.xlane.xlu1 %3490  ;;  %v3485_v31 = vpop.xlane.xlu2 %3484  ;;  %5007 = vpow2.f32 %v3673_v12 }
 0xab6   : > { %v7029_v27 = vpop.f32.mrf.mxu2  ;;  %v3575_v28 = vsub.f32 %v6905_v7, %v3491_v58  ;;  %v3576_v19 = vsub.f32 %v6907_v55, %v3491_v58  ;;  %5009 = vpow2.f32 %v3667_v11  ;;  %v3525_v55 = vmax.f32 %v6978_v54, %v6980_v32 }
 0xab7   : > { %v7031_v36 = vpop.f32.mrf.mxu3  ;;  %5011 = vpow2.f32 %v3669_v25  ;;  %v3540_v58 = vmax.f32 %v6998_v17, %v7000_v53 }
 0xab8   : > { %v3552_v18 = vmax.f32 %v7029_v27, %v7031_v36  ;;  %v5002_v59 = vpop.eup %5001  ;;  %v3659_v7 = vmul.f32 1.442695, %v3575_v28  ;;  %v3661_v50 = vmul.f32 1.442695, %v3576_v19  ;;  %v3571_v28 = vsub.f32 %v6895_v24, %v3485_v31 }
 0xab9   : > { %v5004_v38 = vpop.eup %5003  ;;  %v7041_v26 = vpack.c.bf16 %v5002_v59, %v4998_v4  ;;  %v3572_v19 = vsub.f32 %v6897_v23, %v3485_v31 }
 0xaba   : > { %3463 = vmax.xlane.f32.xlu2 %v3462_v29  ;;  %3466 = vmax.xlane.f32.xlu1 %v3465_v39  ;;  %v7044_v21 = vpack.c.bf16 %v5004_v38, %v5000_v33  ;;  %v5006_v29 = vpop.eup %5005  ;;  %v3468_v39 = vmax.f32 %v6869_v9, %v6871_v1  ;;  %5013 = vpow2.f32 %v3659_v7  ;;  %v3531_v7 = vmax.f32 %v6986_v14, %v6988_v47 }
 0xabb   : > { %3553 = vmax.xlane.f32.xlu0 %v3552_v18  ;;  %3799 = vmatpush.bf16.xpose.msrb.mxu0 %v7041_v26  ;;  %v5008_v4 = vpop.eup %5007  ;;  %5015 = vpow2.f32 %v3661_v50  ;;  %v3651_v50 = vmul.f32 1.442695, %v3571_v28  ;;  %v3653_v23 = vmul.f32 1.442695, %v3572_v19 }
 0xabc   : > { %3818 = vmatpush.bf16.xpose.msrb.mxu1 %v7044_v21  ;;  %v5010_v11 = vpop.eup %5009  ;;  %5017 = vpow2.f32 %v3663_v5 }
 0xabd   : > { %v3488_v12 = vpop.xlane.xlu1 %3487  ;;  %v5012_v33 = vpop.eup %5011  ;;  %v7057_v59 = vpack.c.bf16 %v5006_v29, %v5010_v11  ;;  %5019 = vpow2.f32 %v3665_v3 }
 0xabe   : > { %v3573_v18 = vsub.f32 %v6899_v20, %v3488_v12  ;;  %v3482_v25 = vpop.xlane.xlu2 %3481  ;;  %v3574_v44 = vsub.f32 %v6901_v2, %v3488_v12  ;;  %v7060_v38 = vpack.c.bf16 %v5008_v4, %v5012_v33  ;;  %v3522_v2 = vmax.f32 %v6974_v35, %v6976_v13  ;;  %v3479_v29 = vpop.xlane.xlu0 %3478 }
 0xabf   : > { %v3459_v12 = vmax.f32 %v6855_v45, %v6857_v63  ;;  %v3570_v5 = vsub.f32 %v6891_v61, %v3482_v25  ;;  %v3568_v11 = vsub.f32 %v6887_v49, %v3479_v29 }
 0xac0   : > { %v3655_v20 = vmul.f32 1.442695, %v3573_v18  ;;  %v3657_v60 = vmul.f32 1.442695, %v3574_v44  ;;  %v5014_v37 = vpop.eup %5013  ;;  %v3507_v44 = vmax.f32 %v6942_v51, %v6944_v10 }
 0xac1   : > { %v5016_v24 = vpop.eup %5015  ;;  %v3649_v33 = vmul.f32 1.442695, %v3570_v5  ;;  %v7782_v5 = vld [vmem:[#allocation13_spill] sm:$0xff] }
 0xac2   : > { %3526 = vmax.xlane.f32.xlu2 %v3525_v55  ;;  %3541 = vmax.xlane.f32.xlu1 %v3540_v58  ;;  %v5018_v31 = vpop.eup %5017  ;;  %v3569_v55 = vsub.f32 %v6889_v42, %v3482_v25  ;;  %5021 = vpow2.f32 %v3655_v20  ;;  %v3534_v20 = vmax.f32 %v6990_v41, %v6992_v62 }
 0xac3   : > { %3469 = vmax.xlane.f32.xlu0 %v3468_v39  ;;  %3800 = vmatpush.bf16.xpose.msrb.mxu0 %v7057_v59  ;;  %v5020_v58 = vpop.eup %5019  ;;  %5023 = vpow2.f32 %v3657_v60  ;;  %v7073_v4 = vpack.c.bf16 %v5018_v31, %v5014_v37  ;;  %v3567_v39 = vsub.f32 %v6885_v56, %v3479_v29  ;;  %v3528_v56 = vmax.f32 %v6982_v43, %v6984_v22 }
 0xac4   : > { %3819 = vmatpush.bf16.xpose.msrb.mxu1 %v7060_v38  ;;  %5025 = vpow2.f32 %v3651_v50  ;;  %v7076_v3 = vpack.c.bf16 %v5020_v58, %v5016_v24  ;;  %v3647_v42 = vmul.f32 1.442695, %v3569_v55  ;;  %v3645_v60 = vmul.f32 1.442695, %v3568_v11  ;;  %v7781_v55 = vld [vmem:[#allocation20_spill] sm:$0xff] }
 0xac5   : > { %5027 = vpow2.f32 %v3653_v23  ;;  %v3476_v61 = vpop.xlane.xlu1 %3475  ;;  %v3643_v28 = vmul.f32 1.442695, %v3567_v39  ;;  %v3513_v58 = vmax.f32 %v7781_v55, %v6960_v0  ;;  %v7783_v39 = vld [vmem:[#allocation23_spill] sm:$0xff] }
 0xac6   : > { %v3473_v18 = vpop.xlane.xlu2 %3472  ;;  %5029 = vpow2.f32 %v3647_v42  ;;  %v3566_v24 = vsub.f32 %v6881_v16, %v3476_v61  ;;  %v3519_v11 = vmax.f32 %v7783_v39, %v7782_v5 }
 0xac7   : > { %v3563_v19 = vsub.f32 %v6875_v15, %v3473_v18  ;;  %v3564_v37 = vsub.f32 %v6877_v34, %v3473_v18  ;;  %5031 = vpow2.f32 %v3649_v33 }
 0xac8   : > { %v5022_v25 = vpop.eup %5021  ;;  %5033 = vpow2.f32 %v3643_v28  ;;  %v7786_v28 = vld [vmem:[#allocation4_spill] sm:$0xff] }
 0xac9   : > { %v5024_v49 = vpop.eup %5023  ;;  %v3635_v15 = vmul.f32 1.442695, %v3563_v19  ;;  %5035 = vpow2.f32 %v3645_v60  ;;  %v3637_v23 = vmul.f32 1.442695, %v3564_v37  ;;  %v7787_v19 = vld [vmem:[#allocation2_spill] sm:$0xff] }
 0xaca   : > { %3523 = vmax.xlane.f32.xlu2 %v3522_v2  ;;  %3532 = vmax.xlane.f32.xlu1 %v3531_v7  ;;  %v5026_v2 = vpop.eup %5025  ;;  %v3565_v7 = vsub.f32 %v6879_v57, %v3476_v61  ;;  %v3641_v57 = vmul.f32 1.442695, %v3566_v24  ;;  %v7788_v60 = vld [vmem:[#allocation10_spill] sm:$0xff] }
 0xacb   : > { %3460 = vmax.xlane.f32.xlu0 %v3459_v12  ;;  %3801 = vmatpush.bf16.xpose.msrb.mxu0 %v7073_v4  ;;  %v5028_v50 = vpop.eup %5027  ;;  %v7091_v12 = vpack.c.bf16 %v5022_v25, %v5026_v2  ;;  %5037 = vpow2.f32 %v3635_v15  ;;  %v7789_v37 = vld [vmem:[#allocation6_spill] sm:$0xff] }
 0xacc   : > { %3820 = vmatpush.bf16.xpose.msrb.mxu1 %v7076_v3  ;;  %v7093_v29 = vpack.c.bf16 %v5024_v49, %v5028_v50  ;;  %v3639_v34 = vmul.f32 1.442695, %v3565_v7  ;;  %v5030_v31 = vpop.eup %5029  ;;  %5039 = vpow2.f32 %v3637_v23  ;;  %v3510_v49 = vmax.f32 %v7787_v19, %v7786_v28 }
 0xacd   : > { %v5032_v16 = vpop.eup %5031  ;;  %v3516_v2 = vmax.f32 %v7789_v37, %v7788_v60 }
 0xace   : > { %v5034_v18 = vpop.eup %5033  ;;  %5041 = vpow2.f32 %v3639_v34 }
 0xacf   : > { %v5036_v42 = vpop.eup %5035  ;;  %5043 = vpow2.f32 %v3641_v57  ;;  %v7101_v33 = vpack.c.bf16 %v5030_v31, %v5034_v18 }
 0xad0   : > { %v7103_v61 = vpack.c.bf16 %v5032_v16, %v5036_v42  ;;  %v7792_v42 = vld [vmem:[#allocation26_spill] sm:$0xff] }
 0xad1   : > { %7784 = vst [vmem:[#allocation25_spill] sm:$0xff] %v7101_v33  ;;  %v5038_v25 = vpop.eup %5037 }
 0xad2   : > { %3508 = vmax.xlane.f32.xlu2 %v3507_v44  ;;  %3529 = vmax.xlane.f32.xlu1 %v3528_v56  ;;  %7785 = vst [vmem:[#allocation24_spill] sm:$0xff] %v7103_v61  ;;  %v5040_v44 = vpop.eup %5039 }
 0xad3   : > { %3535 = vmax.xlane.f32.xlu0 %v3534_v20  ;;  %3802 = vmatpush.bf16.xpose.msrb.mxu0 %v7091_v12 }
 0xad4   : > { %3821 = vmatpush.bf16.xpose.msrb.mxu1 %v7093_v29  ;;  %v5042_v56 = vpop.eup %5041 }
 0xad5   : > { %v5044_v20 = vpop.eup %5043  ;;  %v7111_v7 = vpack.c.bf16 %v5042_v56, %v5038_v25  ;;  %v7793_v56 = vld [vmem:[#allocation21_spill] sm:$0xff] }
 0xad6   : > { %v7113_v50 = vpack.c.bf16 %v5044_v20, %v5040_v44 }
 0xad7   : > { %7790 = vst [vmem:[#allocation30_spill] sm:$0xff] %v7111_v7 }
 0xad8   : > { %7791 = vst [vmem:[#allocation59_spill] sm:$0xff] %v7113_v50 }
 0xada   : > { %3514 = vmax.xlane.f32.xlu1 %v3513_v58 }
 0xadb   : > { %3520 = vmax.xlane.f32.xlu0 %v3519_v11  ;;  %3803 = vmatpush.bf16.xpose.msrb.mxu0 %v7101_v33 }
 0xadc   : > { %3822 = vmatpush.bf16.xpose.msrb.mxu1 %v7103_v61 }
 0xae2   : > { %3511 = vmax.xlane.f32.xlu1 %v3510_v49 }
 0xae3   : > { %3517 = vmax.xlane.f32.xlu0 %v3516_v2  ;;  %3804 = vmatpush.bf16.xpose.msrb.mxu0 %v7111_v7  ;;  %v7794_v7 = vld [vmem:[#allocation22_spill] sm:$0xff] }
 0xae4   : > { %3823 = vmatpush.bf16.xpose.msrb.mxu1 %v7113_v50 }
 0xb15   : > { %v3545_v23 = vpop.xlane.xlu0 %3544 }
 0xb16   : > { %v3611_v25 = vsub.f32 %v7792_v42, %v3545_v23  ;;  %v3612_v49 = vsub.f32 %v7793_v56, %v3545_v23 }
 0xb18   : > { %v3731_v33 = vmul.f32 1.442695, %v3611_v25 }
 0xb1d   : > { %v3548_v24 = vpop.xlane.xlu2 %3547 }
 0xb1e   : > { %v3613_v2 = vsub.f32 %v7008_v52, %v3548_v24 }
 0xb25   : > { %v3551_v15 = vpop.xlane.xlu1 %3550  ;;  %v3539_v57 = vpop.xlane.xlu2 %3538 }
 0xb26   : > { %v3615_v34 = vsub.f32 %v7017_v30, %v3551_v15  ;;  %v3616_v31 = vsub.f32 %v7019_v48, %v3551_v15  ;;  %v3614_v30 = vsub.f32 %v7794_v7, %v3548_v24  ;;  %v3733_v15 = vmul.f32 1.442695, %v3612_v49 }
 0xb27   : > { %v3607_v24 = vsub.f32 %v6994_v46, %v3539_v57 }
 0xb28   : > { %v3739_v44 = vmul.f32 1.442695, %v3615_v34  ;;  %v3741_v20 = vmul.f32 1.442695, %v3616_v31  ;;  %v3737_v23 = vmul.f32 1.442695, %v3614_v30 }
 0xb2a   : > { %5045 = vpow2.f32 %v3739_v44 }
 0xb2b   : > { %5047 = vpow2.f32 %v3741_v20 }
 0xb2d   : > { %v3467_v58 = vpop.xlane.xlu1 %3466  ;;  %v3464_v31 = vpop.xlane.xlu2 %3463 }
 0xb2e   : > { %v3554_v16 = vpop.xlane.xlu0 %3553  ;;  %v3559_v48 = vsub.f32 %v6865_v6, %v3467_v58  ;;  %v7795_v6 = vld [vmem:[#allocation16_spill] sm:$0xff] }
 0xb2f   : > { %v3617_v11 = vsub.f32 %v7029_v27, %v3554_v16  ;;  %v3618_v18 = vsub.f32 %v7031_v36, %v3554_v16  ;;  %v3560_v27 = vsub.f32 %v6867_v40, %v3467_v58  ;;  %v3735_v16 = vmul.f32 1.442695, %v3613_v2 }
 0xb30   : > { %v5046_v40 = vpop.eup %5045 }
 0xb31   : > { %v3743_v50 = vmul.f32 1.442695, %v3617_v11  ;;  %v3745_v61 = vmul.f32 1.442695, %v3618_v18  ;;  %v3627_v11 = vmul.f32 1.442695, %v3559_v48  ;;  %v3608_v18 = vsub.f32 %v7795_v6, %v3539_v57  ;;  %v5048_v25 = vpop.eup %5047 }
 0xb32   : > { %v3629_v42 = vmul.f32 1.442695, %v3560_v27 }
 0xb33   : > { %5049 = vpow2.f32 %v3743_v50  ;;  %v3557_v50 = vsub.f32 %v6859_v8, %v3464_v31  ;;  %v3725_v49 = vmul.f32 1.442695, %v3608_v18 }
 0xb34   : > { %5051 = vpow2.f32 %v3745_v61  ;;  %v7796_v61 = vld [vmem:[#allocation12_spill] sm:$0xff] }
 0xb35   : > { %v3542_v36 = vpop.xlane.xlu1 %3541  ;;  %5053 = vpow2.f32 %v3731_v33  ;;  %v3558_v44 = vsub.f32 %v7796_v61, %v3464_v31  ;;  %v3623_v8 = vmul.f32 1.442695, %v3557_v50 }
 0xb36   : > { %v3470_v34 = vpop.xlane.xlu0 %3469  ;;  %5055 = vpow2.f32 %v3733_v15  ;;  %v3609_v46 = vsub.f32 %v6998_v17, %v3542_v36  ;;  %v3610_v57 = vsub.f32 %v7000_v53, %v3542_v36 }
 0xb37   : > { %v3561_v52 = vsub.f32 %v6869_v9, %v3470_v34  ;;  %v3562_v7 = vsub.f32 %v6871_v1, %v3470_v34  ;;  %5057 = vpow2.f32 %v3735_v16  ;;  %v3723_v1 = vmul.f32 1.442695, %v3607_v24 }
 0xb38   : > { %5059 = vpow2.f32 %v3737_v23  ;;  %v3625_v27 = vmul.f32 1.442695, %v3558_v44  ;;  %v3727_v23 = vmul.f32 1.442695, %v3609_v46  ;;  %v3729_v31 = vmul.f32 1.442695, %v3610_v57  ;;  %v3527_v46 = vpop.xlane.xlu2 %3526 }
 0xb39   : > { %v3631_v58 = vmul.f32 1.442695, %v3561_v52  ;;  %v3633_v9 = vmul.f32 1.442695, %v3562_v7  ;;  %v5050_v56 = vpop.eup %5049  ;;  %5061 = vpow2.f32 %v3627_v11 }
 0xb3a   : > { %v5052_v33 = vpop.eup %5051  ;;  %5063 = vpow2.f32 %v3629_v42  ;;  %v7135_v20 = vpack.c.bf16 %v5050_v56, %v5046_v40 }
 0xb3b   : > { %v5054_v2 = vpop.eup %5053  ;;  %5065 = vpow2.f32 %v3631_v58  ;;  %v7137_v30 = vpack.c.bf16 %v5052_v33, %v5048_v25 }
 0xb3c   : > { %v5056_v15 = vpop.eup %5055  ;;  %5067 = vpow2.f32 %v3633_v9  ;;  %3901 = vmatpush.bf16.xpose.msrb.mxu2 %v7135_v20 }
 0xb3d   : > { %v3533_v16 = vpop.xlane.xlu1 %3532  ;;  %v5058_v34 = vpop.eup %5057  ;;  %5069 = vpow2.f32 %v3723_v1  ;;  %3914 = vmatpush.bf16.xpose.msrb.mxu3 %v7137_v30 }
 0xb3e   : > { %v3461_v48 = vpop.xlane.xlu0 %3460  ;;  %v5060_v36 = vpop.eup %5059  ;;  %5071 = vpow2.f32 %v3725_v49  ;;  %v3604_v42 = vsub.f32 %v6988_v47, %v3533_v16 }
 0xb3f   : > { %v3555_v17 = vsub.f32 %v6855_v45, %v3461_v48  ;;  %v3556_v53 = vsub.f32 %v6857_v63, %v3461_v48  ;;  %v5062_v52 = vpop.eup %5061  ;;  %5073 = vpow2.f32 %v3623_v8  ;;  %v3603_v45 = vsub.f32 %v6986_v14, %v3533_v16  ;;  %v7798_v16 = vld [vmem:[#allocation9_spill] sm:$0xff] }
 0xb40   : > { %v5064_v24 = vpop.eup %5063  ;;  %5075 = vpow2.f32 %v3625_v27  ;;  %v7147_v63 = vpack.c.bf16 %v5058_v34, %v5054_v2  ;;  %v7151_v25 = vpack.c.bf16 %v5060_v36, %v5056_v15  ;;  %v3717_v33 = vmul.f32 1.442695, %v3604_v42  ;;  %v7797_v27 = vld [vmem:[#allocation8_spill] sm:$0xff] }
 0xb41   : > { %v3619_v7 = vmul.f32 1.442695, %v3555_v17  ;;  %v3621_v11 = vmul.f32 1.442695, %v3556_v53  ;;  %v5066_v6 = vpop.eup %5065  ;;  %5077 = vpow2.f32 %v3727_v23  ;;  %v3715_v9 = vmul.f32 1.442695, %v3603_v45 }
 0xb42   : > { %v5068_v18 = vpop.eup %5067  ;;  %5079 = vpow2.f32 %v3729_v31  ;;  %v7145_v40 = vpack.c.bf16 %v5066_v6, %v5062_v52  ;;  %v3599_v36 = vsub.f32 %v6978_v54, %v3527_v46 }
 0xb43   : > { %v5070_v50 = vpop.eup %5069  ;;  %5081 = vpow2.f32 %v3619_v7  ;;  %v7149_v58 = vpack.c.bf16 %v5068_v18, %v5064_v24  ;;  %v3600_v7 = vsub.f32 %v6980_v32, %v3527_v46 }
 0xb44   : > { %v5072_v44 = vpop.eup %5071  ;;  %5083 = vpow2.f32 %v3621_v11  ;;  %3805 = vmatpush.bf16.xpose.msrb.mxu0 %v7145_v40  ;;  %3902 = vmatpush.bf16.xpose.msrb.mxu2 %v7147_v63  ;;  %v3707_v42 = vmul.f32 1.442695, %v3599_v36 }
 0xb45   : > { %v5074_v47 = vpop.eup %5073  ;;  %3824 = vmatpush.bf16.xpose.msrb.mxu1 %v7149_v58  ;;  %3915 = vmatpush.bf16.xpose.msrb.mxu3 %v7151_v25  ;;  %v3530_v49 = vpop.xlane.xlu1 %3529  ;;  %5085 = vpow2.f32 %v3715_v9 }
 0xb46   : > { %v3536_v61 = vpop.xlane.xlu0 %3535  ;;  %v5076_v1 = vpop.eup %5075  ;;  %v3601_v17 = vsub.f32 %v6982_v43, %v3530_v49  ;;  %5087 = vpow2.f32 %v3717_v33  ;;  %v3602_v23 = vsub.f32 %v6984_v22, %v3530_v49  ;;  %v7799_v22 = vld [vmem:[#allocation7_spill] sm:$0xff] }
 0xb47   : > { %v3605_v14 = vsub.f32 %v6990_v41, %v3536_v61  ;;  %v3606_v56 = vsub.f32 %v6992_v62, %v3536_v61  ;;  %v5078_v57 = vpop.eup %5077  ;;  %v855_v41 = vpack.c.bf16 %v7798_v16, %v7797_v27  ;;  %v3783_v24 = vunpack.c.l.b16 %v7799_v22  ;;  %v7801_v16 = vld [vmem:[#allocation15_spill] sm:$0xff] }
 0xb48   : > { %v5080_v8 = vpop.eup %5079  ;;  %v7165_v53 = vpack.c.bf16 %v5078_v57, %v5070_v50  ;;  %v3711_v6 = vmul.f32 1.442695, %v3601_v17  ;;  %v3784_v54 = vunpack.c.h.b16 %v7799_v22  ;;  %v3713_v18 = vmul.f32 1.442695, %v3602_v23 }
 0xb49   : > { %v3719_v2 = vmul.f32 1.442695, %v3605_v14  ;;  %v3721_v48 = vmul.f32 1.442695, %v3606_v56  ;;  %v5082_v15 = vpop.eup %5081  ;;  %v7170_v52 = vpack.c.bf16 %v5080_v8, %v5072_v44  ;;  %v3785_v11 = vunpack.c.l.b16 %v855_v41  ;;  %v3524_v44 = vpop.xlane.xlu2 %3523 }
 0xb4a   : > { %v5084_v34 = vpop.eup %5083  ;;  %v7163_v62 = vpack.c.bf16 %v5074_v47, %v5082_v15  ;;  %v3786_v45 = vunpack.c.h.b16 %v855_v41  ;;  %v3709_v61 = vmul.f32 1.442695, %v3600_v7  ;;  %v3598_v49 = vsub.f32 %v6976_v13, %v3524_v44  ;;  %v7800_v13 = vld [vmem:[#allocation14_spill] sm:$0xff] }
 0xb4b   : > { %5089 = vpow2.f32 %v3719_v2  ;;  %v7168_v31 = vpack.c.bf16 %v5076_v1, %v5084_v34  ;;  %v5086_v32 = vpop.eup %5085  ;;  %v7181_v47 = vpack.c.b16 %v3785_v11, %v3783_v24  ;;  %v857_v41 = vpack.c.bf16 %v7801_v16, %v7800_v13 }
 0xb4c   : > { %5091 = vpow2.f32 %v3721_v48  ;;  %3806 = vmatpush.bf16.xpose.msrb.mxu0 %v7163_v62  ;;  %3903 = vmatpush.bf16.xpose.msrb.mxu2 %v7165_v53  ;;  %v5088_v50 = vpop.eup %5087  ;;  %v7184_v1 = vpack.c.b16 %v3786_v45, %v3784_v54  ;;  %v3705_v15 = vmul.f32 1.442695, %v3598_v49 }
 0xb4d   : > { %3825 = vmatpush.bf16.xpose.msrb.mxu1 %v7168_v31  ;;  %3916 = vmatpush.bf16.xpose.msrb.mxu3 %v7170_v52  ;;  %5093 = vpow2.f32 %v3711_v6  ;;  %v3515_v57 = vpop.xlane.xlu1 %3514  ;;  %v3789_v24 = vunpack.c.l.b16 %v857_v41  ;;  %v3790_v6 = vunpack.c.h.b16 %v857_v41 }
 0xb4e   : > { %v3521_v43 = vpop.xlane.xlu0 %3520  ;;  %5095 = vpow2.f32 %v3713_v18  ;;  %v3592_v7 = vsub.f32 %v6960_v0, %v3515_v57 }
 0xb4f   : > { %v3595_v9 = vsub.f32 %v7783_v39, %v3521_v43  ;;  %v3596_v46 = vsub.f32 %v7782_v5, %v3521_v43  ;;  %5097 = vpow2.f32 %v3707_v42  ;;  %v7802_v43 = vld [vmem:[#allocation11_spill] sm:$0xff] }
 0xb50   : > { %5099 = vpow2.f32 %v3709_v61  ;;  %v3787_v22 = vunpack.c.l.b16 %v7802_v43  ;;  %v3693_v0 = vmul.f32 1.442695, %v3592_v7 }
 0xb51   : > { %v5090_v14 = vpop.eup %5089  ;;  %v3699_v39 = vmul.f32 1.442695, %v3595_v9  ;;  %v3701_v5 = vmul.f32 1.442695, %v3596_v46 }
 0xb52   : > { %v5092_v56 = vpop.eup %5091  ;;  %v3793_v61 = vpack.c.b16 %v3789_v24, %v3787_v22 }
 0xb53   : > { %3807 = vmatmul.bf16.vlgmr.msrb.gmra.mxu0 %v7181_v47  ;;  %v7191_v33 = vpack.c.bf16 %v5092_v56, %v5088_v50  ;;  %v5094_v2 = vpop.eup %5093  ;;  %5101 = vpow2.f32 %v3699_v39 }
 0xb54   : > { %3837 = vmatpush.bf16.xpose.msra.mxu0 %v7135_v20  ;;  %v7187_v20 = vpack.c.bf16 %v5090_v14, %v5086_v32  ;;  %3826 = vmatmul.bf16.vlgmr.msrb.gmra.mxu1 %v7184_v1  ;;  %v5096_v48 = vpop.eup %5095  ;;  %5103 = vpow2.f32 %v3701_v5  ;;  %v3509_v32 = vpop.xlane.xlu2 %3508 }
 0xb55   : > { %3856 = vmatpush.bf16.xpose.msra.mxu1 %v7137_v30  ;;  %v3597_v30 = vsub.f32 %v6974_v35, %v3524_v44  ;;  %3917 = vmatpush.bf16.xpose.msrb.mxu3 %v7191_v33  ;;  %v5098_v27 = vpop.eup %5097  ;;  %v3512_v54 = vpop.xlane.xlu1 %3511  ;;  %v3588_v46 = vsub.f32 %v6944_v10, %v3509_v32 }
 0xb56   : > { %3904 = vmatpush.bf16.xpose.msrb.mxu2 %v7187_v20  ;;  %v3518_v35 = vpop.xlane.xlu0 %3517  ;;  %v5100_v34 = vpop.eup %5099  ;;  %v3769_v36 = vpack.c.bf16 %v5094_v2, %v5098_v27  ;;  %v3589_v50 = vsub.f32 %v7787_v19, %v3512_v54  ;;  %v3590_v14 = vsub.f32 %v7786_v28, %v3512_v54  ;;  %v7803_v27 = vmov 1065369472  }
 0xb57   : > { %v3703_v8 = vmul.f32 1.442695, %v3597_v30  ;;  %v3593_v17 = vsub.f32 %v7789_v37, %v3518_v35  ;;  %v3594_v23 = vsub.f32 %v7788_v60, %v3518_v35  ;;  %v3788_v37 = vunpack.c.h.b16 %v7802_v43 }
 0xb58   : > { %v3687_v30 = vmul.f32 1.442695, %v3589_v50  ;;  %v3689_v19 = vmul.f32 1.442695, %v3590_v14  ;;  %v3685_v39 = vmul.f32 1.442695, %v3588_v46 }
 0xb59   : > { %5105 = vpow2.f32 %v3703_v8  ;;  %v3695_v11 = vmul.f32 1.442695, %v3593_v17  ;;  %v3697_v45 = vmul.f32 1.442695, %v3594_v23  ;;  %v3794_v9 = vpack.c.b16 %v3790_v6, %v3788_v37  ;;  %v7809_v14 = vld [vmem:[#allocation42_spill] sm:$0xff]  ;;  %v7814_v46 = vld [vmem:[#allocation61_spill] sm:$0xff] }
 0xb5a   : > { %5107 = vpow2.f32 %v3705_v15 }
 0xb5b   : > { %5109 = vpow2.f32 %v3695_v11 }
 0xb5c   : > { %3838 = vmatpush.bf16.xpose.msra.mxu0 %v7147_v63  ;;  %v3591_v63 = vsub.f32 %v7781_v55, %v3515_v57  ;;  %v5102_v55 = vpop.eup %5101  ;;  %5111 = vpow2.f32 %v3697_v45 }
 0xb5d   : > { %3857 = vmatpush.bf16.xpose.msra.mxu1 %v7151_v25  ;;  %v3770_v25 = vpack.c.bf16 %v5096_v48, %v5100_v34  ;;  %v5104_v18 = vpop.eup %5103 }
 0xb5e   : > { %3905 = vmatpush.bf16.xpose.msrb.mxu2 %v3769_v36  ;;  %v3691_v60 = vmul.f32 1.442695, %v3591_v63 }
 0xb5f   : > { %3918 = vmatpush.bf16.xpose.msrb.mxu3 %v3770_v25  ;;  %v5106_v42 = vpop.eup %5105 }
 0xb60   : > { %v5108_v44 = vpop.eup %5107  ;;  %v3767_v56 = vpack.c.bf16 %v5106_v42, %v5102_v55  ;;  %5113 = vpow2.f32 %v3691_v60 }
 0xb61   : > { %5115 = vpow2.f32 %v3693_v0  ;;  %v5110_v28 = vpop.eup %5109 }
 0xb62   : > { %v5112_v57 = vpop.eup %5111  ;;  %5117 = vpow2.f32 %v3687_v30  ;;  %v7815_v30 = vld [vmem:[#allocation62_spill] sm:$0xff] }
 0xb63   : > { %3812 = vmatmul.bf16.gmra.mxu0 %v3793_v61  ;;  %5119 = vpow2.f32 %v3689_v19  ;;  %v7816_v19 = vpack.c.bf16 %v7814_v46, %v7815_v30  ;;  %v4568_v46 = vld [vmem:[%s7372_s2 + $0x38] sm:$0xff]  ;;  %v320_v30 = vld [vmem:[%s7373_s3 + $0x40] sm:$0xff] }
 0xb64   : > { %3839 = vmatpush.bf16.xpose.msra.mxu0 %v7165_v53  ;;  %v3587_v53 = vsub.f32 %v6942_v51, %v3509_v32  ;;  %3831 = vmatmul.bf16.gmra.mxu1 %v3794_v9 }
 0xb65   : > { %3858 = vmatpush.bf16.xpose.msra.mxu1 %v7170_v52  ;;  %v3768_v52 = vpack.c.bf16 %v5108_v44, %v5104_v18  ;;  %v7808_v44 = vld [vmem:[#allocation45_spill] sm:$0xff] }
 0xb66   : > { %3906 = vmatpush.bf16.xpose.msrb.mxu2 %v3767_v56  ;;  %v3683_v49 = vmul.f32 1.442695, %v3587_v53  ;;  %v5114_v51 = vpop.eup %5113  ;;  %v7812_v53 = vld [vmem:[#allocation43_spill] sm:$0xff] }
 0xb67   : > { %3919 = vmatpush.bf16.xpose.msrb.mxu3 %v3768_v52  ;;  %v5116_v5 = vpop.eup %5115  ;;  %v3765_v35 = vpack.c.bf16 %v5110_v28, %v5114_v51  ;;  %v7817_v28 = vld [vmem:[#allocation57_spill] sm:$0xff] }
 0xb68   : > { %5121 = vpow2.f32 %v3683_v49  ;;  %v3766_v10 = vpack.c.bf16 %v5112_v57, %v5116_v5  ;;  %v5118_v2 = vpop.eup %5117  ;;  %v7818_v49 = vld [vmem:[#allocation58_spill] sm:$0xff]  ;;  %v7821_v51 = vld [vmem:[#allocation29_spill] sm:$0xff] }
 0xb69   : > { %5123 = vpow2.f32 %v3685_v39  ;;  %v7819_v57 = vpack.c.bf16 %v7817_v28, %v7818_v49  ;;  %v7820_v39 = vld [vmem:[#allocation17_spill] sm:$0xff]  ;;  %v325_v28 = vld [vmem:[%s7373_s3 + $0x68] sm:$0xff]  ;;  %v326_v49 = vld [vmem:[%s7373_s3 + $0x70] sm:$0xff] }
 0xb6a   : > { %v7822_v5 = vpack.c.bf16 %v7820_v39, %v7821_v51 }
 0xb6c   : > { %3840 = vmatpush.bf16.xpose.msra.mxu0 %v7187_v20  ;;  %v5120_v20 = vpop.eup %5119 }
 0xb6d   : > { %3859 = vmatpush.bf16.xpose.msra.mxu1 %v7191_v33 }
 0xb6e   : > { %3907 = vmatpush.bf16.xpose.msrb.mxu2 %v3765_v35  ;;  %v5122_v8 = vpop.eup %5121 }
 0xb6f   : > { %3920 = vmatpush.bf16.xpose.msrb.mxu3 %v3766_v10  ;;  %v5124_v33 = vpop.eup %5123  ;;  %v3763_v48 = vpack.c.bf16 %v5118_v2, %v5122_v8  ;;  %v7823_v8 = vld [vmem:[#allocation28_spill] sm:$0xff] }
 0xb70   : > { %v3764_v15 = vpack.c.bf16 %v5120_v20, %v5124_v33  ;;  %v4561_v20 = vld [vmem:[%s7372_s2] sm:$0xff]  ;;  %v7824_v33 = vld [vmem:[#allocation27_spill] sm:$0xff] }
 0xb74   : > { %3841 = vmatpush.bf16.xpose.msra.mxu0 %v3769_v36 }
 0xb75   : > { %3860 = vmatpush.bf16.xpose.msra.mxu1 %v3770_v25 }
 0xb76   : > { %3908 = vmatpush.bf16.xpose.msrb.mxu2 %v3763_v48 }
 0xb77   : > { %3921 = vmatpush.bf16.xpose.msrb.mxu3 %v3764_v15 }
 0xb7c   : > { %3842 = vmatpush.bf16.xpose.msra.mxu0 %v3767_v56  ;;  %v7811_v56 = vld [vmem:[#allocation38_spill] sm:$0xff] }
 0xb7d   : > { %3861 = vmatpush.bf16.xpose.msra.mxu1 %v3768_v52  ;;  %3909 = vmatmul.bf16.vlgmr.msrb.gmra.mxu2 %v7803_v27  ;;  %v7813_v52 = vpack.c.bf16 %v7811_v56, %v7812_v53  ;;  %v324_v56 = vld [vmem:[%s7373_s3 + $0x60] sm:$0xff]  ;;  %v327_v53 = vld [vmem:[%s7373_s3 + $0x78] sm:$0xff] }
 0xb7e   : > { %3922 = vmatmul.bf16.vlgmr.msrb.gmra.mxu3 %v7803_v27 }
 0xb84   : > { %3843 = vmatpush.bf16.xpose.msra.mxu0 %v3765_v35 }
 0xb85   : > { %3862 = vmatpush.bf16.xpose.msra.mxu1 %v3766_v10 }
 0xb8c   : > { %3844 = vmatpush.bf16.xpose.msra.mxu0 %v3763_v48  ;;  %v7825_v48 = vpack.c.bf16 %v7823_v8, %v7824_v33 }
 0xb8d   : > { %3863 = vmatpush.bf16.xpose.msra.mxu1 %v3764_v15 }
 0xb93   : > { %3845 = vmatmul.bf16.vlgmr.msra.gmra.mxu0 %v7181_v47  ;;  %v7806_v47 = vld [vmem:[#allocation30_spill] sm:$0xff] }
 0xb94   : > { %3875 = vmatpush.bf16.xpose.msrb.mxu0 %v7041_v26  ;;  %3864 = vmatmul.bf16.vlgmr.msra.gmra.mxu1 %v7184_v1  ;;  %v7804_v26 = vld [vmem:[#allocation25_spill] sm:$0xff]  ;;  %v7807_v1 = vld [vmem:[#allocation59_spill] sm:$0xff] }
 0xb95   : > { %3888 = vmatpush.bf16.xpose.msrb.mxu1 %v7044_v21  ;;  %v7805_v21 = vld [vmem:[#allocation24_spill] sm:$0xff] }
 0xb9c   : > { %3876 = vmatpush.bf16.xpose.msrb.mxu0 %v7057_v59 }
 0xb9d   : > { %3889 = vmatpush.bf16.xpose.msrb.mxu1 %v7060_v38 }
 0xba3   : > { %3850 = vmatmul.bf16.gmra.mxu0 %v3793_v61 }
 0xba4   : > { %3877 = vmatpush.bf16.xpose.msrb.mxu0 %v7073_v4  ;;  %3869 = vmatmul.bf16.gmra.mxu1 %v3794_v9  ;;  %v7810_v9 = vpack.c.bf16 %v7808_v44, %v7809_v14  ;;  %v317_v44 = vld [vmem:[%s7373_s3 + $0x28] sm:$0xff] }
 0xba5   : > { %3890 = vmatpush.bf16.xpose.msrb.mxu1 %v7076_v3  ;;  %v321_v14 = vld [vmem:[%s7373_s3 + $0x48] sm:$0xff] }
 0xbac   : > { %3878 = vmatpush.bf16.xpose.msrb.mxu0 %v7091_v12 }
 0xbad   : > { %3891 = vmatpush.bf16.xpose.msrb.mxu1 %v7093_v29 }
 0xbb4   : > { %3879 = vmatpush.bf16.xpose.msrb.mxu0 %v7804_v26 }
 0xbb5   : > { %3892 = vmatpush.bf16.xpose.msrb.mxu1 %v7805_v21 }
 0xbbc   : > { %3880 = vmatpush.bf16.xpose.msrb.mxu0 %v7806_v47 }
 0xbbd   : > { %3893 = vmatpush.bf16.xpose.msrb.mxu1 %v7807_v1 }
 0xbc4   : > { %3881 = vmatpush.bf16.xpose.msrb.mxu0 %v7145_v40 }
 0xbc5   : > { %3894 = vmatpush.bf16.xpose.msrb.mxu1 %v7149_v58 }
 0xbcc   : > { %3882 = vmatpush.bf16.xpose.msrb.mxu0 %v7163_v62 }
 0xbcd   : > { %3895 = vmatpush.bf16.xpose.msrb.mxu1 %v7168_v31 }
 0xbd0   : > { %v3808_v59 = vpop.f32.mrf.mxu0 }
 0xbd1   : > { %v3827_v38 = vpop.f32.mrf.mxu1 }
 0xbd2   : > { %v3828_v4 = vadd.f32 %v3827_v38, %v3808_v59 }
 0xbd3   : > { %3883 = vmatmul.bf16.vlgmr.msrb.gmra.mxu0 %v7803_v27 }
 0xbd4   : > { %3896 = vmatmul.bf16.vlgmr.msrb.gmra.mxu1 %v7803_v27 }
 0xbd8   : > { %v3810_v3 = vpop.f32.mrf.mxu0 }
 0xbd9   : > { %v3829_v12 = vpop.f32.mrf.mxu1 }
 0xbda   : > { %v3830_v47 = vadd.f32 %v3829_v12, %v3810_v3  ;;  %v312_v3 = vld [vmem:[%s7373_s3] sm:$0xff]  ;;  %v7830_v12 = vld [vmem:[#allocation3_spill] sm:$0xff] }
 0xbe0   : > { %v3813_v29 = vpop.f32.mrf.mxu0 }
 0xbe1   : > { %v3832_v13 = vpop.f32.mrf.mxu1 }
 0xbe2   : > { %v3833_v16 = vadd.f32 %v3832_v13, %v3813_v29 }
 0xbe8   : > { %v3815_v41 = vpop.f32.mrf.mxu0 }
 0xbe9   : > { %v3834_v40 = vpop.f32.mrf.mxu1 }
 0xbea   : > { %v3835_v17 = vadd.f32 %v3834_v40, %v3815_v41  ;;  %v4562_v41 = vld [vmem:[%s7372_s2 + $0x8] sm:$0xff] }
 0xc00   : > { %v3910_v58 = vpop.f32.mrf.mxu2 }
 0xc01   : > { %v3923_v34 = vpop.f32.mrf.mxu3 }
 0xc02   : > { %v3924_v7 = vadd.f32 %v3923_v34, %v3910_v58  ;;  %v7826_v58 = vld [vmem:[#allocation44_spill] sm:$0xff] }
 0xc03   : > { %v7827_v34 = vld [vmem:[#allocation40_spill] sm:$0xff] }
 0xc04   : > { %5125 = vrcp.f32 %v3924_v7  ;;  %v7836_v7 = vld [vmem:[#allocation67_spill] sm:$0xff] }
 0xc08   : > { %v3912_v62 = vpop.f32.mrf.mxu2 }
 0xc09   : > { %v3925_v23 = vpop.f32.mrf.mxu3  ;;  %v7828_v62 = vpack.c.bf16 %v7826_v58, %v7827_v34 }
 0xc0a   : > { %v5126_v24 = vpop.eup %5125  ;;  %v5141_v23 = vmov 0  }
 0xc0b   : > { %v3930_v54 = vperm.slane %v5126_v24, 0  ;;  %4598 = vset.pattern.permute.xlu0 %v5141_v23  ;;  %4600 = vset.pattern.permute.xlu1 %v5141_v23  ;;  %v7839_v24 = vld [vmem:[#allocation52_spill] sm:$0xff] }
 0xc0c   : > { %3957 = vperm.xlu0 %4598, %v312_v3   ;;  %4599 = vset.pattern.permute.xlu2 %v5141_v23 }
 0xc10   : > { %v3846_v31 = vpop.f32.mrf.mxu0 }
 0xc11   : > { %v3865_v36 = vpop.f32.mrf.mxu1 }
 0xc12   : > { %v3866_v60 = vadd.f32 %v3865_v36, %v3846_v31  ;;  %v7833_v31 = vld [vmem:[#allocation65_spill] sm:$0xff] }
 0xc14   : > { %v3932_v50 = vmul.f32 %v3930_v54, %v3866_v60  ;;  %v313_v60 = vld [vmem:[%s7373_s3 + $0x8] sm:$0xff] }
 0xc15   : > { %3962 = vperm.xlu2 %4599, %v313_v60  }
 0xc18   : > { %v3848_v63 = vpop.f32.mrf.mxu0 }
 0xc19   : > { %v3867_v25 = vpop.f32.mrf.mxu1 }
 0xc1a   : > { %v3868_v45 = vadd.f32 %v3867_v25, %v3848_v63  ;;  %v4563_v63 = vld [vmem:[%s7372_s2 + $0x10] sm:$0xff] }
 0xc1b   : > { %v7835_v25 = vld [vmem:[#allocation56_spill] sm:$0xff] }
 0xc1c   : > { %v3934_v0 = vmul.f32 %v3930_v54, %v3868_v45 }
 0xc1e   : > { %v3952_v61 = vpack.c.bf16 %v3934_v0, %v3932_v50  ;;  %v315_v0 = vld [vmem:[%s7373_s3 + $0x18] sm:$0xff] }
 0xc1f   : > { %3972 = vperm.xlu2 %4599, %v315_v0   ;;  %v319_v50 = vld [vmem:[%s7373_s3 + $0x38] sm:$0xff] }
 0xc20   : > { %v3851_v43 = vpop.f32.mrf.mxu0  ;;  %3992 = vperm.xlu0 %4598, %v319_v50  }
 0xc21   : > { %v3870_v22 = vpop.f32.mrf.mxu1 }
 0xc22   : > { %v3871_v11 = vadd.f32 %v3870_v22, %v3851_v43  ;;  %v7837_v43 = vpack.c.bf16 %v7835_v25, %v7836_v7  ;;  %v7838_v22 = vld [vmem:[#allocation53_spill] sm:$0xff] }
 0xc24   : > { %v3936_v18 = vmul.f32 %v3930_v54, %v3871_v11  ;;  %v7840_v11 = vpack.c.bf16 %v7838_v22, %v7839_v24 }
 0xc27   : > { %3982 = vperm.xlu2 %4599, %v317_v44  }
 0xc28   : > { %v3853_v37 = vpop.f32.mrf.mxu0 }
 0xc29   : > { %v3872_v6 = vpop.f32.mrf.mxu1 }
 0xc2a   : > { %v3873_v55 = vadd.f32 %v3872_v6, %v3853_v37  ;;  %v314_v37 = vld [vmem:[%s7373_s3 + $0x10] sm:$0xff]  ;;  %v7841_v6 = vld [vmem:[#allocation55_spill] sm:$0xff] }
 0xc2b   : > { %3967 = vperm.xlu1 %4600, %v314_v37  }
 0xc2c   : > { %v3938_v32 = vmul.f32 %v3930_v54, %v3873_v55  ;;  %v7842_v54 = vld [vmem:[#allocation54_spill] sm:$0xff]  ;;  %v4564_v55 = vld [vmem:[%s7372_s2 + $0x18] sm:$0xff] }
 0xc2d   : > { %v7843_v45 = vpack.c.bf16 %v7841_v6, %v7842_v54 }
 0xc2e   : > { %v3954_v42 = vpack.c.bf16 %v3938_v32, %v3936_v18  ;;  %v316_v18 = vld [vmem:[%s7373_s3 + $0x20] sm:$0xff] }
 0xc2f   : > { %v4565_v32 = vld [vmem:[%s7372_s2 + $0x20] sm:$0xff]  ;;  %3997 = vperm.xlu2 %4599, %v320_v30  }
 0xc30   : > { %4132 = vmatpush.bf16.msra.mxu1 %v3954_v42  ;;  %v318_v42 = vld [vmem:[%s7373_s3 + $0x30] sm:$0xff] }
 0xc33   : > { %3977 = vperm.xlu1 %4600, %v316_v18  }
 0xc34   : > { %4133 = vmatpush.bf16.msra.mxu1 %v3952_v61  ;;  %v4566_v61 = vld [vmem:[%s7372_s2 + $0x28] sm:$0xff] }
 0xc38   : > { %4134 = vmatpush.bf16.msra.mxu1 %v7810_v9  ;;  %v4567_v9 = vld [vmem:[%s7372_s2 + $0x30] sm:$0xff] }
 0xc3b   : > { %3987 = vperm.xlu1 %4600, %v318_v42  }
 0xc3c   : > { %4135 = vmatpush.bf16.msra.mxu1 %v7813_v52  ;;  %v322_v52 = vld [vmem:[%s7373_s3 + $0x50] sm:$0xff] }
 0xc3d   : > { %4007 = vperm.xlu0 %4598, %v322_v52  }
 0xc40   : > { %4136 = vmatpush.bf16.msra.mxu1 %v7816_v19  ;;  %v323_v19 = vld [vmem:[%s7373_s3 + $0x58] sm:$0xff] }
 0xc41   : > { %4012 = vperm.xlu2 %4599, %v323_v19  }
 0xc43   : > { %4002 = vperm.xlu1 %4600, %v321_v14  }
 0xc44   : > { %4137 = vmatpush.bf16.msra.mxu1 %v7819_v57 }
 0xc45   : > { %4022 = vperm.xlu0 %4598, %v325_v28  }
 0xc48   : > { %4138 = vmatpush.bf16.msra.mxu1 %v7822_v5 }
 0xc49   : > { %4027 = vperm.xlu2 %4599, %v326_v49  }
 0xc4b   : > { %4017 = vperm.xlu1 %4600, %v324_v56  }
 0xc4c   : > { %4139 = vmatpush.bf16.msra.mxu1 %v7825_v48 }
 0xc4f   : > { %4140 = vmatmul.bf16.vlgmr.msra.gmra.mxu1 %v4561_v20 }
 0xc50   : > { %v3884_v35 = vpop.f32.mrf.mxu0 }
 0xc51   : > { %v3897_v10 = vpop.f32.mrf.mxu1 }
 0xc52   : > { %v3898_v2 = vadd.f32 %v3897_v10, %v3884_v35 }
 0xc53   : > { %4032 = vperm.xlu1 %4600, %v327_v53  }
 0xc54   : > { %5127 = vrcp.f32 %v3898_v2 }
 0xc58   : > { %v3886_v15 = vpop.f32.mrf.mxu0 }
 0xc59   : > { %v3899_v27 = vpop.f32.mrf.mxu1 }
 0xc5a   : > { %v5128_v26 = vpop.eup %5127 }
 0xc5b   : > { %v3929_v21 = vperm.slane %v5128_v26, 0 }
 0xc5d   : > { %v3935_v1 = vmul.f32 %v3929_v21, %v3833_v16  ;;  %v3937_v59 = vmul.f32 %v3929_v21, %v3835_v17  ;;  %v3931_v29 = vmul.f32 %v3929_v21, %v3828_v4  ;;  %v3933_v13 = vmul.f32 %v3929_v21, %v3830_v47  ;;  %v7829_v4 = vld [vmem:[#allocation5_spill] sm:$0xff]  ;;  %v7832_v17 = vld [vmem:[#allocation66_spill] sm:$0xff] }
 0xc5e   : > { %v7831_v16 = vpack.c.bf16 %v7829_v4, %v7830_v12  ;;  %v7834_v36 = vpack.c.bf16 %v7832_v17, %v7833_v31 }
 0xc5f   : > { %v3953_v38 = vpack.c.bf16 %v3937_v59, %v3935_v1  ;;  %v3951_v40 = vpack.c.bf16 %v3933_v13, %v3931_v29  ;;  %4145 = vmatmul.bf16.gmra.mxu1 %v4562_v41 }
 0xc61   : > { %4083 = vmatpush.bf16.msra.mxu0 %v3953_v38 }
 0xc65   : > { %4084 = vmatpush.bf16.msra.mxu0 %v3951_v40 }
 0xc69   : > { %4085 = vmatpush.bf16.msra.mxu0 %v7828_v62 }
 0xc6d   : > { %4086 = vmatpush.bf16.msra.mxu0 %v7831_v16 }
 0xc6f   : > { %4150 = vmatmul.bf16.gmra.mxu1 %v4563_v63  ;;  %v3963_v33 = vpop.permute.xlu2 %3962 }
 0xc71   : > { %4087 = vmatpush.bf16.msra.mxu0 %v7834_v36 }
 0xc75   : > { %4088 = vmatpush.bf16.msra.mxu0 %v7837_v43 }
 0xc79   : > { %4089 = vmatpush.bf16.msra.mxu0 %v7840_v11 }
 0xc7d   : > { %4090 = vmatpush.bf16.msra.mxu0 %v7843_v45 }
 0xc7e   : > { %v3958_v5 = vpop.permute.xlu0 %3957 }
 0xc7f   : > { %4155 = vmatmul.bf16.gmra.mxu1 %v4564_v55 }
 0xc80   : > { %4091 = vmatmul.bf16.vlgmr.msra.gmra.mxu0 %v4561_v20 }
 0xc8f   : > { %4160 = vmatmul.bf16.gmra.mxu1 %v4565_v32 }
 0xc90   : > { %4096 = vmatmul.bf16.gmra.mxu0 %v4562_v41  ;;  %v3973_v41 = vpop.permute.xlu2 %3972 }
 0xc92   : > { %v3993_v45 = vpop.permute.xlu0 %3992 }
 0xc98   : > { %v3983_v36 = vpop.permute.xlu2 %3982 }
 0xc9d   : > { %v3968_v47 = vpop.permute.xlu1 %3967 }
 0xc9f   : > { %4165 = vmatmul.bf16.gmra.mxu1 %v4566_v61 }
 0xca0   : > { %4101 = vmatmul.bf16.gmra.mxu0 %v4563_v63  ;;  %v3998_v42 = vpop.permute.xlu2 %3997 }
 0xca5   : > { %v3978_v3 = vpop.permute.xlu1 %3977 }
 0xcad   : > { %v3988_v22 = vpop.permute.xlu1 %3987 }
 0xcaf   : > { %4170 = vmatmul.bf16.gmra.mxu1 %v4567_v9  ;;  %v4008_v19 = vpop.permute.xlu0 %4007 }
 0xcb0   : > { %4106 = vmatmul.bf16.gmra.mxu0 %v4564_v55 }
 0xcb5   : > { %v4003_v56 = vpop.permute.xlu1 %4002 }
 0xcbf   : > { %4175 = vmatmul.bf16.gmra.mxu1 %v4568_v46 }
 0xcc0   : > { %4111 = vmatmul.bf16.gmra.mxu0 %v4565_v32 }
 0xccc   : > { %v4141_v57 = vpop.f32.mrf.mxu1 }
 0xccd   : > { %v4142_v10 = vadd.f32 %v4141_v57, %v3958_v5 }
 0xcd0   : > { %4116 = vmatmul.bf16.gmra.mxu0 %v4566_v61 }
 0xcd4   : > { %v4143_v39 = vpop.f32.mrf.mxu1 }
 0xcd5   : > { %v4144_v26 = vadd.f32 %v4143_v39, %v3963_v33 }
 0xcdc   : > { %v4146_v51 = vpop.f32.mrf.mxu1 }
 0xcdd   : > { %v4147_v1 = vadd.f32 %v4146_v51, %v3968_v47 }
 0xce0   : > { %4121 = vmatmul.bf16.gmra.mxu0 %v4567_v9 }
 0xce4   : > { %v4148_v35 = vpop.f32.mrf.mxu1 }
 0xce5   : > { %v4149_v34 = vadd.f32 %v4148_v35, %v3973_v41 }
 0xcec   : > { %v4151_v15 = vpop.f32.mrf.mxu1 }
 0xced   : > { %v4152_v4 = vadd.f32 %v4151_v15, %v3978_v3 }
 0xcf0   : > { %4126 = vmatmul.bf16.gmra.mxu0 %v4568_v46 }
 0xcf4   : > { %v4153_v29 = vpop.f32.mrf.mxu1 }
 0xcf5   : > { %v4154_v7 = vadd.f32 %v4153_v29, %v3983_v36 }
 0xcfc   : > { %v4156_v23 = vpop.f32.mrf.mxu1 }
 0xcfd   : > { %v4092_v2 = vpop.f32.mrf.mxu0  ;;  %v4157_v24 = vadd.f32 %v4156_v23, %v3988_v22 }
 0xcfe   : > { %v4093_v20 = vadd.f32 %v4092_v2, %v3958_v5  ;;  %v4013_v5 = vpop.permute.xlu2 %4012 }
 0xd00   : > { %v4181_v8 = vpack.c.bf16 %v4142_v10, %v4093_v20 }
 0xd02   : > { %4197 = vst [vmem:[%s7349_s27] sm:$0xff] %v4181_v8 }
 0xd04   : > { %v4158_v31 = vpop.f32.mrf.mxu1 }
 0xd05   : > { %v4094_v48 = vpop.f32.mrf.mxu0  ;;  %v4159_v18 = vadd.f32 %v4158_v31, %v3993_v45 }
 0xd06   : > { %v4095_v27 = vadd.f32 %v4094_v48, %v3963_v33  ;;  %v4018_v48 = vpop.permute.xlu1 %4017 }
 0xd08   : > { %v4182_v21 = vpack.c.bf16 %v4144_v26, %v4095_v27 }
 0xd0a   : > { %4198 = vst [vmem:[%s7349_s27 + $0x8] sm:$0xff] %v4182_v21 }
 0xd0c   : > { %v4161_v37 = vpop.f32.mrf.mxu1 }
 0xd0d   : > { %v4097_v59 = vpop.f32.mrf.mxu0  ;;  %v4162_v50 = vadd.f32 %v4161_v37, %v3998_v42 }
 0xd0e   : > { %v4098_v38 = vadd.f32 %v4097_v59, %v3968_v47  ;;  %v4023_v47 = vpop.permute.xlu0 %4022  ;;  %v4033_v23 = vpop.permute.xlu1 %4032 }
 0xd10   : > { %v4183_v13 = vpack.c.bf16 %v4147_v1, %v4098_v38 }
 0xd12   : > { %4199 = vst [vmem:[%s7349_s27 + $0x10] sm:$0xff] %v4183_v13 }
 0xd14   : > { %v4163_v32 = vpop.f32.mrf.mxu1 }
 0xd15   : > { %v4099_v40 = vpop.f32.mrf.mxu0  ;;  %v4164_v46 = vadd.f32 %v4163_v32, %v4003_v56 }
 0xd16   : > { %v4100_v58 = vadd.f32 %v4099_v40, %v3973_v41  ;;  %v4028_v41 = vpop.permute.xlu2 %4027 }
 0xd18   : > { %v4184_v62 = vpack.c.bf16 %v4149_v34, %v4100_v58 }
 0xd1a   : > { %4200 = vst [vmem:[%s7349_s27 + $0x18] sm:$0xff] %v4184_v62 }
 0xd1c   : > { %v4166_v9 = vpop.f32.mrf.mxu1 }
 0xd1d   : > { %v4102_v12 = vpop.f32.mrf.mxu0  ;;  %v4167_v49 = vadd.f32 %v4166_v9, %v4008_v19 }
 0xd1e   : > { %v4103_v16 = vadd.f32 %v4102_v12, %v3978_v3 }
 0xd20   : > { %v4185_v17 = vpack.c.bf16 %v4152_v4, %v4103_v16 }
 0xd22   : > { %4201 = vst [vmem:[%s7349_s27 + $0x20] sm:$0xff] %v4185_v17 }
 0xd24   : > { %v4168_v28 = vpop.f32.mrf.mxu1 }
 0xd25   : > { %v4104_v63 = vpop.f32.mrf.mxu0  ;;  %v4169_v20 = vadd.f32 %v4168_v28, %v4013_v5 }
 0xd26   : > { %v4105_v25 = vadd.f32 %v4104_v63, %v3983_v36 }
 0xd28   : > { %v4186_v43 = vpack.c.bf16 %v4154_v7, %v4105_v25 }
 0xd2a   : > { %4202 = vst [vmem:[%s7349_s27 + $0x28] sm:$0xff] %v4186_v43 }
 0xd2c   : > { %v4171_v10 = vpop.f32.mrf.mxu1 }
 0xd2d   : > { %v4107_v11 = vpop.f32.mrf.mxu0  ;;  %v4172_v27 = vadd.f32 %v4171_v10, %v4018_v48 }
 0xd2e   : > { %v4108_v6 = vadd.f32 %v4107_v11, %v3988_v22 }
 0xd30   : > { %v4187_v54 = vpack.c.bf16 %v4157_v24, %v4108_v6 }
 0xd32   : > { %4203 = vst [vmem:[%s7349_s27 + $0x30] sm:$0xff] %v4187_v54 }
 0xd34   : > { %v4173_v26 = vpop.f32.mrf.mxu1 }
 0xd35   : > { %v4109_v55 = vpop.f32.mrf.mxu0  ;;  %v4174_v38 = vadd.f32 %v4173_v26, %v4023_v47 }
 0xd36   : > { %v4110_v60 = vadd.f32 %v4109_v55, %v3993_v45 }
 0xd38   : > { %v4188_v0 = vpack.c.bf16 %v4159_v18, %v4110_v60 }
 0xd3a   : > { %4204 = vst [vmem:[%s7349_s27 + $0x38] sm:$0xff] %v4188_v0 }
 0xd3c   : > { %v4176_v13 = vpop.f32.mrf.mxu1 }
 0xd3d   : > { %v4112_v61 = vpop.f32.mrf.mxu0  ;;  %v4177_v34 = vadd.f32 %v4176_v13, %v4028_v41 }
 0xd3e   : > { %v4113_v44 = vadd.f32 %v4112_v61, %v3998_v42 }
 0xd40   : > { %v4189_v14 = vpack.c.bf16 %v4162_v50, %v4113_v44 }
 0xd42   : > { %4205 = vst [vmem:[%s7349_s27 + $0x40] sm:$0xff] %v4189_v14 }
 0xd44   : > { %v4178_v3 = vpop.f32.mrf.mxu1 }
 0xd45   : > { %v4114_v53 = vpop.f32.mrf.mxu0  ;;  %v4179_v16 = vadd.f32 %v4178_v3, %v4033_v23 }
 0xd46   : > { %v4115_v52 = vadd.f32 %v4114_v53, %v4003_v56 }
 0xd48   : > { %v4190_v30 = vpack.c.bf16 %v4164_v46, %v4115_v52 }
 0xd4a   : > { %4206 = vst [vmem:[%s7349_s27 + $0x48] sm:$0xff] %v4190_v30 }
 0xd4d   : > { %v4117_v57 = vpop.f32.mrf.mxu0 }
 0xd4e   : > { %v4118_v39 = vadd.f32 %v4117_v57, %v4008_v19 }
 0xd50   : > { %v4191_v51 = vpack.c.bf16 %v4167_v49, %v4118_v39 }
 0xd52   : > { %4207 = vst [vmem:[%s7349_s27 + $0x50] sm:$0xff] %v4191_v51 }
 0xd55   : > { %v4119_v35 = vpop.f32.mrf.mxu0 }
 0xd56   : > { %v4120_v2 = vadd.f32 %v4119_v35, %v4013_v5 }
 0xd58   : > { %v4192_v8 = vpack.c.bf16 %v4169_v20, %v4120_v2 }
 0xd5a   : > { %4208 = vst [vmem:[%s7349_s27 + $0x58] sm:$0xff] %v4192_v8 }
 0xd5d   : > { %v4122_v33 = vpop.f32.mrf.mxu0 }
 0xd5e   : > { %v4123_v15 = vadd.f32 %v4122_v33, %v4018_v48 }
 0xd60   : > { %v4193_v21 = vpack.c.bf16 %v4172_v27, %v4123_v15 }
 0xd62   : > { %4209 = vst [vmem:[%s7349_s27 + $0x60] sm:$0xff] %v4193_v21 }
 0xd65   : > { %v4124_v1 = vpop.f32.mrf.mxu0 }
 0xd66   : > { %v4125_v59 = vadd.f32 %v4124_v1, %v4023_v47 }
 0xd68   : > { %v4194_v29 = vpack.c.bf16 %v4174_v38, %v4125_v59 }
 0xd6a   : > { %4210 = vst [vmem:[%s7349_s27 + $0x68] sm:$0xff] %v4194_v29 }
 0xd6d   : > { %v4127_v40 = vpop.f32.mrf.mxu0 }
 0xd6e   : > { %v4128_v58 = vadd.f32 %v4127_v40, %v4028_v41 }
 0xd70   : > { %v4195_v62 = vpack.c.bf16 %v4177_v34, %v4128_v58 }
 0xd72   : > { %4211 = vst [vmem:[%s7349_s27 + $0x70] sm:$0xff] %v4195_v62 }
 0xd75   : > { %v4129_v4 = vpop.f32.mrf.mxu0 }
 0xd76   : > { %v4130_v12 = vadd.f32 %v4129_v4, %v4033_v23 }
 0xd78   : > { %v4196_v17 = vpack.c.bf16 %v4179_v16, %v4130_v12 }
 0xd7a   : > { %4212 = vst [vmem:[%s7349_s27 + $0x78] sm:$0xff] %v4196_v17 }
 0xd7b PF: > { %s14_s15 = sadd.s32 1, %s5135_s15  }
 0xd7c   : > { %p11_p4 = scmp.ge.s32.totalorder %s14_s15, 4  }
 0xd7e   :  { %13 = sbr.rel (!%p11_p4) target bundleno = 1 (0x1), region = 66 }

</bundles_post_ra>
